<compile_context>
chip_gen: v5e
topology: v5e:2x2
jax: 0.10.0
libtpu: 0.0.40
codegen_flags: <defaults>
</compile_context>

<pallas_src>
import jax
import jax.numpy as jnp
from jax.experimental import pallas as pl
from jax.experimental.pallas import tpu as pltpu

IMG = 96
D = IMG * IMG            # 9216 flattened pixels
H = 32                   # bottleneck_dim of this concrete instantiation


def _round_up(n, m):
    return ((n + m - 1) // m) * m


# ---------------------------------------------------------------------------
# Fused kernel: y = sigmoid(relu(x @ We + be) @ Wd + bd), one batch tile / step
# ---------------------------------------------------------------------------
def _fused_ae_kernel(x_ref, we_ref, be_ref, wd_ref, bd_ref, y_ref):
    # Encoder: (TB, 9216) @ (9216, H) -> (TB, H), f32 accumulation on the MXU.
    xb = x_ref[...].astype(jnp.bfloat16)
    v = jnp.dot(xb, we_ref[...], preferred_element_type=jnp.float32)
    v = jnp.maximum(v + be_ref[...], 0.0)                       # ReLU

    # Decoder: (TB, H) @ (H, 9216) -> (TB, 9216), lane-dense single store.
    z = jnp.dot(v.astype(jnp.bfloat16), wd_ref[...],
                preferred_element_type=jnp.float32)
    y_ref[...] = jax.nn.sigmoid(z + bd_ref[...])


def _forward_impl(x, params):
    """x: (batch, 96, 96) f32 in [0,1] -> y: (batch, 96, 96) f32 in [0,1]."""
    B = x.shape[0]
    x2d = x.reshape(B, D)                 # reshape((-1, 1, 96, 96)) with C=1

    # Batch tile: multiple of 8 sublanes, capped at 128 so
    #   2x double-buffered x blocks + 2x y blocks (~4.5 MB each at TB=128)
    #   + ~1.5 MB resident bf16 weights fit v7x's 32 MiB scoped VMEM.
    tb = min(128, _round_up(max(B, 1), 8))
    Bp = _round_up(B, tb)
    if Bp != B:
        x2d = jnp.pad(x2d, ((0, Bp - B), (0, 0)))

    y2d = pl.pallas_call(
        _fused_ae_kernel,
        out_shape=jax.ShapeDtypeStruct((Bp, D), jnp.float32),
        grid_spec=pltpu.PrefetchScalarGridSpec(
            num_scalar_prefetch=0,
            grid=(Bp // tb,),                                   # batch tiles only
            in_specs=[
                pl.BlockSpec((tb, D), lambda i: (i, 0)),        # x batch tile
                pl.BlockSpec((D, H),  lambda i: (0, 0)),        # We (whole, resident)
                pl.BlockSpec((1, H),  lambda i: (0, 0)),        # be (whole)
                pl.BlockSpec((H, D),  lambda i: (0, 0)),        # Wd (whole, resident)
                pl.BlockSpec((1, D),  lambda i: (0, 0)),        # bd (whole)
            ],
            out_specs=pl.BlockSpec((tb, D), lambda i: (i, 0)),  # lane-dense y tile
        ),
        compiler_params=pltpu.CompilerParams(
            dimension_semantics=("parallel",)),
    )(x2d, params["We"], params["be"], params["Wd"], params["bd"])

    return y2d[:B].reshape(B, IMG, IMG)    # reshape((-1, 96, 96))


face_autoencoder_forward = jax.jit(_forward_impl)


# ---------------------------------------------------------------------------
# Params + pure-JAX reference
# ---------------------------------------------------------------------------
def make_params(key):
    k1, k2, k3, k4 = jax.random.split(key, 4)
    scale_e = 1.0 / jnp.sqrt(jnp.float32(D))
    scale_d = 1.0 / jnp.sqrt(jnp.float32(H))
    return {
        "We": (jax.random.normal(k1, (D, H), jnp.float32) * scale_e
               ).astype(jnp.bfloat16),
        "be": jax.random.normal(k3, (1, H), jnp.float32) * 0.01,
        "Wd": (jax.random.normal(k2, (H, D), jnp.float32) * scale_d
               ).astype(jnp.bfloat16),
        "bd": jax.random.normal(k4, (1, D), jnp.float32) * 0.01,
    }


def _reference_forward(x, params):
    B = x.shape[0]
    x2d = x.reshape(B, D).astype(jnp.bfloat16)
    v = jnp.dot(x2d, params["We"], preferred_element_type=jnp.float32)
    v = jnp.maximum(v + params["be"], 0.0)
    z = jnp.dot(v.astype(jnp.bfloat16), params["Wd"],
                preferred_element_type=jnp.float32)
    y2d = jax.nn.sigmoid(z + params["bd"])
    return y2d.reshape(B, IMG, IMG)


if __name__ == "__main__":
    key = jax.random.PRNGKey(0)
    kx, kp = jax.random.split(key)

    # Normalized pixel values in [0, 1], shape (batch, 96, 96), float32.
    x = jax.random.uniform(kx, (2, IMG, IMG), dtype=jnp.float32)
    params = make_params(kp)

    y = face_autoencoder_forward(x, params)
    y = jax.block_until_ready(y)

    y_ref = _reference_forward(x, params)
    assert y.shape == (2, IMG, IMG)
    assert jnp.allclose(y, y_ref, atol=1e-4, rtol=1e-4), \
        float(jnp.max(jnp.abs(y - y_ref)))

    print("KERNEL_OK")
</pallas_src>

<mosaic_0001>
module attributes {stable_mosaic.version = 11 : i64} {
  func.func @_fused_ae_kernel(%arg0: i32, %arg1: memref<8x9216xf32, #tpu.memory_space<vmem>>, %arg2: memref<9216x32xbf16, #tpu.memory_space<vmem>>, %arg3: memref<1x32xf32, #tpu.memory_space<vmem>>, %arg4: memref<32x9216xbf16, #tpu.memory_space<vmem>>, %arg5: memref<1x9216xf32, #tpu.memory_space<vmem>>, %arg6: memref<8x9216xf32, #tpu.memory_space<vmem>>) attributes {dimension_semantics = [#tpu.dimension_semantics<parallel>], iteration_bounds = array<i64: 1>, scalar_prefetch = 0 : i64, scratch_operands = 0 : i64, tpu.core_type = #tpu.core_type<tc>, window_params = [{transform_indices = @transform_0, window_bounds = array<i64: 8, 9216>}, {pipeline_mode = #tpu.pipeline_mode<synchronous>, transform_indices = @transform_1, window_bounds = array<i64: 9216, 32>}, {pipeline_mode = #tpu.pipeline_mode<synchronous>, transform_indices = @transform_2, window_bounds = array<i64: 1, 32>}, {pipeline_mode = #tpu.pipeline_mode<synchronous>, transform_indices = @transform_3, window_bounds = array<i64: 32, 9216>}, {pipeline_mode = #tpu.pipeline_mode<synchronous>, transform_indices = @transform_4, window_bounds = array<i64: 1, 9216>}, {transform_indices = @transform_5, window_bounds = array<i64: 8, 9216>}]} {
    %c0 = arith.constant 0 : index
    %c0_0 = arith.constant 0 : index
    %0 = vector.load %arg1[%c0, %c0_0] : memref<8x9216xf32, #tpu.memory_space<vmem>>, vector<8x9216xf32>
    %1 = arith.truncf %0 : vector<8x9216xf32> to vector<8x9216xbf16>
    %c0_1 = arith.constant 0 : index
    %c0_2 = arith.constant 0 : index
    %2 = vector.load %arg2[%c0_1, %c0_2] : memref<9216x32xbf16, #tpu.memory_space<vmem>>, vector<9216x32xbf16>
    %cst = arith.constant dense<0.000000e+00> : vector<8x32xf32>
    %3 = tpu.matmul %1, %2, %cst {dimension_numbers = #tpu.dot_dimension_numbers<[1], [0], [0], [1], [0, 0, 1, 1], [], []>} : vector<8x9216xbf16>, vector<9216x32xbf16>, vector<8x32xf32> -> vector<8x32xf32>
    %c0_3 = arith.constant 0 : index
    %c0_4 = arith.constant 0 : index
    %4 = vector.load %arg3[%c0_3, %c0_4] : memref<1x32xf32, #tpu.memory_space<vmem>>, vector<1x32xf32>
    %5 = vector.broadcast %4 : vector<1x32xf32> to vector<8x32xf32>
    %6 = arith.addf %3, %5 : vector<8x32xf32>
    %cst_5 = arith.constant 0.000000e+00 : f32
    %7 = vector.broadcast %cst_5 : f32 to vector<8x32xf32>
    %8 = arith.maximumf %6, %7 : vector<8x32xf32>
    %9 = arith.truncf %8 : vector<8x32xf32> to vector<8x32xbf16>
    %c0_6 = arith.constant 0 : index
    %c0_7 = arith.constant 0 : index
    %10 = vector.load %arg4[%c0_6, %c0_7] : memref<32x9216xbf16, #tpu.memory_space<vmem>>, vector<32x9216xbf16>
    %cst_8 = arith.constant dense<0.000000e+00> : vector<8x9216xf32>
    %11 = tpu.matmul %9, %10, %cst_8 {dimension_numbers = #tpu.dot_dimension_numbers<[1], [0], [0], [1], [0, 0, 1, 1], [], []>} : vector<8x32xbf16>, vector<32x9216xbf16>, vector<8x9216xf32> -> vector<8x9216xf32>
    %c0_9 = arith.constant 0 : index
    %c0_10 = arith.constant 0 : index
    %12 = vector.load %arg5[%c0_9, %c0_10] : memref<1x9216xf32, #tpu.memory_space<vmem>>, vector<1x9216xf32>
    %13 = vector.broadcast %12 : vector<1x9216xf32> to vector<8x9216xf32>
    %14 = arith.addf %11, %13 : vector<8x9216xf32>
    %15 = arith.negf %14 : vector<8x9216xf32>
    %16 = math.exp %15 : vector<8x9216xf32>
    %cst_11 = arith.constant 1.000000e+00 : f32
    %17 = vector.broadcast %cst_11 : f32 to vector<8x9216xf32>
    %18 = arith.addf %17, %16 : vector<8x9216xf32>
    %19 = arith.divf %17, %18 : vector<8x9216xf32>
    %c0_12 = arith.constant 0 : index
    %c0_13 = arith.constant 0 : index
    %20 = vector.load %arg6[%c0_12, %c0_13] : memref<8x9216xf32, #tpu.memory_space<vmem>>, vector<8x9216xf32>
    tpu.vector_store %arg6[%c0_12, %c0_13], %19 {strides = array<i32>} : memref<8x9216xf32, #tpu.memory_space<vmem>>, vector<8x9216xf32>,
    return
  }
  func.func @transform_0(%arg0: i32) -> (i32, i32) {
    %c0_i32 = arith.constant 0 : i32
    %c0_i32_0 = arith.constant 0 : i32
    return %arg0, %c0_i32 : i32, i32
  }
  func.func @transform_1(%arg0: i32) -> (i32, i32) {
    %c0_i32 = arith.constant 0 : i32
    %c0_i32_0 = arith.constant 0 : i32
    %c0_i32_1 = arith.constant 0 : i32
    return %c0_i32, %c0_i32_0 : i32, i32
  }
  func.func @transform_2(%arg0: i32) -> (i32, i32) {
    %c0_i32 = arith.constant 0 : i32
    %c0_i32_0 = arith.constant 0 : i32
    %c0_i32_1 = arith.constant 0 : i32
    return %c0_i32, %c0_i32_0 : i32, i32
  }
  func.func @transform_3(%arg0: i32) -> (i32, i32) {
    %c0_i32 = arith.constant 0 : i32
    %c0_i32_0 = arith.constant 0 : i32
    %c0_i32_1 = arith.constant 0 : i32
    return %c0_i32, %c0_i32_0 : i32, i32
  }
  func.func @transform_4(%arg0: i32) -> (i32, i32) {
    %c0_i32 = arith.constant 0 : i32
    %c0_i32_0 = arith.constant 0 : i32
    %c0_i32_1 = arith.constant 0 : i32
    return %c0_i32, %c0_i32_0 : i32, i32
  }
  func.func @transform_5(%arg0: i32) -> (i32, i32) {
    %c0_i32 = arith.constant 0 : i32
    %c0_i32_0 = arith.constant 0 : i32
    return %arg0, %c0_i32 : i32, i32
  }
}

</mosaic_0001>

<bundles_post_ra>
// kernel: _forward_impl.1
= control target key start
LH: loop header
LB: loop body
LE: loop exit
PB: predicated region body
PF: predicated region fallthrough
CT: control target
= control target key end

     0   :  { %vm6741_vm0 = vcmask 261120   ;;  %s18045_s1 = inlined_call_operand.vmem [shape: bf16[9216,32], index: 1, kind: input, shape index: {}]   ;;  %s18046_s0 = inlined_call_operand.vmem [shape: f32[8,9216], index: 0, kind: input, shape index: {}]   ;;  %s18047_s2 = inlined_call_operand.vmem [shape: f32[1,32], index: 2, kind: input, shape index: {}]   ;;  %s18048_s3 = inlined_call_operand.vmem [shape: bf16[32,9216], index: 3, kind: input, shape index: {}]   ;;  %s18049_s4 = inlined_call_operand.vmem [shape: f32[1,9216], index: 4, kind: input, shape index: {}]   ;;  %s18050_s5 = inlined_call_operand.vmem [shape: f32[8,9216], index: 5, kind: output, shape index: {}]  }
   0x1   :  { %v12156_v0 = vld [vmem:[%s18045_s1 + $0x38] sm:$0xff]  ;;  %v12155_v4 = vld [vmem:[%s18045_s1 + $0x30] sm:$0xff]  ;;  %v12154_v8 = vld [vmem:[%s18045_s1 + $0x28] sm:$0xff] }
   0x2   :  { %v12164_v1 = vld [vmem:[%s18045_s1 + $0x78] sm:$0xff]  ;;  %4777 = vmatpush.bf16.msra.mxu0 %v12156_v0  ;;  %v12163_v5 = vld [vmem:[%s18045_s1 + $0x70] sm:$0xff]  ;;  %v12162_v9 = vld [vmem:[%s18045_s1 + $0x68] sm:$0xff] }
   0x3   :  { %v12172_v2 = vld [vmem:[%s18045_s1 + $0xb8] sm:$0xff]  ;;  %4790 = vmatpush.bf16.msra.mxu1 %v12164_v1  ;;  %v12171_v6 = vld [vmem:[%s18045_s1 + $0xb0] sm:$0xff]  ;;  %v12170_v10 = vld [vmem:[%s18045_s1 + $0xa8] sm:$0xff] }
   0x4   :  { %v12180_v3 = vld [vmem:[%s18045_s1 + $0xf8] sm:$0xff]  ;;  %4803 = vmatpush.bf16.msra.mxu2 %v12172_v2  ;;  %v12179_v7 = vld [vmem:[%s18045_s1 + $0xf0] sm:$0xff]  ;;  %v12178_v11 = vld [vmem:[%s18045_s1 + $0xe8] sm:$0xff] }
   0x5   :  { %4816 = vmatpush.bf16.msra.mxu3 %v12180_v3  ;;  %v12153_v12 = vld [vmem:[%s18045_s1 + $0x20] sm:$0xff]  ;;  %v12152_v16 = vld [vmem:[%s18045_s1 + $0x18] sm:$0xff]  ;;  %v12151_v20 = vld [vmem:[%s18045_s1 + $0x10] sm:$0xff] }
   0x6   :  { %4778 = vmatpush.bf16.msra.mxu0 %v12155_v4  ;;  %v12161_v13 = vld [vmem:[%s18045_s1 + $0x60] sm:$0xff]  ;;  %v12160_v17 = vld [vmem:[%s18045_s1 + $0x58] sm:$0xff]  ;;  %v12159_v21 = vld [vmem:[%s18045_s1 + $0x50] sm:$0xff] }
   0x7   :  { %4791 = vmatpush.bf16.msra.mxu1 %v12163_v5  ;;  %v12169_v14 = vld [vmem:[%s18045_s1 + $0xa0] sm:$0xff]  ;;  %v12168_v18 = vld [vmem:[%s18045_s1 + $0x98] sm:$0xff]  ;;  %v12167_v22 = vld [vmem:[%s18045_s1 + $0x90] sm:$0xff] }
   0x8   :  { %4804 = vmatpush.bf16.msra.mxu2 %v12171_v6  ;;  %v12177_v15 = vld [vmem:[%s18045_s1 + $0xe0] sm:$0xff]  ;;  %v12176_v19 = vld [vmem:[%s18045_s1 + $0xd8] sm:$0xff]  ;;  %v12175_v23 = vld [vmem:[%s18045_s1 + $0xd0] sm:$0xff] }
   0x9   :  { %4817 = vmatpush.bf16.msra.mxu3 %v12179_v7  ;;  %v12150_v24 = vld [vmem:[%s18045_s1 + $0x8] sm:$0xff]  ;;  %v12149_v28 = vld [vmem:[%s18045_s1] sm:$0xff]  ;;  %v12188_v32 = vld [vmem:[%s18045_s1 + $0x138] sm:$0xff] }
   0xa   :  { %4779 = vmatpush.bf16.msra.mxu0 %v12154_v8  ;;  %v12158_v25 = vld [vmem:[%s18045_s1 + $0x48] sm:$0xff]  ;;  %v12157_v29 = vld [vmem:[%s18045_s1 + $0x40] sm:$0xff]  ;;  %v23_v33 = vld [vmem:[%s18046_s0 + $0x10] sm:$0xff] }
   0xb   :  { %4792 = vmatpush.bf16.msra.mxu1 %v12162_v9  ;;  %v12166_v26 = vld [vmem:[%s18045_s1 + $0x88] sm:$0xff]  ;;  %v12165_v30 = vld [vmem:[%s18045_s1 + $0x80] sm:$0xff]  ;;  %v12196_v35 = vld [vmem:[%s18045_s1 + $0x178] sm:$0xff]  ;;  %v95_v40 = vpack.c.bf16 %v23_v33, %v23_v33 }
   0xc   :  { %4805 = vmatpush.bf16.msra.mxu2 %v12170_v10  ;;  %v12174_v27 = vld [vmem:[%s18045_s1 + $0xc8] sm:$0xff]  ;;  %v12173_v31 = vld [vmem:[%s18045_s1 + $0xc0] sm:$0xff]  ;;  %v24_v36 = vld [vmem:[%s18046_s0 + $0x18] sm:$0xff] }
   0xd   :  { %4818 = vmatpush.bf16.msra.mxu3 %v12178_v11  ;;  %v21_v34 = vld [vmem:[%s18046_s0] sm:$0xff]  ;;  %v22_v37 = vld [vmem:[%s18046_s0 + $0x8] sm:$0xff]  ;;  %v12204_v38 = vld [vmem:[%s18045_s1 + $0x1b8] sm:$0xff]  ;;  %v96_v42 = vpack.c.bf16 %v24_v36, %v24_v36 }
   0xe   :  { %4780 = vmatpush.bf16.msra.mxu0 %v12153_v12  ;;  %v12212_v39 = vld [vmem:[%s18045_s1 + $0x1f8] sm:$0xff]  ;;  %v93_v41 = vpack.c.bf16 %v21_v34, %v21_v34  ;;  %v94_v43 = vpack.c.bf16 %v22_v37, %v22_v37  ;;  %v12187_v44 = vld [vmem:[%s18045_s1 + $0x130] sm:$0xff]  ;;  %v12186_v48 = vld [vmem:[%s18045_s1 + $0x128] sm:$0xff] }
   0xf   :  { %4793 = vmatpush.bf16.msra.mxu1 %v12161_v13  ;;  %v12195_v45 = vld [vmem:[%s18045_s1 + $0x170] sm:$0xff]  ;;  %v12194_v49 = vld [vmem:[%s18045_s1 + $0x168] sm:$0xff]  ;;  %v12185_v52 = vld [vmem:[%s18045_s1 + $0x120] sm:$0xff] }
  0x10   :  { %4806 = vmatpush.bf16.msra.mxu2 %v12169_v14  ;;  %v12203_v46 = vld [vmem:[%s18045_s1 + $0x1b0] sm:$0xff]  ;;  %v12202_v50 = vld [vmem:[%s18045_s1 + $0x1a8] sm:$0xff]  ;;  %v12193_v53 = vld [vmem:[%s18045_s1 + $0x160] sm:$0xff] }
  0x11   :  { %4819 = vmatpush.bf16.msra.mxu3 %v12177_v15  ;;  %v12211_v47 = vld [vmem:[%s18045_s1 + $0x1f0] sm:$0xff]  ;;  %v12210_v51 = vld [vmem:[%s18045_s1 + $0x1e8] sm:$0xff]  ;;  %v12201_v54 = vld [vmem:[%s18045_s1 + $0x1a0] sm:$0xff] }
  0x12   :  { %4781 = vmatpush.bf16.msra.mxu0 %v12152_v16  ;;  %v12209_v55 = vld [vmem:[%s18045_s1 + $0x1e0] sm:$0xff]  ;;  %v12184_v56 = vld [vmem:[%s18045_s1 + $0x118] sm:$0xff]  ;;  %v12183_v60 = vld [vmem:[%s18045_s1 + $0x110] sm:$0xff] }
  0x13   :  { %4794 = vmatpush.bf16.msra.mxu1 %v12160_v17  ;;  %v12192_v57 = vld [vmem:[%s18045_s1 + $0x158] sm:$0xff]  ;;  %v12191_v61 = vld [vmem:[%s18045_s1 + $0x150] sm:$0xff]  ;;  %v12182_v0 = vld [vmem:[%s18045_s1 + $0x108] sm:$0xff] }
  0x14   :  { %4807 = vmatpush.bf16.msra.mxu2 %v12168_v18  ;;  %v12200_v58 = vld [vmem:[%s18045_s1 + $0x198] sm:$0xff]  ;;  %v12199_v62 = vld [vmem:[%s18045_s1 + $0x190] sm:$0xff]  ;;  %v12190_v1 = vld [vmem:[%s18045_s1 + $0x148] sm:$0xff] }
  0x15   :  { %4820 = vmatpush.bf16.msra.mxu3 %v12176_v19  ;;  %v12208_v59 = vld [vmem:[%s18045_s1 + $0x1d8] sm:$0xff]  ;;  %v12207_v63 = vld [vmem:[%s18045_s1 + $0x1d0] sm:$0xff]  ;;  %v12198_v2 = vld [vmem:[%s18045_s1 + $0x188] sm:$0xff] }
  0x16   :  { %4782 = vmatpush.bf16.msra.mxu0 %v12151_v20  ;;  %v12206_v3 = vld [vmem:[%s18045_s1 + $0x1c8] sm:$0xff]  ;;  %v12181_v4 = vld [vmem:[%s18045_s1 + $0x100] sm:$0xff]  ;;  %v12220_v8 = vld [vmem:[%s18045_s1 + $0x238] sm:$0xff] }
  0x17   :  { %4795 = vmatpush.bf16.msra.mxu1 %v12159_v21  ;;  %v12189_v5 = vld [vmem:[%s18045_s1 + $0x140] sm:$0xff]  ;;  %v27_v9 = vld [vmem:[%s18046_s0 + $0x30] sm:$0xff]  ;;  %v12228_v11 = vld [vmem:[%s18045_s1 + $0x278] sm:$0xff] }
  0x18   :  { %4808 = vmatpush.bf16.msra.mxu2 %v12167_v22  ;;  %v12197_v6 = vld [vmem:[%s18045_s1 + $0x180] sm:$0xff]  ;;  %v28_v12 = vld [vmem:[%s18046_s0 + $0x38] sm:$0xff]  ;;  %v26_v13 = vld [vmem:[%s18046_s0 + $0x28] sm:$0xff]  ;;  %v99_v16 = vpack.c.bf16 %v27_v9, %v27_v9 }
  0x19   :  { %4821 = vmatpush.bf16.msra.mxu3 %v12175_v23  ;;  %v12205_v7 = vld [vmem:[%s18045_s1 + $0x1c0] sm:$0xff]  ;;  %v12236_v14 = vld [vmem:[%s18045_s1 + $0x2b8] sm:$0xff]  ;;  %v100_v18 = vpack.c.bf16 %v28_v12, %v28_v12  ;;  %v98_v19 = vpack.c.bf16 %v26_v13, %v26_v13  ;;  %v12219_v20 = vld [vmem:[%s18045_s1 + $0x230] sm:$0xff] }
  0x1a   :  { %4783 = vmatpush.bf16.msra.mxu0 %v12150_v24  ;;  %v25_v10 = vld [vmem:[%s18046_s0 + $0x20] sm:$0xff]  ;;  %v12244_v15 = vld [vmem:[%s18045_s1 + $0x2f8] sm:$0xff]  ;;  %v12227_v21 = vld [vmem:[%s18045_s1 + $0x270] sm:$0xff] }
  0x1b   :  { %4796 = vmatpush.bf16.msra.mxu1 %v12158_v25  ;;  %v97_v17 = vpack.c.bf16 %v25_v10, %v25_v10  ;;  %v12235_v22 = vld [vmem:[%s18045_s1 + $0x2b0] sm:$0xff]  ;;  %v12218_v24 = vld [vmem:[%s18045_s1 + $0x228] sm:$0xff]  ;;  %v12224_v33 = vld [vmem:[%s18045_s1 + $0x258] sm:$0xff] }
  0x1c   :  { %4809 = vmatpush.bf16.msra.mxu2 %v12166_v26  ;;  %v12243_v23 = vld [vmem:[%s18045_s1 + $0x2f0] sm:$0xff]  ;;  %v12226_v25 = vld [vmem:[%s18045_s1 + $0x268] sm:$0xff]  ;;  %v12232_v34 = vld [vmem:[%s18045_s1 + $0x298] sm:$0xff] }
  0x1d   :  { %4822 = vmatpush.bf16.msra.mxu3 %v12174_v27  ;;  %v12234_v26 = vld [vmem:[%s18045_s1 + $0x2a8] sm:$0xff]  ;;  %v12215_v36 = vld [vmem:[%s18045_s1 + $0x210] sm:$0xff]  ;;  %v12256_v9 = vld [vmem:[%s18045_s1 + $0x358] sm:$0xff] }
  0x1e   :  { %4784 = vmatpush.bf16.msra.mxu0 %v12149_v28  ;;  %v12242_v27 = vld [vmem:[%s18045_s1 + $0x2e8] sm:$0xff]  ;;  %v12217_v28 = vld [vmem:[%s18045_s1 + $0x220] sm:$0xff]  ;;  %v12223_v37 = vld [vmem:[%s18045_s1 + $0x250] sm:$0xff] }
  0x1f   :  { %4797 = vmatpush.bf16.msra.mxu1 %v12157_v29  ;;  %v12225_v29 = vld [vmem:[%s18045_s1 + $0x260] sm:$0xff]  ;;  %v12264_v10 = vld [vmem:[%s18045_s1 + $0x398] sm:$0xff]  ;;  %v12247_v12 = vld [vmem:[%s18045_s1 + $0x310] sm:$0xff] }
  0x20   :  { %4810 = vmatpush.bf16.msra.mxu2 %v12165_v30  ;;  %v12233_v30 = vld [vmem:[%s18045_s1 + $0x2a0] sm:$0xff]  ;;  %v12255_v13 = vld [vmem:[%s18045_s1 + $0x350] sm:$0xff] }
  0x21   :  { %4823 = vmatpush.bf16.msra.mxu3 %v12173_v31  ;;  %4785 = vmatmul.bf16.vlgmr.msra.gmra.mxu0 %v93_v41  ;;  %v12241_v31 = vld [vmem:[%s18045_s1 + $0x2e0] sm:$0xff]  ;;  %v12222_v41 = vld [vmem:[%s18045_s1 + $0x248] sm:$0xff] }
  0x22   :  { %4829 = vmatpush.bf16.msrb.mxu0 %v12188_v32  ;;  %4798 = vmatmul.bf16.vlgmr.msra.gmra.mxu1 %v94_v43  ;;  %v12216_v32 = vld [vmem:[%s18045_s1 + $0x218] sm:$0xff]  ;;  %v12238_v43 = vld [vmem:[%s18045_s1 + $0x2c8] sm:$0xff] }
  0x23   :  { %4842 = vmatpush.bf16.msrb.mxu1 %v12196_v35  ;;  %4811 = vmatmul.bf16.vlgmr.msra.gmra.mxu2 %v95_v40  ;;  %v12240_v35 = vld [vmem:[%s18045_s1 + $0x2d8] sm:$0xff]  ;;  %v12214_v40 = vld [vmem:[%s18045_s1 + $0x208] sm:$0xff] }
  0x24   :  { %4855 = vmatpush.bf16.msrb.mxu2 %v12204_v38  ;;  %4824 = vmatmul.bf16.vlgmr.msra.gmra.mxu3 %v96_v42  ;;  %v12231_v38 = vld [vmem:[%s18045_s1 + $0x290] sm:$0xff]  ;;  %v12230_v42 = vld [vmem:[%s18045_s1 + $0x288] sm:$0xff] }
  0x25   :  { %4868 = vmatpush.bf16.msrb.mxu3 %v12212_v39  ;;  %v12239_v39 = vld [vmem:[%s18045_s1 + $0x2d0] sm:$0xff] }
  0x26   :  { %4830 = vmatpush.bf16.msrb.mxu0 %v12187_v44  ;;  %v12213_v44 = vld [vmem:[%s18045_s1 + $0x200] sm:$0xff] }
  0x27   :  { %4843 = vmatpush.bf16.msrb.mxu1 %v12195_v45  ;;  %v12221_v45 = vld [vmem:[%s18045_s1 + $0x240] sm:$0xff] }
  0x28   :  { %4856 = vmatpush.bf16.msrb.mxu2 %v12203_v46  ;;  %v12229_v46 = vld [vmem:[%s18045_s1 + $0x280] sm:$0xff] }
  0x29   :  { %4869 = vmatpush.bf16.msrb.mxu3 %v12211_v47  ;;  %v12237_v47 = vld [vmem:[%s18045_s1 + $0x2c0] sm:$0xff] }
  0x2a   :  { %4831 = vmatpush.bf16.msrb.mxu0 %v12186_v48  ;;  %v12252_v48 = vld [vmem:[%s18045_s1 + $0x338] sm:$0xff] }
  0x2b   :  { %4844 = vmatpush.bf16.msrb.mxu1 %v12194_v49  ;;  %v29_v49 = vld [vmem:[%s18046_s0 + $0x40] sm:$0xff] }
  0x2c   :  { %4857 = vmatpush.bf16.msrb.mxu2 %v12202_v50  ;;  %v31_v50 = vld [vmem:[%s18046_s0 + $0x50] sm:$0xff] }
  0x2d   :  { %4870 = vmatpush.bf16.msrb.mxu3 %v12210_v51  ;;  %v12260_v51 = vld [vmem:[%s18045_s1 + $0x378] sm:$0xff] }
  0x2e   :  { %4832 = vmatpush.bf16.msrb.mxu0 %v12185_v52  ;;  %v30_v52 = vld [vmem:[%s18046_s0 + $0x48] sm:$0xff] }
  0x2f   :  { %4845 = vmatpush.bf16.msrb.mxu1 %v12193_v53  ;;  %v32_v53 = vld [vmem:[%s18046_s0 + $0x58] sm:$0xff] }
  0x30   :  { %4858 = vmatpush.bf16.msrb.mxu2 %v12201_v54  ;;  %v12268_v54 = vld [vmem:[%s18045_s1 + $0x3b8] sm:$0xff] }
  0x31   :  { %4871 = vmatpush.bf16.msrb.mxu3 %v12209_v55  ;;  %v12276_v55 = vld [vmem:[%s18045_s1 + $0x3f8] sm:$0xff] }
  0x32   :  { %4833 = vmatpush.bf16.msrb.mxu0 %v12184_v56  ;;  %v101_v56 = vpack.c.bf16 %v29_v49, %v29_v49  ;;  %v12288_v49 = vld [vmem:[%s18045_s1 + $0x458] sm:$0xff] }
  0x33   :  { %4846 = vmatpush.bf16.msrb.mxu1 %v12192_v57  ;;  %v103_v57 = vpack.c.bf16 %v31_v50, %v31_v50  ;;  %v12296_v50 = vld [vmem:[%s18045_s1 + $0x498] sm:$0xff] }
  0x34   :  { %4859 = vmatpush.bf16.msrb.mxu2 %v12200_v58  ;;  %v102_v58 = vpack.c.bf16 %v30_v52, %v30_v52  ;;  %v12279_v52 = vld [vmem:[%s18045_s1 + $0x410] sm:$0xff] }
  0x35   :  { %4872 = vmatpush.bf16.msrb.mxu3 %v12208_v59  ;;  %v104_v59 = vpack.c.bf16 %v32_v53, %v32_v53  ;;  %v12287_v53 = vld [vmem:[%s18045_s1 + $0x450] sm:$0xff] }
  0x36   :  { %4834 = vmatpush.bf16.msrb.mxu0 %v12183_v60  ;;  %v12251_v60 = vld [vmem:[%s18045_s1 + $0x330] sm:$0xff] }
  0x37   :  { %4847 = vmatpush.bf16.msrb.mxu1 %v12191_v61  ;;  %v12259_v61 = vld [vmem:[%s18045_s1 + $0x370] sm:$0xff] }
  0x38   :  { %4860 = vmatpush.bf16.msrb.mxu2 %v12199_v62  ;;  %v12267_v62 = vld [vmem:[%s18045_s1 + $0x3b0] sm:$0xff] }
  0x39   :  { %4873 = vmatpush.bf16.msrb.mxu3 %v12207_v63  ;;  %v12275_v63 = vld [vmem:[%s18045_s1 + $0x3f0] sm:$0xff] }
  0x3a   :  { %4835 = vmatpush.bf16.msrb.mxu0 %v12182_v0  ;;  %v12250_v0 = vld [vmem:[%s18045_s1 + $0x328] sm:$0xff] }
  0x3b   :  { %4848 = vmatpush.bf16.msrb.mxu1 %v12190_v1  ;;  %v12258_v1 = vld [vmem:[%s18045_s1 + $0x368] sm:$0xff] }
  0x3c   :  { %4861 = vmatpush.bf16.msrb.mxu2 %v12198_v2  ;;  %v12266_v2 = vld [vmem:[%s18045_s1 + $0x3a8] sm:$0xff] }
  0x3d   :  { %4874 = vmatpush.bf16.msrb.mxu3 %v12206_v3  ;;  %v12274_v3 = vld [vmem:[%s18045_s1 + $0x3e8] sm:$0xff] }
  0x3e   :  { %4836 = vmatpush.bf16.msrb.mxu0 %v12181_v4  ;;  %v12249_v4 = vld [vmem:[%s18045_s1 + $0x320] sm:$0xff] }
  0x3f   :  { %4849 = vmatpush.bf16.msrb.mxu1 %v12189_v5  ;;  %v12257_v5 = vld [vmem:[%s18045_s1 + $0x360] sm:$0xff] }
  0x40   :  { %4862 = vmatpush.bf16.msrb.mxu2 %v12197_v6  ;;  %v12265_v6 = vld [vmem:[%s18045_s1 + $0x3a0] sm:$0xff] }
  0x41   :  { %4875 = vmatpush.bf16.msrb.mxu3 %v12205_v7  ;;  %4837 = vmatmul.bf16.vlgmr.msrb.gmra.mxu0 %v97_v17  ;;  %v12273_v7 = vld [vmem:[%s18045_s1 + $0x3e0] sm:$0xff]  ;;  %v12254_v17 = vld [vmem:[%s18045_s1 + $0x348] sm:$0xff] }
  0x42   :  { %4881 = vmatpush.bf16.msra.mxu0 %v12220_v8  ;;  %4850 = vmatmul.bf16.vlgmr.msrb.gmra.mxu1 %v98_v19  ;;  %v12248_v8 = vld [vmem:[%s18045_s1 + $0x318] sm:$0xff]  ;;  %v12270_v19 = vld [vmem:[%s18045_s1 + $0x3c8] sm:$0xff] }
  0x43   :  { %4894 = vmatpush.bf16.msra.mxu1 %v12228_v11  ;;  %4863 = vmatmul.bf16.vlgmr.msrb.gmra.mxu2 %v99_v16  ;;  %v12272_v11 = vld [vmem:[%s18045_s1 + $0x3d8] sm:$0xff]  ;;  %v12246_v16 = vld [vmem:[%s18045_s1 + $0x308] sm:$0xff] }
  0x44   :  { %4907 = vmatpush.bf16.msra.mxu2 %v12236_v14  ;;  %4876 = vmatmul.bf16.vlgmr.msrb.gmra.mxu3 %v100_v18  ;;  %v12263_v14 = vld [vmem:[%s18045_s1 + $0x390] sm:$0xff]  ;;  %v12262_v18 = vld [vmem:[%s18045_s1 + $0x388] sm:$0xff] }
  0x45   :  { %4920 = vmatpush.bf16.msra.mxu3 %v12244_v15  ;;  %v12271_v15 = vld [vmem:[%s18045_s1 + $0x3d0] sm:$0xff] }
  0x46   :  { %4882 = vmatpush.bf16.msra.mxu0 %v12219_v20  ;;  %v12245_v20 = vld [vmem:[%s18045_s1 + $0x300] sm:$0xff] }
  0x47   :  { %4895 = vmatpush.bf16.msra.mxu1 %v12227_v21  ;;  %v12253_v21 = vld [vmem:[%s18045_s1 + $0x340] sm:$0xff] }
  0x48   :  { %4908 = vmatpush.bf16.msra.mxu2 %v12235_v22  ;;  %v12261_v22 = vld [vmem:[%s18045_s1 + $0x380] sm:$0xff] }
  0x49   :  { %4921 = vmatpush.bf16.msra.mxu3 %v12243_v23  ;;  %v12269_v23 = vld [vmem:[%s18045_s1 + $0x3c0] sm:$0xff] }
  0x4a   :  { %4883 = vmatpush.bf16.msra.mxu0 %v12218_v24  ;;  %v12284_v24 = vld [vmem:[%s18045_s1 + $0x438] sm:$0xff] }
  0x4b   :  { %4896 = vmatpush.bf16.msra.mxu1 %v12226_v25  ;;  %v33_v25 = vld [vmem:[%s18046_s0 + $0x60] sm:$0xff] }
  0x4c   :  { %4909 = vmatpush.bf16.msra.mxu2 %v12234_v26  ;;  %v35_v26 = vld [vmem:[%s18046_s0 + $0x70] sm:$0xff] }
  0x4d   :  { %4922 = vmatpush.bf16.msra.mxu3 %v12242_v27  ;;  %v12292_v27 = vld [vmem:[%s18045_s1 + $0x478] sm:$0xff] }
  0x4e   :  { %4884 = vmatpush.bf16.msra.mxu0 %v12217_v28  ;;  %v34_v28 = vld [vmem:[%s18046_s0 + $0x68] sm:$0xff] }
  0x4f   :  { %4897 = vmatpush.bf16.msra.mxu1 %v12225_v29  ;;  %v36_v29 = vld [vmem:[%s18046_s0 + $0x78] sm:$0xff] }
  0x50   :  { %4910 = vmatpush.bf16.msra.mxu2 %v12233_v30  ;;  %v12300_v30 = vld [vmem:[%s18045_s1 + $0x4b8] sm:$0xff] }
  0x51   :  { %4923 = vmatpush.bf16.msra.mxu3 %v12241_v31  ;;  %v12308_v31 = vld [vmem:[%s18045_s1 + $0x4f8] sm:$0xff] }
  0x52   :  { %4885 = vmatpush.bf16.msra.mxu0 %v12216_v32  ;;  %v105_v32 = vpack.c.bf16 %v33_v25, %v33_v25 }
  0x53   :  { %4898 = vmatpush.bf16.msra.mxu1 %v12224_v33  ;;  %v107_v33 = vpack.c.bf16 %v35_v26, %v35_v26  ;;  %v12329_v26 = vld [vmem:[%s18045_s1 + $0x5a0] sm:$0xff] }
  0x54   :  { %4911 = vmatpush.bf16.msra.mxu2 %v12232_v34  ;;  %v106_v34 = vpack.c.bf16 %v34_v28, %v34_v28 }
  0x55   :  { %4924 = vmatpush.bf16.msra.mxu3 %v12240_v35  ;;  %v108_v35 = vpack.c.bf16 %v36_v29, %v36_v29  ;;  %v12312_v29 = vld [vmem:[%s18045_s1 + $0x518] sm:$0xff] }
  0x56   :  { %4886 = vmatpush.bf16.msra.mxu0 %v12215_v36  ;;  %v12283_v36 = vld [vmem:[%s18045_s1 + $0x430] sm:$0xff] }
  0x57   :  { %4899 = vmatpush.bf16.msra.mxu1 %v12223_v37  ;;  %v12291_v37 = vld [vmem:[%s18045_s1 + $0x470] sm:$0xff] }
  0x58   :  { %4912 = vmatpush.bf16.msra.mxu2 %v12231_v38  ;;  %v12299_v38 = vld [vmem:[%s18045_s1 + $0x4b0] sm:$0xff] }
  0x59   :  { %4925 = vmatpush.bf16.msra.mxu3 %v12239_v39  ;;  %v12307_v39 = vld [vmem:[%s18045_s1 + $0x4f0] sm:$0xff] }
  0x5a   :  { %4887 = vmatpush.bf16.msra.mxu0 %v12214_v40  ;;  %v12282_v40 = vld [vmem:[%s18045_s1 + $0x428] sm:$0xff] }
  0x5b   :  { %4900 = vmatpush.bf16.msra.mxu1 %v12222_v41  ;;  %v12290_v41 = vld [vmem:[%s18045_s1 + $0x468] sm:$0xff] }
  0x5c   :  { %4913 = vmatpush.bf16.msra.mxu2 %v12230_v42  ;;  %v12298_v42 = vld [vmem:[%s18045_s1 + $0x4a8] sm:$0xff] }
  0x5d   :  { %4926 = vmatpush.bf16.msra.mxu3 %v12238_v43  ;;  %v12306_v43 = vld [vmem:[%s18045_s1 + $0x4e8] sm:$0xff] }
  0x5e   :  { %4888 = vmatpush.bf16.msra.mxu0 %v12213_v44  ;;  %v12281_v44 = vld [vmem:[%s18045_s1 + $0x420] sm:$0xff] }
  0x5f   :  { %4901 = vmatpush.bf16.msra.mxu1 %v12221_v45  ;;  %v12289_v45 = vld [vmem:[%s18045_s1 + $0x460] sm:$0xff] }
  0x60   :  { %4914 = vmatpush.bf16.msra.mxu2 %v12229_v46  ;;  %v12297_v46 = vld [vmem:[%s18045_s1 + $0x4a0] sm:$0xff] }
  0x61   :  { %4927 = vmatpush.bf16.msra.mxu3 %v12237_v47  ;;  %4889 = vmatmul.bf16.vlgmr.msra.gmra.mxu0 %v101_v56  ;;  %v12305_v47 = vld [vmem:[%s18045_s1 + $0x4e0] sm:$0xff]  ;;  %v12278_v56 = vld [vmem:[%s18045_s1 + $0x408] sm:$0xff] }
  0x62   :  { %4933 = vmatpush.bf16.msrb.mxu0 %v12252_v48  ;;  %4902 = vmatmul.bf16.vlgmr.msra.gmra.mxu1 %v102_v58  ;;  %v12280_v48 = vld [vmem:[%s18045_s1 + $0x418] sm:$0xff]  ;;  %v12294_v58 = vld [vmem:[%s18045_s1 + $0x488] sm:$0xff] }
  0x63   :  { %4946 = vmatpush.bf16.msrb.mxu1 %v12260_v51  ;;  %4915 = vmatmul.bf16.vlgmr.msra.gmra.mxu2 %v103_v57  ;;  %v12304_v51 = vld [vmem:[%s18045_s1 + $0x4d8] sm:$0xff]  ;;  %v12286_v57 = vld [vmem:[%s18045_s1 + $0x448] sm:$0xff] }
  0x64   :  { %4959 = vmatpush.bf16.msrb.mxu2 %v12268_v54  ;;  %4928 = vmatmul.bf16.vlgmr.msra.gmra.mxu3 %v104_v59  ;;  %v12295_v54 = vld [vmem:[%s18045_s1 + $0x490] sm:$0xff]  ;;  %v12302_v59 = vld [vmem:[%s18045_s1 + $0x4c8] sm:$0xff] }
  0x65   :  { %4972 = vmatpush.bf16.msrb.mxu3 %v12276_v55  ;;  %v12303_v55 = vld [vmem:[%s18045_s1 + $0x4d0] sm:$0xff] }
  0x66   :  { %4934 = vmatpush.bf16.msrb.mxu0 %v12251_v60  ;;  %v12277_v60 = vld [vmem:[%s18045_s1 + $0x400] sm:$0xff] }
  0x67   :  { %4947 = vmatpush.bf16.msrb.mxu1 %v12259_v61  ;;  %v12285_v61 = vld [vmem:[%s18045_s1 + $0x440] sm:$0xff] }
  0x68   :  { %4960 = vmatpush.bf16.msrb.mxu2 %v12267_v62  ;;  %v12293_v62 = vld [vmem:[%s18045_s1 + $0x480] sm:$0xff] }
  0x69   :  { %4973 = vmatpush.bf16.msrb.mxu3 %v12275_v63  ;;  %v12301_v63 = vld [vmem:[%s18045_s1 + $0x4c0] sm:$0xff] }
  0x6a   :  { %4935 = vmatpush.bf16.msrb.mxu0 %v12250_v0  ;;  %v12316_v0 = vld [vmem:[%s18045_s1 + $0x538] sm:$0xff] }
  0x6b   :  { %4948 = vmatpush.bf16.msrb.mxu1 %v12258_v1  ;;  %v37_v1 = vld [vmem:[%s18046_s0 + $0x80] sm:$0xff] }
  0x6c   :  { %4961 = vmatpush.bf16.msrb.mxu2 %v12266_v2  ;;  %v39_v2 = vld [vmem:[%s18046_s0 + $0x90] sm:$0xff] }
  0x6d   :  { %4974 = vmatpush.bf16.msrb.mxu3 %v12274_v3  ;;  %v12324_v3 = vld [vmem:[%s18045_s1 + $0x578] sm:$0xff] }
  0x6e   :  { %4936 = vmatpush.bf16.msrb.mxu0 %v12249_v4  ;;  %v38_v4 = vld [vmem:[%s18046_s0 + $0x88] sm:$0xff] }
  0x6f   :  { %4949 = vmatpush.bf16.msrb.mxu1 %v12257_v5  ;;  %v40_v5 = vld [vmem:[%s18046_s0 + $0x98] sm:$0xff] }
  0x70   :  { %4962 = vmatpush.bf16.msrb.mxu2 %v12265_v6  ;;  %v12332_v6 = vld [vmem:[%s18045_s1 + $0x5b8] sm:$0xff] }
  0x71   :  { %4975 = vmatpush.bf16.msrb.mxu3 %v12273_v7  ;;  %v12340_v7 = vld [vmem:[%s18045_s1 + $0x5f8] sm:$0xff] }
  0x72   :  { %4937 = vmatpush.bf16.msrb.mxu0 %v12248_v8  ;;  %v109_v8 = vpack.c.bf16 %v37_v1, %v37_v1  ;;  %v12347_v1 = vld [vmem:[%s18045_s1 + $0x630] sm:$0xff] }
  0x73   :  { %4950 = vmatpush.bf16.msrb.mxu1 %v12256_v9  ;;  %v111_v9 = vpack.c.bf16 %v39_v2, %v39_v2  ;;  %v12355_v2 = vld [vmem:[%s18045_s1 + $0x670] sm:$0xff] }
  0x74   :  { %4963 = vmatpush.bf16.msrb.mxu2 %v12264_v10  ;;  %v110_v10 = vpack.c.bf16 %v38_v4, %v38_v4  ;;  %v12371_v4 = vld [vmem:[%s18045_s1 + $0x6f0] sm:$0xff] }
  0x75   :  { %4976 = vmatpush.bf16.msrb.mxu3 %v12272_v11  ;;  %v112_v11 = vpack.c.bf16 %v40_v5, %v40_v5  ;;  %v12346_v5 = vld [vmem:[%s18045_s1 + $0x628] sm:$0xff] }
  0x76   :  { %4938 = vmatpush.bf16.msrb.mxu0 %v12247_v12  ;;  %v12315_v12 = vld [vmem:[%s18045_s1 + $0x530] sm:$0xff] }
  0x77   :  { %4951 = vmatpush.bf16.msrb.mxu1 %v12255_v13  ;;  %v12323_v13 = vld [vmem:[%s18045_s1 + $0x570] sm:$0xff] }
  0x78   :  { %4964 = vmatpush.bf16.msrb.mxu2 %v12263_v14  ;;  %v12331_v14 = vld [vmem:[%s18045_s1 + $0x5b0] sm:$0xff] }
  0x79   :  { %4977 = vmatpush.bf16.msrb.mxu3 %v12271_v15  ;;  %v12339_v15 = vld [vmem:[%s18045_s1 + $0x5f0] sm:$0xff] }
  0x7a   :  { %4939 = vmatpush.bf16.msrb.mxu0 %v12246_v16  ;;  %v12314_v16 = vld [vmem:[%s18045_s1 + $0x528] sm:$0xff] }
  0x7b   :  { %4952 = vmatpush.bf16.msrb.mxu1 %v12254_v17  ;;  %v12322_v17 = vld [vmem:[%s18045_s1 + $0x568] sm:$0xff] }
  0x7c   :  { %4965 = vmatpush.bf16.msrb.mxu2 %v12262_v18  ;;  %v12869_v18 = vld [vmem:[%s18047_s2] ss:$0 sm:$0xff] }
  0x7d   :  { %4978 = vmatpush.bf16.msrb.mxu3 %v12270_v19  ;;  %v12330_v19 = vld [vmem:[%s18045_s1 + $0x5a8] sm:$0xff] }
  0x7e   :  { %4940 = vmatpush.bf16.msrb.mxu0 %v12245_v20  ;;  %v12338_v20 = vld [vmem:[%s18045_s1 + $0x5e8] sm:$0xff] }
  0x7f   :  { %4953 = vmatpush.bf16.msrb.mxu1 %v12253_v21 }
  0x80   :  { %4966 = vmatpush.bf16.msrb.mxu2 %v12261_v22  ;;  %v12313_v22 = vld [vmem:[%s18045_s1 + $0x520] sm:$0xff] }
  0x81   :  { %4979 = vmatpush.bf16.msrb.mxu3 %v12269_v23  ;;  %4941 = vmatmul.bf16.vlgmr.msrb.gmra.mxu0 %v105_v32  ;;  %v12321_v23 = vld [vmem:[%s18045_s1 + $0x560] sm:$0xff]  ;;  %v12336_v32 = vld [vmem:[%s18045_s1 + $0x5d8] sm:$0xff] }
  0x82   :  { %4985 = vmatpush.bf16.msra.mxu0 %v12284_v24  ;;  %4954 = vmatmul.bf16.vlgmr.msrb.gmra.mxu1 %v106_v34 }
  0x83   :  { %4998 = vmatpush.bf16.msra.mxu1 %v12292_v27  ;;  %4967 = vmatmul.bf16.vlgmr.msrb.gmra.mxu2 %v107_v33  ;;  %v12337_v27 = vld [vmem:[%s18045_s1 + $0x5e0] sm:$0xff] }
  0x84   :  { %5011 = vmatpush.bf16.msra.mxu2 %v12300_v30  ;;  %4980 = vmatmul.bf16.vlgmr.msrb.gmra.mxu3 %v108_v35  ;;  %v12320_v30 = vld [vmem:[%s18045_s1 + $0x558] sm:$0xff] }
  0x85   :  { %5024 = vmatpush.bf16.msra.mxu3 %v12308_v31  ;;  %v12328_v31 = vld [vmem:[%s18045_s1 + $0x598] sm:$0xff] }
  0x86   :  { %4986 = vmatpush.bf16.msra.mxu0 %v12283_v36 }
  0x87   :  { %4999 = vmatpush.bf16.msra.mxu1 %v12291_v37  ;;  %v12311_v37 = vld [vmem:[%s18045_s1 + $0x510] sm:$0xff] }
  0x88   :  { %5012 = vmatpush.bf16.msra.mxu2 %v12299_v38  ;;  %v12319_v38 = vld [vmem:[%s18045_s1 + $0x550] sm:$0xff] }
  0x89   :  { %5025 = vmatpush.bf16.msra.mxu3 %v12307_v39 }
  0x8a   :  { %4987 = vmatpush.bf16.msra.mxu0 %v12282_v40 }
  0x8b   :  { %5000 = vmatpush.bf16.msra.mxu1 %v12290_v41  ;;  %v12327_v41 = vld [vmem:[%s18045_s1 + $0x590] sm:$0xff] }
  0x8c   :  { %5013 = vmatpush.bf16.msra.mxu2 %v12298_v42  ;;  %v12335_v42 = vld [vmem:[%s18045_s1 + $0x5d0] sm:$0xff] }
  0x8d   :  { %5026 = vmatpush.bf16.msra.mxu3 %v12306_v43  ;;  %v12310_v43 = vld [vmem:[%s18045_s1 + $0x508] sm:$0xff] }
  0x8e   :  { %4988 = vmatpush.bf16.msra.mxu0 %v12281_v44  ;;  %v12318_v44 = vld [vmem:[%s18045_s1 + $0x548] sm:$0xff] }
  0x8f   :  { %5001 = vmatpush.bf16.msra.mxu1 %v12289_v45  ;;  %v12326_v45 = vld [vmem:[%s18045_s1 + $0x588] sm:$0xff] }
  0x90   :  { %5014 = vmatpush.bf16.msra.mxu2 %v12297_v46  ;;  %v12334_v46 = vld [vmem:[%s18045_s1 + $0x5c8] sm:$0xff] }
  0x91   :  { %5027 = vmatpush.bf16.msra.mxu3 %v12305_v47 }
  0x92   :  { %4989 = vmatpush.bf16.msra.mxu0 %v12280_v48 }
  0x93   :  { %5002 = vmatpush.bf16.msra.mxu1 %v12288_v49  ;;  %v12309_v49 = vld [vmem:[%s18045_s1 + $0x500] sm:$0xff] }
  0x94   :  { %5015 = vmatpush.bf16.msra.mxu2 %v12296_v50  ;;  %v12317_v50 = vld [vmem:[%s18045_s1 + $0x540] sm:$0xff] }
  0x95   :  { %5028 = vmatpush.bf16.msra.mxu3 %v12304_v51  ;;  %v12325_v51 = vld [vmem:[%s18045_s1 + $0x580] sm:$0xff] }
  0x96   :  { %4990 = vmatpush.bf16.msra.mxu0 %v12279_v52  ;;  %v12333_v52 = vld [vmem:[%s18045_s1 + $0x5c0] sm:$0xff] }
  0x97   :  { %5003 = vmatpush.bf16.msra.mxu1 %v12287_v53  ;;  %v12348_v53 = vld [vmem:[%s18045_s1 + $0x638] sm:$0xff] }
  0x98   :  { %5016 = vmatpush.bf16.msra.mxu2 %v12295_v54  ;;  %v41_v54 = vld [vmem:[%s18046_s0 + $0xa0] sm:$0xff] }
  0x99   :  { %5029 = vmatpush.bf16.msra.mxu3 %v12303_v55  ;;  %v43_v55 = vld [vmem:[%s18046_s0 + $0xb0] sm:$0xff] }
  0x9a   :  { %4991 = vmatpush.bf16.msra.mxu0 %v12278_v56  ;;  %v12356_v56 = vld [vmem:[%s18045_s1 + $0x678] sm:$0xff] }
  0x9b   :  { %5004 = vmatpush.bf16.msra.mxu1 %v12286_v57  ;;  %v42_v57 = vld [vmem:[%s18046_s0 + $0xa8] sm:$0xff] }
  0x9c   :  { %5017 = vmatpush.bf16.msra.mxu2 %v12294_v58  ;;  %v44_v58 = vld [vmem:[%s18046_s0 + $0xb8] sm:$0xff] }
  0x9d   :  { %5030 = vmatpush.bf16.msra.mxu3 %v12302_v59  ;;  %v12364_v59 = vld [vmem:[%s18045_s1 + $0x6b8] sm:$0xff] }
  0x9e   :  { %4992 = vmatpush.bf16.msra.mxu0 %v12277_v60  ;;  %v4786_v21 = vpop.f32.mrf.mxu0  ;;  %v12372_v60 = vld [vmem:[%s18045_s1 + $0x6f8] sm:$0xff] }
  0x9f   :  { %5005 = vmatpush.bf16.msra.mxu1 %v12285_v61  ;;  %v4787_v24 = vadd.f32 %v12869_v18, %v4786_v21  ;;  %v4799_v25 = vpop.f32.mrf.mxu1  ;;  %v113_v61 = vpack.c.bf16 %v41_v54, %v41_v54  ;;  %v12352_v18 = vld [vmem:[%s18045_s1 + $0x658] sm:$0xff]  ;;  %v12387_v54 = vld [vmem:[%s18045_s1 + $0x770] sm:$0xff] }
  0xa0   :  { %5018 = vmatpush.bf16.msra.mxu2 %v12293_v62  ;;  %v115_v62 = vpack.c.bf16 %v43_v55, %v43_v55  ;;  %v12395_v55 = vld [vmem:[%s18045_s1 + $0x7b0] sm:$0xff] }
  0xa1   :  { %5031 = vmatpush.bf16.msra.mxu3 %v12301_v63  ;;  %4993 = vmatmul.bf16.vlgmr.msra.gmra.mxu0 %v109_v8  ;;  %v4800_v28 = vadd.f32 %v4799_v25, %v4787_v24  ;;  %v114_v63 = vpack.c.bf16 %v42_v57, %v42_v57  ;;  %v12370_v8 = vld [vmem:[%s18045_s1 + $0x6e8] sm:$0xff]  ;;  %v12343_v25 = vld [vmem:[%s18045_s1 + $0x610] sm:$0xff] }
  0xa2   :  { %5037 = vmatpush.bf16.msrb.mxu0 %v12316_v0  ;;  %5006 = vmatmul.bf16.vlgmr.msra.gmra.mxu1 %v110_v10  ;;  %v116_v0 = vpack.c.bf16 %v44_v58, %v44_v58  ;;  %v12345_v10 = vld [vmem:[%s18045_s1 + $0x620] sm:$0xff]  ;;  %v12378_v57 = vld [vmem:[%s18045_s1 + $0x728] sm:$0xff] }
  0xa3   :  { %5050 = vmatpush.bf16.msrb.mxu1 %v12324_v3  ;;  %5019 = vmatmul.bf16.vlgmr.msra.gmra.mxu2 %v111_v9  ;;  %v12363_v3 = vld [vmem:[%s18045_s1 + $0x6b0] sm:$0xff]  ;;  %v12386_v58 = vld [vmem:[%s18045_s1 + $0x768] sm:$0xff] }
  0xa4   :  { %5063 = vmatpush.bf16.msrb.mxu2 %v12332_v6  ;;  %5032 = vmatmul.bf16.vlgmr.msra.gmra.mxu3 %v112_v11  ;;  %v12354_v6 = vld [vmem:[%s18045_s1 + $0x668] sm:$0xff]  ;;  %v12353_v11 = vld [vmem:[%s18045_s1 + $0x660] sm:$0xff] }
  0xa5   :  { %5076 = vmatpush.bf16.msrb.mxu3 %v12340_v7  ;;  %v12362_v7 = vld [vmem:[%s18045_s1 + $0x6a8] sm:$0xff] }
  0xa6   :  { %5038 = vmatpush.bf16.msrb.mxu0 %v12315_v12  ;;  %v4812_v33 = vpop.f32.mrf.mxu2  ;;  %v4788_v36 = vpop.f32.mrf.mxu0 }
  0xa7   :  { %5051 = vmatpush.bf16.msrb.mxu1 %v12323_v13  ;;  %v4813_v34 = vadd.f32 %v4812_v33, %v4800_v28  ;;  %v4825_v35 = vpop.f32.mrf.mxu3  ;;  %v4801_v40 = vpop.f32.mrf.mxu1  ;;  %v12358_v33 = vld [vmem:[%s18045_s1 + $0x688] sm:$0xff] }
  0xa8   :  { %5064 = vmatpush.bf16.msrb.mxu2 %v12331_v14  ;;  %v12361_v14 = vld [vmem:[%s18045_s1 + $0x6a0] sm:$0xff] }
  0xa9   :  { %5077 = vmatpush.bf16.msrb.mxu3 %v12339_v15  ;;  %v13797_v39 = vadd.f32 %v4825_v35, %v4813_v34  ;;  %v12369_v15 = vld [vmem:[%s18045_s1 + $0x6e0] sm:$0xff]  ;;  %v12366_v34 = vld [vmem:[%s18045_s1 + $0x6c8] sm:$0xff] }
  0xaa   :  { %5039 = vmatpush.bf16.msrb.mxu0 %v12314_v16  ;;  %v12365_v40 = vld [vmem:[%s18045_s1 + $0x6c0] sm:$0xff] }
  0xab   :  { %5052 = vmatpush.bf16.msrb.mxu1 %v12322_v17  ;;  %v12344_v17 = vld [vmem:[%s18045_s1 + $0x618] sm:$0xff] }
  0xac   :  { %5065 = vmatpush.bf16.msrb.mxu2 %v12330_v19  ;;  %v12360_v19 = vld [vmem:[%s18045_s1 + $0x698] sm:$0xff] }
  0xad   :  { %5078 = vmatpush.bf16.msrb.mxu3 %v12338_v20  ;;  %v12368_v20 = vld [vmem:[%s18045_s1 + $0x6d8] sm:$0xff] }
  0xae   :  { %5040 = vmatpush.bf16.msrb.mxu0 %v12313_v22  ;;  %v4814_v47 = vpop.f32.mrf.mxu2 }
  0xaf   :  { %5053 = vmatpush.bf16.msrb.mxu1 %v12321_v23  ;;  %v4827_v48 = vpop.f32.mrf.mxu3  ;;  %v12396_v47 = vld [vmem:[%s18045_s1 + $0x7b8] sm:$0xff] }
  0xb0   :  { %5066 = vmatpush.bf16.msrb.mxu2 %v12329_v26  ;;  %v12351_v26 = vld [vmem:[%s18045_s1 + $0x650] sm:$0xff]  ;;  %v12404_v48 = vld [vmem:[%s18045_s1 + $0x7f8] sm:$0xff] }
  0xb1   :  { %5079 = vmatpush.bf16.msrb.mxu3 %v12337_v27 }
  0xb2   :  { %5041 = vmatpush.bf16.msrb.mxu0 %v12312_v29  ;;  %v12359_v29 = vld [vmem:[%s18045_s1 + $0x690] sm:$0xff] }
  0xb3   :  { %5054 = vmatpush.bf16.msrb.mxu1 %v12320_v30  ;;  %v12367_v30 = vld [vmem:[%s18045_s1 + $0x6d0] sm:$0xff] }
  0xb4   :  { %5067 = vmatpush.bf16.msrb.mxu2 %v12328_v31  ;;  %v12342_v31 = vld [vmem:[%s18045_s1 + $0x608] sm:$0xff] }
  0xb5   :  { %5080 = vmatpush.bf16.msrb.mxu3 %v12336_v32  ;;  %v12350_v32 = vld [vmem:[%s18045_s1 + $0x648] sm:$0xff] }
  0xb6   :  { %5042 = vmatpush.bf16.msrb.mxu0 %v12311_v37  ;;  %v12341_v37 = vld [vmem:[%s18045_s1 + $0x600] sm:$0xff] }
  0xb7   :  { %5055 = vmatpush.bf16.msrb.mxu1 %v12319_v38  ;;  %v12349_v38 = vld [vmem:[%s18045_s1 + $0x640] sm:$0xff] }
  0xb8   :  { %5068 = vmatpush.bf16.msrb.mxu2 %v12327_v41  ;;  %v12380_v41 = vld [vmem:[%s18045_s1 + $0x738] sm:$0xff] }
  0xb9   :  { %5081 = vmatpush.bf16.msrb.mxu3 %v12335_v42  ;;  %v45_v42 = vld [vmem:[%s18046_s0 + $0xc0] sm:$0xff] }
  0xba   :  { %5043 = vmatpush.bf16.msrb.mxu0 %v12310_v43  ;;  %v47_v43 = vld [vmem:[%s18046_s0 + $0xd0] sm:$0xff] }
  0xbb   :  { %5056 = vmatpush.bf16.msrb.mxu1 %v12318_v44  ;;  %v12388_v44 = vld [vmem:[%s18045_s1 + $0x778] sm:$0xff] }
  0xbc   :  { %5069 = vmatpush.bf16.msrb.mxu2 %v12326_v45  ;;  %v46_v45 = vld [vmem:[%s18046_s0 + $0xc8] sm:$0xff] }
  0xbd   :  { %5082 = vmatpush.bf16.msrb.mxu3 %v12334_v46  ;;  %v48_v46 = vld [vmem:[%s18046_s0 + $0xd8] sm:$0xff] }
  0xbe   :  { %5044 = vmatpush.bf16.msrb.mxu0 %v12309_v49  ;;  %v4838_v9 = vpop.f32.mrf.mxu0  ;;  %v117_v49 = vpack.c.bf16 %v45_v42, %v45_v42  ;;  %v12419_v42 = vld [vmem:[%s18045_s1 + $0x870] sm:$0xff] }
  0xbf   :  { %5057 = vmatpush.bf16.msrb.mxu1 %v12317_v50  ;;  %v4839_v12 = vadd.f32 %v4838_v9, %v13797_v39  ;;  %v4851_v13 = vpop.f32.mrf.mxu1  ;;  %v12357_v39 = vld [vmem:[%s18045_s1 + $0x680] sm:$0xff]  ;;  %v119_v50 = vpack.c.bf16 %v47_v43, %v47_v43  ;;  %v12427_v43 = vld [vmem:[%s18045_s1 + $0x8b0] sm:$0xff] }
  0xc0   :  { %5070 = vmatpush.bf16.msrb.mxu2 %v12325_v51  ;;  %v118_v51 = vpack.c.bf16 %v46_v45, %v46_v45  ;;  %v12410_v45 = vld [vmem:[%s18045_s1 + $0x828] sm:$0xff] }
  0xc1   :  { %5083 = vmatpush.bf16.msrb.mxu3 %v12333_v52  ;;  %5045 = vmatmul.bf16.vlgmr.msrb.gmra.mxu0 %v113_v61  ;;  %v4852_v16 = vadd.f32 %v4851_v13, %v4839_v12  ;;  %v120_v52 = vpack.c.bf16 %v48_v46, %v48_v46  ;;  %v12418_v46 = vld [vmem:[%s18045_s1 + $0x868] sm:$0xff] }
  0xc2   :  { %5089 = vmatpush.bf16.msra.mxu0 %v12348_v53  ;;  %5058 = vmatmul.bf16.vlgmr.msrb.gmra.mxu1 %v114_v63  ;;  %v12379_v53 = vld [vmem:[%s18045_s1 + $0x730] sm:$0xff]  ;;  %v12377_v63 = vld [vmem:[%s18045_s1 + $0x720] sm:$0xff] }
  0xc3   :  { %5102 = vmatpush.bf16.msra.mxu1 %v12356_v56  ;;  %5071 = vmatmul.bf16.vlgmr.msrb.gmra.mxu2 %v115_v62  ;;  %v12403_v56 = vld [vmem:[%s18045_s1 + $0x7f0] sm:$0xff] }
  0xc4   :  { %5115 = vmatpush.bf16.msra.mxu2 %v12364_v59  ;;  %5084 = vmatmul.bf16.vlgmr.msrb.gmra.mxu3 %v116_v0  ;;  %v12394_v59 = vld [vmem:[%s18045_s1 + $0x7a8] sm:$0xff]  ;;  %v12385_v0 = vld [vmem:[%s18045_s1 + $0x760] sm:$0xff] }
  0xc5   :  { %5128 = vmatpush.bf16.msra.mxu3 %v12372_v60  ;;  %v12402_v60 = vld [vmem:[%s18045_s1 + $0x7e8] sm:$0xff] }
  0xc6   :  { %5090 = vmatpush.bf16.msra.mxu0 %v12347_v1  ;;  %v4864_v21 = vpop.f32.mrf.mxu2  ;;  %v4840_v24 = vpop.f32.mrf.mxu0 }
  0xc7   :  { %5103 = vmatpush.bf16.msra.mxu1 %v12355_v2  ;;  %v4865_v22 = vadd.f32 %v4864_v21, %v4852_v16  ;;  %v4877_v23 = vpop.f32.mrf.mxu3  ;;  %v4853_v28 = vpop.f32.mrf.mxu1  ;;  %v12393_v2 = vld [vmem:[%s18045_s1 + $0x7a0] sm:$0xff]  ;;  %v12390_v21 = vld [vmem:[%s18045_s1 + $0x788] sm:$0xff] }
  0xc8   :  { %5116 = vmatpush.bf16.msra.mxu2 %v12363_v3  ;;  %v12401_v3 = vld [vmem:[%s18045_s1 + $0x7e0] sm:$0xff] }
  0xc9   :  { %5129 = vmatpush.bf16.msra.mxu3 %v12371_v4  ;;  %v13908_v27 = vadd.f32 %v4877_v23, %v4865_v22  ;;  %v12398_v22 = vld [vmem:[%s18045_s1 + $0x7c8] sm:$0xff]  ;;  %v12397_v28 = vld [vmem:[%s18045_s1 + $0x7c0] sm:$0xff] }
  0xca   :  { %5091 = vmatpush.bf16.msra.mxu0 %v12346_v5  ;;  %v12376_v5 = vld [vmem:[%s18045_s1 + $0x718] sm:$0xff] }
  0xcb   :  { %5104 = vmatpush.bf16.msra.mxu1 %v12354_v6  ;;  %v12384_v6 = vld [vmem:[%s18045_s1 + $0x758] sm:$0xff] }
  0xcc   :  { %5117 = vmatpush.bf16.msra.mxu2 %v12362_v7  ;;  %v12392_v7 = vld [vmem:[%s18045_s1 + $0x798] sm:$0xff] }
  0xcd   :  { %5130 = vmatpush.bf16.msra.mxu3 %v12370_v8  ;;  %v12400_v8 = vld [vmem:[%s18045_s1 + $0x7d8] sm:$0xff] }
  0xce   :  { %5092 = vmatpush.bf16.msra.mxu0 %v12345_v10  ;;  %v4866_v35 = vpop.f32.mrf.mxu2 }
  0xcf   :  { %5105 = vmatpush.bf16.msra.mxu1 %v12353_v11  ;;  %v4879_v36 = vpop.f32.mrf.mxu3  ;;  %v12428_v35 = vld [vmem:[%s18045_s1 + $0x8b8] sm:$0xff] }
  0xd0   :  { %5118 = vmatpush.bf16.msra.mxu2 %v12361_v14  ;;  %v12375_v14 = vld [vmem:[%s18045_s1 + $0x710] sm:$0xff]  ;;  %v12436_v36 = vld [vmem:[%s18045_s1 + $0x8f8] sm:$0xff] }
  0xd1   :  { %5131 = vmatpush.bf16.msra.mxu3 %v12369_v15  ;;  %v12383_v15 = vld [vmem:[%s18045_s1 + $0x750] sm:$0xff] }
  0xd2   :  { %5093 = vmatpush.bf16.msra.mxu0 %v12344_v17  ;;  %v12391_v17 = vld [vmem:[%s18045_s1 + $0x790] sm:$0xff] }
  0xd3   :  { %5106 = vmatpush.bf16.msra.mxu1 %v12352_v18  ;;  %v12399_v18 = vld [vmem:[%s18045_s1 + $0x7d0] sm:$0xff] }
  0xd4   :  { %5119 = vmatpush.bf16.msra.mxu2 %v12360_v19  ;;  %v12374_v19 = vld [vmem:[%s18045_s1 + $0x708] sm:$0xff] }
  0xd5   :  { %5132 = vmatpush.bf16.msra.mxu3 %v12368_v20  ;;  %v12382_v20 = vld [vmem:[%s18045_s1 + $0x748] sm:$0xff] }
  0xd6   :  { %5094 = vmatpush.bf16.msra.mxu0 %v12343_v25  ;;  %v12373_v25 = vld [vmem:[%s18045_s1 + $0x700] sm:$0xff] }
  0xd7   :  { %5107 = vmatpush.bf16.msra.mxu1 %v12351_v26  ;;  %v12381_v26 = vld [vmem:[%s18045_s1 + $0x740] sm:$0xff] }
  0xd8   :  { %5120 = vmatpush.bf16.msra.mxu2 %v12359_v29  ;;  %v12412_v29 = vld [vmem:[%s18045_s1 + $0x838] sm:$0xff] }
  0xd9   :  { %5133 = vmatpush.bf16.msra.mxu3 %v12367_v30  ;;  %v49_v30 = vld [vmem:[%s18046_s0 + $0xe0] sm:$0xff] }
  0xda   :  { %5095 = vmatpush.bf16.msra.mxu0 %v12342_v31  ;;  %v51_v31 = vld [vmem:[%s18046_s0 + $0xf0] sm:$0xff] }
  0xdb   :  { %5108 = vmatpush.bf16.msra.mxu1 %v12350_v32  ;;  %v12420_v32 = vld [vmem:[%s18045_s1 + $0x878] sm:$0xff] }
  0xdc   :  { %5121 = vmatpush.bf16.msra.mxu2 %v12358_v33  ;;  %v50_v33 = vld [vmem:[%s18046_s0 + $0xe8] sm:$0xff] }
  0xdd   :  { %5134 = vmatpush.bf16.msra.mxu3 %v12366_v34  ;;  %v52_v34 = vld [vmem:[%s18046_s0 + $0xf8] sm:$0xff] }
  0xde   :  { %5096 = vmatpush.bf16.msra.mxu0 %v12341_v37  ;;  %v4890_v61 = vpop.f32.mrf.mxu0  ;;  %v121_v37 = vpack.c.bf16 %v49_v30, %v49_v30  ;;  %v12451_v30 = vld [vmem:[%s18045_s1 + $0x970] sm:$0xff] }
  0xdf   :  { %5109 = vmatpush.bf16.msra.mxu1 %v12349_v38  ;;  %v4891_v62 = vadd.f32 %v4890_v61, %v13908_v27  ;;  %v4903_v1 = vpop.f32.mrf.mxu1  ;;  %v12389_v27 = vld [vmem:[%s18045_s1 + $0x780] sm:$0xff]  ;;  %v123_v38 = vpack.c.bf16 %v51_v31, %v51_v31  ;;  %v12459_v31 = vld [vmem:[%s18045_s1 + $0x9b0] sm:$0xff] }
  0xe0   :  { %5122 = vmatpush.bf16.msra.mxu2 %v12357_v39  ;;  %v122_v39 = vpack.c.bf16 %v50_v33, %v50_v33  ;;  %v12442_v33 = vld [vmem:[%s18045_s1 + $0x928] sm:$0xff] }
  0xe1   :  { %5135 = vmatpush.bf16.msra.mxu3 %v12365_v40  ;;  %5097 = vmatmul.bf16.vlgmr.msra.gmra.mxu0 %v117_v49  ;;  %v4904_v4 = vadd.f32 %v4903_v1, %v4891_v62  ;;  %v124_v40 = vpack.c.bf16 %v52_v34, %v52_v34  ;;  %v12450_v34 = vld [vmem:[%s18045_s1 + $0x968] sm:$0xff] }
  0xe2   :  { %5141 = vmatpush.bf16.msrb.mxu0 %v12380_v41  ;;  %5110 = vmatmul.bf16.vlgmr.msra.gmra.mxu1 %v118_v51  ;;  %v12411_v41 = vld [vmem:[%s18045_s1 + $0x830] sm:$0xff]  ;;  %v12409_v51 = vld [vmem:[%s18045_s1 + $0x820] sm:$0xff] }
  0xe3   :  { %5154 = vmatpush.bf16.msrb.mxu1 %v12388_v44  ;;  %5123 = vmatmul.bf16.vlgmr.msra.gmra.mxu2 %v119_v50  ;;  %v12435_v44 = vld [vmem:[%s18045_s1 + $0x8f0] sm:$0xff] }
  0xe4   :  { %5167 = vmatpush.bf16.msrb.mxu2 %v12396_v47  ;;  %5136 = vmatmul.bf16.vlgmr.msra.gmra.mxu3 %v120_v52  ;;  %v12426_v47 = vld [vmem:[%s18045_s1 + $0x8a8] sm:$0xff]  ;;  %v12417_v52 = vld [vmem:[%s18045_s1 + $0x860] sm:$0xff] }
  0xe5   :  { %5180 = vmatpush.bf16.msrb.mxu3 %v12404_v48  ;;  %v12434_v48 = vld [vmem:[%s18045_s1 + $0x8e8] sm:$0xff] }
  0xe6   :  { %5142 = vmatpush.bf16.msrb.mxu0 %v12379_v53  ;;  %v4916_v9 = vpop.f32.mrf.mxu2  ;;  %v4892_v12 = vpop.f32.mrf.mxu0 }
  0xe7   :  { %5155 = vmatpush.bf16.msrb.mxu1 %v12387_v54  ;;  %v4917_v10 = vadd.f32 %v4916_v9, %v4904_v4  ;;  %v4929_v11 = vpop.f32.mrf.mxu3  ;;  %v4905_v16 = vpop.f32.mrf.mxu1  ;;  %v12425_v54 = vld [vmem:[%s18045_s1 + $0x8a0] sm:$0xff]  ;;  %v12422_v9 = vld [vmem:[%s18045_s1 + $0x888] sm:$0xff] }
  0xe8   :  { %5168 = vmatpush.bf16.msrb.mxu2 %v12395_v55  ;;  %v12433_v55 = vld [vmem:[%s18045_s1 + $0x8e0] sm:$0xff] }
  0xe9   :  { %5181 = vmatpush.bf16.msrb.mxu3 %v12403_v56  ;;  %v14013_v13 = vadd.f32 %v4929_v11, %v4917_v10  ;;  %v12430_v10 = vld [vmem:[%s18045_s1 + $0x8c8] sm:$0xff]  ;;  %v12429_v16 = vld [vmem:[%s18045_s1 + $0x8c0] sm:$0xff] }
  0xea   :  { %5143 = vmatpush.bf16.msrb.mxu0 %v12378_v57  ;;  %v12408_v57 = vld [vmem:[%s18045_s1 + $0x818] sm:$0xff] }
  0xeb   :  { %5156 = vmatpush.bf16.msrb.mxu1 %v12386_v58  ;;  %v12416_v58 = vld [vmem:[%s18045_s1 + $0x858] sm:$0xff] }
  0xec   :  { %5169 = vmatpush.bf16.msrb.mxu2 %v12394_v59  ;;  %v12424_v59 = vld [vmem:[%s18045_s1 + $0x898] sm:$0xff] }
  0xed   :  { %5182 = vmatpush.bf16.msrb.mxu3 %v12402_v60  ;;  %v12432_v60 = vld [vmem:[%s18045_s1 + $0x8d8] sm:$0xff] }
  0xee   :  { %5144 = vmatpush.bf16.msrb.mxu0 %v12377_v63  ;;  %v4918_v23 = vpop.f32.mrf.mxu2 }
  0xef   :  { %5157 = vmatpush.bf16.msrb.mxu1 %v12385_v0  ;;  %v4931_v24 = vpop.f32.mrf.mxu3  ;;  %v12460_v23 = vld [vmem:[%s18045_s1 + $0x9b8] sm:$0xff] }
  0xf0   :  { %5170 = vmatpush.bf16.msrb.mxu2 %v12393_v2  ;;  %v12407_v2 = vld [vmem:[%s18045_s1 + $0x810] sm:$0xff]  ;;  %v12468_v24 = vld [vmem:[%s18045_s1 + $0x9f8] sm:$0xff] }
  0xf1   :  { %5183 = vmatpush.bf16.msrb.mxu3 %v12401_v3  ;;  %v12415_v3 = vld [vmem:[%s18045_s1 + $0x850] sm:$0xff] }
  0xf2   :  { %5145 = vmatpush.bf16.msrb.mxu0 %v12376_v5  ;;  %v12423_v5 = vld [vmem:[%s18045_s1 + $0x890] sm:$0xff] }
  0xf3   :  { %5158 = vmatpush.bf16.msrb.mxu1 %v12384_v6  ;;  %v12431_v6 = vld [vmem:[%s18045_s1 + $0x8d0] sm:$0xff] }
  0xf4   :  { %5171 = vmatpush.bf16.msrb.mxu2 %v12392_v7  ;;  %v12406_v7 = vld [vmem:[%s18045_s1 + $0x808] sm:$0xff] }
  0xf5   :  { %5184 = vmatpush.bf16.msrb.mxu3 %v12400_v8  ;;  %v12414_v8 = vld [vmem:[%s18045_s1 + $0x848] sm:$0xff] }
  0xf6   :  { %5146 = vmatpush.bf16.msrb.mxu0 %v12375_v14  ;;  %v12413_v14 = vld [vmem:[%s18045_s1 + $0x840] sm:$0xff] }
  0xf7   :  { %5159 = vmatpush.bf16.msrb.mxu1 %v12383_v15  ;;  %v12421_v15 = vld [vmem:[%s18045_s1 + $0x880] sm:$0xff] }
  0xf8   :  { %5172 = vmatpush.bf16.msrb.mxu2 %v12391_v17  ;;  %v12444_v17 = vld [vmem:[%s18045_s1 + $0x938] sm:$0xff] }
  0xf9   :  { %5185 = vmatpush.bf16.msrb.mxu3 %v12399_v18  ;;  %v53_v18 = vld [vmem:[%s18046_s0 + $0x100] sm:$0xff] }
  0xfa   :  { %5147 = vmatpush.bf16.msrb.mxu0 %v12374_v19  ;;  %v55_v19 = vld [vmem:[%s18046_s0 + $0x110] sm:$0xff] }
  0xfb   :  { %5160 = vmatpush.bf16.msrb.mxu1 %v12382_v20  ;;  %v12452_v20 = vld [vmem:[%s18045_s1 + $0x978] sm:$0xff] }
  0xfc   :  { %5173 = vmatpush.bf16.msrb.mxu2 %v12390_v21  ;;  %v54_v21 = vld [vmem:[%s18046_s0 + $0x108] sm:$0xff] }
  0xfd   :  { %5186 = vmatpush.bf16.msrb.mxu3 %v12398_v22  ;;  %v56_v22 = vld [vmem:[%s18046_s0 + $0x118] sm:$0xff] }
  0xfe   :  { %5148 = vmatpush.bf16.msrb.mxu0 %v12373_v25  ;;  %v4942_v49 = vpop.f32.mrf.mxu0  ;;  %v125_v25 = vpack.c.bf16 %v53_v18, %v53_v18  ;;  %v12483_v18 = vld [vmem:[%s18045_s1 + $0xa70] sm:$0xff] }
  0xff   :  { %5161 = vmatpush.bf16.msrb.mxu1 %v12381_v26  ;;  %v4943_v50 = vadd.f32 %v4942_v49, %v14013_v13  ;;  %v4955_v53 = vpop.f32.mrf.mxu1  ;;  %v12405_v13 = vld [vmem:[%s18045_s1 + $0x800] sm:$0xff]  ;;  %v127_v26 = vpack.c.bf16 %v55_v19, %v55_v19  ;;  %v12491_v19 = vld [vmem:[%s18045_s1 + $0xab0] sm:$0xff] }
 0x100   :  { %5174 = vmatpush.bf16.msrb.mxu2 %v12389_v27  ;;  %v126_v27 = vpack.c.bf16 %v54_v21, %v54_v21  ;;  %v12474_v21 = vld [vmem:[%s18045_s1 + $0xa28] sm:$0xff] }
 0x101   :  { %5187 = vmatpush.bf16.msrb.mxu3 %v12397_v28  ;;  %5149 = vmatmul.bf16.vlgmr.msrb.gmra.mxu0 %v121_v37  ;;  %v4956_v56 = vadd.f32 %v4955_v53, %v4943_v50  ;;  %v128_v28 = vpack.c.bf16 %v56_v22, %v56_v22  ;;  %v12482_v22 = vld [vmem:[%s18045_s1 + $0xa68] sm:$0xff] }
 0x102   :  { %5193 = vmatpush.bf16.msra.mxu0 %v12412_v29  ;;  %5162 = vmatmul.bf16.vlgmr.msrb.gmra.mxu1 %v122_v39  ;;  %v12443_v29 = vld [vmem:[%s18045_s1 + $0x930] sm:$0xff]  ;;  %v12441_v39 = vld [vmem:[%s18045_s1 + $0x920] sm:$0xff] }
 0x103   :  { %5206 = vmatpush.bf16.msra.mxu1 %v12420_v32  ;;  %5175 = vmatmul.bf16.vlgmr.msrb.gmra.mxu2 %v123_v38  ;;  %v12467_v32 = vld [vmem:[%s18045_s1 + $0x9f0] sm:$0xff] }
 0x104   :  { %5219 = vmatpush.bf16.msra.mxu2 %v12428_v35  ;;  %5188 = vmatmul.bf16.vlgmr.msrb.gmra.mxu3 %v124_v40  ;;  %v12458_v35 = vld [vmem:[%s18045_s1 + $0x9a8] sm:$0xff]  ;;  %v12449_v40 = vld [vmem:[%s18045_s1 + $0x960] sm:$0xff] }
 0x105   :  { %5232 = vmatpush.bf16.msra.mxu3 %v12436_v36  ;;  %v12466_v36 = vld [vmem:[%s18045_s1 + $0x9e8] sm:$0xff] }
 0x106   :  { %5194 = vmatpush.bf16.msra.mxu0 %v12411_v41  ;;  %v4968_v61 = vpop.f32.mrf.mxu2  ;;  %v4944_v0 = vpop.f32.mrf.mxu0 }
 0x107   :  { %5207 = vmatpush.bf16.msra.mxu1 %v12419_v42  ;;  %v4969_v62 = vadd.f32 %v4968_v61, %v4956_v56  ;;  %v4981_v63 = vpop.f32.mrf.mxu3  ;;  %v4957_v4 = vpop.f32.mrf.mxu1  ;;  %v12457_v42 = vld [vmem:[%s18045_s1 + $0x9a0] sm:$0xff]  ;;  %v12454_v61 = vld [vmem:[%s18045_s1 + $0x988] sm:$0xff] }
 0x108   :  { %5220 = vmatpush.bf16.msra.mxu2 %v12427_v43  ;;  %v12465_v43 = vld [vmem:[%s18045_s1 + $0x9e0] sm:$0xff] }
 0x109   :  { %5233 = vmatpush.bf16.msra.mxu3 %v12435_v44  ;;  %v14124_v1 = vadd.f32 %v4981_v63, %v4969_v62  ;;  %v12462_v62 = vld [vmem:[%s18045_s1 + $0x9c8] sm:$0xff]  ;;  %v12461_v4 = vld [vmem:[%s18045_s1 + $0x9c0] sm:$0xff] }
 0x10a   :  { %5195 = vmatpush.bf16.msra.mxu0 %v12410_v45  ;;  %v12440_v45 = vld [vmem:[%s18045_s1 + $0x918] sm:$0xff] }
 0x10b   :  { %5208 = vmatpush.bf16.msra.mxu1 %v12418_v46  ;;  %v12448_v46 = vld [vmem:[%s18045_s1 + $0x958] sm:$0xff] }
 0x10c   :  { %5221 = vmatpush.bf16.msra.mxu2 %v12426_v47  ;;  %v12456_v47 = vld [vmem:[%s18045_s1 + $0x998] sm:$0xff] }
 0x10d   :  { %5234 = vmatpush.bf16.msra.mxu3 %v12434_v48  ;;  %v12464_v48 = vld [vmem:[%s18045_s1 + $0x9d8] sm:$0xff] }
 0x10e   :  { %5196 = vmatpush.bf16.msra.mxu0 %v12409_v51  ;;  %v4970_v11 = vpop.f32.mrf.mxu2 }
 0x10f   :  { %5209 = vmatpush.bf16.msra.mxu1 %v12417_v52  ;;  %v4983_v12 = vpop.f32.mrf.mxu3  ;;  %v12492_v11 = vld [vmem:[%s18045_s1 + $0xab8] sm:$0xff] }
 0x110   :  { %5222 = vmatpush.bf16.msra.mxu2 %v12425_v54  ;;  %v12439_v54 = vld [vmem:[%s18045_s1 + $0x910] sm:$0xff]  ;;  %v12500_v12 = vld [vmem:[%s18045_s1 + $0xaf8] sm:$0xff] }
 0x111   :  { %5235 = vmatpush.bf16.msra.mxu3 %v12433_v55  ;;  %v12447_v55 = vld [vmem:[%s18045_s1 + $0x950] sm:$0xff] }
 0x112   :  { %5197 = vmatpush.bf16.msra.mxu0 %v12408_v57  ;;  %v12455_v57 = vld [vmem:[%s18045_s1 + $0x990] sm:$0xff] }
 0x113   :  { %5210 = vmatpush.bf16.msra.mxu1 %v12416_v58  ;;  %v12463_v58 = vld [vmem:[%s18045_s1 + $0x9d0] sm:$0xff] }
 0x114   :  { %5223 = vmatpush.bf16.msra.mxu2 %v12424_v59  ;;  %v12438_v59 = vld [vmem:[%s18045_s1 + $0x908] sm:$0xff] }
 0x115   :  { %5236 = vmatpush.bf16.msra.mxu3 %v12432_v60  ;;  %v12446_v60 = vld [vmem:[%s18045_s1 + $0x948] sm:$0xff] }
 0x116   :  { %5198 = vmatpush.bf16.msra.mxu0 %v12407_v2  ;;  %v12445_v2 = vld [vmem:[%s18045_s1 + $0x940] sm:$0xff] }
 0x117   :  { %5211 = vmatpush.bf16.msra.mxu1 %v12415_v3  ;;  %v12453_v3 = vld [vmem:[%s18045_s1 + $0x980] sm:$0xff] }
 0x118   :  { %5224 = vmatpush.bf16.msra.mxu2 %v12423_v5  ;;  %v12476_v5 = vld [vmem:[%s18045_s1 + $0xa38] sm:$0xff] }
 0x119   :  { %5237 = vmatpush.bf16.msra.mxu3 %v12431_v6  ;;  %v57_v6 = vld [vmem:[%s18046_s0 + $0x120] sm:$0xff] }
 0x11a   :  { %5199 = vmatpush.bf16.msra.mxu0 %v12406_v7  ;;  %v59_v7 = vld [vmem:[%s18046_s0 + $0x130] sm:$0xff] }
 0x11b   :  { %5212 = vmatpush.bf16.msra.mxu1 %v12414_v8  ;;  %v12484_v8 = vld [vmem:[%s18045_s1 + $0xa78] sm:$0xff] }
 0x11c   :  { %5225 = vmatpush.bf16.msra.mxu2 %v12422_v9  ;;  %v58_v9 = vld [vmem:[%s18046_s0 + $0x128] sm:$0xff] }
 0x11d   :  { %5238 = vmatpush.bf16.msra.mxu3 %v12430_v10  ;;  %v60_v10 = vld [vmem:[%s18046_s0 + $0x138] sm:$0xff] }
 0x11e   :  { %5200 = vmatpush.bf16.msra.mxu0 %v12405_v13  ;;  %v4994_v37 = vpop.f32.mrf.mxu0  ;;  %v129_v13 = vpack.c.bf16 %v57_v6, %v57_v6  ;;  %v12515_v6 = vld [vmem:[%s18045_s1 + $0xb70] sm:$0xff] }
 0x11f   :  { %5213 = vmatpush.bf16.msra.mxu1 %v12413_v14  ;;  %v4995_v38 = vadd.f32 %v4994_v37, %v14124_v1  ;;  %v5007_v41 = vpop.f32.mrf.mxu1  ;;  %v12437_v1 = vld [vmem:[%s18045_s1 + $0x900] sm:$0xff]  ;;  %v131_v14 = vpack.c.bf16 %v59_v7, %v59_v7  ;;  %v12523_v7 = vld [vmem:[%s18045_s1 + $0xbb0] sm:$0xff] }
 0x120   :  { %5226 = vmatpush.bf16.msra.mxu2 %v12421_v15  ;;  %v130_v15 = vpack.c.bf16 %v58_v9, %v58_v9  ;;  %v12506_v9 = vld [vmem:[%s18045_s1 + $0xb28] sm:$0xff] }
 0x121   :  { %5239 = vmatpush.bf16.msra.mxu3 %v12429_v16  ;;  %5201 = vmatmul.bf16.vlgmr.msra.gmra.mxu0 %v125_v25  ;;  %v5008_v44 = vadd.f32 %v5007_v41, %v4995_v38  ;;  %v132_v16 = vpack.c.bf16 %v60_v10, %v60_v10  ;;  %v12514_v10 = vld [vmem:[%s18045_s1 + $0xb68] sm:$0xff] }
 0x122   :  { %5245 = vmatpush.bf16.msrb.mxu0 %v12444_v17  ;;  %5214 = vmatmul.bf16.vlgmr.msra.gmra.mxu1 %v126_v27  ;;  %v12475_v17 = vld [vmem:[%s18045_s1 + $0xa30] sm:$0xff]  ;;  %v12473_v27 = vld [vmem:[%s18045_s1 + $0xa20] sm:$0xff] }
 0x123   :  { %5258 = vmatpush.bf16.msrb.mxu1 %v12452_v20  ;;  %5227 = vmatmul.bf16.vlgmr.msra.gmra.mxu2 %v127_v26  ;;  %v12499_v20 = vld [vmem:[%s18045_s1 + $0xaf0] sm:$0xff] }
 0x124   :  { %5271 = vmatpush.bf16.msrb.mxu2 %v12460_v23  ;;  %5240 = vmatmul.bf16.vlgmr.msra.gmra.mxu3 %v128_v28  ;;  %v12490_v23 = vld [vmem:[%s18045_s1 + $0xaa8] sm:$0xff]  ;;  %v12481_v28 = vld [vmem:[%s18045_s1 + $0xa60] sm:$0xff] }
 0x125   :  { %5284 = vmatpush.bf16.msrb.mxu3 %v12468_v24  ;;  %v12498_v24 = vld [vmem:[%s18045_s1 + $0xae8] sm:$0xff] }
 0x126   :  { %5246 = vmatpush.bf16.msrb.mxu0 %v12443_v29  ;;  %v5020_v49 = vpop.f32.mrf.mxu2  ;;  %v4996_v52 = vpop.f32.mrf.mxu0 }
 0x127   :  { %5259 = vmatpush.bf16.msrb.mxu1 %v12451_v30  ;;  %v5021_v50 = vadd.f32 %v5020_v49, %v5008_v44  ;;  %v5033_v51 = vpop.f32.mrf.mxu3  ;;  %v5009_v56 = vpop.f32.mrf.mxu1  ;;  %v12489_v30 = vld [vmem:[%s18045_s1 + $0xaa0] sm:$0xff]  ;;  %v12486_v49 = vld [vmem:[%s18045_s1 + $0xa88] sm:$0xff] }
 0x128   :  { %5272 = vmatpush.bf16.msrb.mxu2 %v12459_v31  ;;  %v12497_v31 = vld [vmem:[%s18045_s1 + $0xae0] sm:$0xff] }
 0x129   :  { %5285 = vmatpush.bf16.msrb.mxu3 %v12467_v32  ;;  %v14235_v53 = vadd.f32 %v5033_v51, %v5021_v50  ;;  %v12494_v50 = vld [vmem:[%s18045_s1 + $0xac8] sm:$0xff]  ;;  %v12493_v56 = vld [vmem:[%s18045_s1 + $0xac0] sm:$0xff] }
 0x12a   :  { %5247 = vmatpush.bf16.msrb.mxu0 %v12442_v33  ;;  %v12472_v33 = vld [vmem:[%s18045_s1 + $0xa18] sm:$0xff] }
 0x12b   :  { %5260 = vmatpush.bf16.msrb.mxu1 %v12450_v34  ;;  %v12480_v34 = vld [vmem:[%s18045_s1 + $0xa58] sm:$0xff] }
 0x12c   :  { %5273 = vmatpush.bf16.msrb.mxu2 %v12458_v35  ;;  %v12488_v35 = vld [vmem:[%s18045_s1 + $0xa98] sm:$0xff] }
 0x12d   :  { %5286 = vmatpush.bf16.msrb.mxu3 %v12466_v36  ;;  %v12496_v36 = vld [vmem:[%s18045_s1 + $0xad8] sm:$0xff] }
 0x12e   :  { %5248 = vmatpush.bf16.msrb.mxu0 %v12441_v39  ;;  %v5022_v63 = vpop.f32.mrf.mxu2 }
 0x12f   :  { %5261 = vmatpush.bf16.msrb.mxu1 %v12449_v40  ;;  %v5035_v0 = vpop.f32.mrf.mxu3  ;;  %v12524_v63 = vld [vmem:[%s18045_s1 + $0xbb8] sm:$0xff] }
 0x130   :  { %5274 = vmatpush.bf16.msrb.mxu2 %v12457_v42  ;;  %v12471_v42 = vld [vmem:[%s18045_s1 + $0xa10] sm:$0xff]  ;;  %v12532_v0 = vld [vmem:[%s18045_s1 + $0xbf8] sm:$0xff] }
 0x131   :  { %5287 = vmatpush.bf16.msrb.mxu3 %v12465_v43  ;;  %v12479_v43 = vld [vmem:[%s18045_s1 + $0xa50] sm:$0xff] }
 0x132   :  { %5249 = vmatpush.bf16.msrb.mxu0 %v12440_v45  ;;  %v12487_v45 = vld [vmem:[%s18045_s1 + $0xa90] sm:$0xff] }
 0x133   :  { %5262 = vmatpush.bf16.msrb.mxu1 %v12448_v46  ;;  %v12495_v46 = vld [vmem:[%s18045_s1 + $0xad0] sm:$0xff] }
 0x134   :  { %5275 = vmatpush.bf16.msrb.mxu2 %v12456_v47  ;;  %v12470_v47 = vld [vmem:[%s18045_s1 + $0xa08] sm:$0xff] }
 0x135   :  { %5288 = vmatpush.bf16.msrb.mxu3 %v12464_v48  ;;  %v12478_v48 = vld [vmem:[%s18045_s1 + $0xa48] sm:$0xff] }
 0x136   :  { %5250 = vmatpush.bf16.msrb.mxu0 %v12439_v54  ;;  %v12477_v54 = vld [vmem:[%s18045_s1 + $0xa40] sm:$0xff] }
 0x137   :  { %5263 = vmatpush.bf16.msrb.mxu1 %v12447_v55  ;;  %v12485_v55 = vld [vmem:[%s18045_s1 + $0xa80] sm:$0xff] }
 0x138   :  { %5276 = vmatpush.bf16.msrb.mxu2 %v12455_v57  ;;  %v12508_v57 = vld [vmem:[%s18045_s1 + $0xb38] sm:$0xff] }
 0x139   :  { %5289 = vmatpush.bf16.msrb.mxu3 %v12463_v58  ;;  %v61_v58 = vld [vmem:[%s18046_s0 + $0x140] sm:$0xff] }
 0x13a   :  { %5251 = vmatpush.bf16.msrb.mxu0 %v12438_v59  ;;  %v63_v59 = vld [vmem:[%s18046_s0 + $0x150] sm:$0xff] }
 0x13b   :  { %5264 = vmatpush.bf16.msrb.mxu1 %v12446_v60  ;;  %v12516_v60 = vld [vmem:[%s18045_s1 + $0xb78] sm:$0xff] }
 0x13c   :  { %5277 = vmatpush.bf16.msrb.mxu2 %v12454_v61  ;;  %v62_v61 = vld [vmem:[%s18046_s0 + $0x148] sm:$0xff] }
 0x13d   :  { %5290 = vmatpush.bf16.msrb.mxu3 %v12462_v62  ;;  %v64_v62 = vld [vmem:[%s18046_s0 + $0x158] sm:$0xff] }
 0x13e   :  { %5252 = vmatpush.bf16.msrb.mxu0 %v12437_v1  ;;  %v5046_v25 = vpop.f32.mrf.mxu0  ;;  %v133_v1 = vpack.c.bf16 %v61_v58, %v61_v58  ;;  %v12547_v58 = vld [vmem:[%s18045_s1 + $0xc70] sm:$0xff] }
 0x13f   :  { %5265 = vmatpush.bf16.msrb.mxu1 %v12445_v2  ;;  %v5047_v26 = vadd.f32 %v5046_v25, %v14235_v53  ;;  %v5059_v29 = vpop.f32.mrf.mxu1  ;;  %v12469_v53 = vld [vmem:[%s18045_s1 + $0xa00] sm:$0xff]  ;;  %v135_v2 = vpack.c.bf16 %v63_v59, %v63_v59  ;;  %v12555_v59 = vld [vmem:[%s18045_s1 + $0xcb0] sm:$0xff] }
 0x140   :  { %5278 = vmatpush.bf16.msrb.mxu2 %v12453_v3  ;;  %v134_v3 = vpack.c.bf16 %v62_v61, %v62_v61  ;;  %v12538_v61 = vld [vmem:[%s18045_s1 + $0xc28] sm:$0xff] }
 0x141   :  { %5291 = vmatpush.bf16.msrb.mxu3 %v12461_v4  ;;  %5253 = vmatmul.bf16.vlgmr.msrb.gmra.mxu0 %v129_v13  ;;  %v5060_v32 = vadd.f32 %v5059_v29, %v5047_v26  ;;  %v136_v4 = vpack.c.bf16 %v64_v62, %v64_v62  ;;  %v12546_v62 = vld [vmem:[%s18045_s1 + $0xc68] sm:$0xff] }
 0x142   :  { %5297 = vmatpush.bf16.msra.mxu0 %v12476_v5  ;;  %5266 = vmatmul.bf16.vlgmr.msrb.gmra.mxu1 %v130_v15  ;;  %v12507_v5 = vld [vmem:[%s18045_s1 + $0xb30] sm:$0xff]  ;;  %v12505_v15 = vld [vmem:[%s18045_s1 + $0xb20] sm:$0xff] }
 0x143   :  { %5310 = vmatpush.bf16.msra.mxu1 %v12484_v8  ;;  %5279 = vmatmul.bf16.vlgmr.msrb.gmra.mxu2 %v131_v14  ;;  %v12531_v8 = vld [vmem:[%s18045_s1 + $0xbf0] sm:$0xff] }
 0x144   :  { %5323 = vmatpush.bf16.msra.mxu2 %v12492_v11  ;;  %5292 = vmatmul.bf16.vlgmr.msrb.gmra.mxu3 %v132_v16  ;;  %v12522_v11 = vld [vmem:[%s18045_s1 + $0xba8] sm:$0xff]  ;;  %v12513_v16 = vld [vmem:[%s18045_s1 + $0xb60] sm:$0xff] }
 0x145   :  { %5336 = vmatpush.bf16.msra.mxu3 %v12500_v12  ;;  %v12530_v12 = vld [vmem:[%s18045_s1 + $0xbe8] sm:$0xff] }
 0x146   :  { %5298 = vmatpush.bf16.msra.mxu0 %v12475_v17  ;;  %v5072_v37 = vpop.f32.mrf.mxu2  ;;  %v5048_v40 = vpop.f32.mrf.mxu0 }
 0x147   :  { %5311 = vmatpush.bf16.msra.mxu1 %v12483_v18  ;;  %v5073_v38 = vadd.f32 %v5072_v37, %v5060_v32  ;;  %v5085_v39 = vpop.f32.mrf.mxu3  ;;  %v5061_v44 = vpop.f32.mrf.mxu1  ;;  %v12521_v18 = vld [vmem:[%s18045_s1 + $0xba0] sm:$0xff]  ;;  %v12518_v37 = vld [vmem:[%s18045_s1 + $0xb88] sm:$0xff] }
 0x148   :  { %5324 = vmatpush.bf16.msra.mxu2 %v12491_v19  ;;  %v12529_v19 = vld [vmem:[%s18045_s1 + $0xbe0] sm:$0xff] }
 0x149   :  { %5337 = vmatpush.bf16.msra.mxu3 %v12499_v20  ;;  %v14346_v41 = vadd.f32 %v5085_v39, %v5073_v38  ;;  %v12526_v38 = vld [vmem:[%s18045_s1 + $0xbc8] sm:$0xff]  ;;  %v12525_v44 = vld [vmem:[%s18045_s1 + $0xbc0] sm:$0xff] }
 0x14a   :  { %5299 = vmatpush.bf16.msra.mxu0 %v12474_v21  ;;  %v12504_v21 = vld [vmem:[%s18045_s1 + $0xb18] sm:$0xff] }
 0x14b   :  { %5312 = vmatpush.bf16.msra.mxu1 %v12482_v22  ;;  %v12512_v22 = vld [vmem:[%s18045_s1 + $0xb58] sm:$0xff] }
 0x14c   :  { %5325 = vmatpush.bf16.msra.mxu2 %v12490_v23  ;;  %v12520_v23 = vld [vmem:[%s18045_s1 + $0xb98] sm:$0xff] }
 0x14d   :  { %5338 = vmatpush.bf16.msra.mxu3 %v12498_v24  ;;  %v12528_v24 = vld [vmem:[%s18045_s1 + $0xbd8] sm:$0xff] }
 0x14e   :  { %5300 = vmatpush.bf16.msra.mxu0 %v12473_v27  ;;  %v5074_v51 = vpop.f32.mrf.mxu2 }
 0x14f   :  { %5313 = vmatpush.bf16.msra.mxu1 %v12481_v28  ;;  %v5087_v52 = vpop.f32.mrf.mxu3  ;;  %v12556_v51 = vld [vmem:[%s18045_s1 + $0xcb8] sm:$0xff] }
 0x150   :  { %5326 = vmatpush.bf16.msra.mxu2 %v12489_v30  ;;  %v12503_v30 = vld [vmem:[%s18045_s1 + $0xb10] sm:$0xff]  ;;  %v12564_v52 = vld [vmem:[%s18045_s1 + $0xcf8] sm:$0xff] }
 0x151   :  { %5339 = vmatpush.bf16.msra.mxu3 %v12497_v31  ;;  %v12511_v31 = vld [vmem:[%s18045_s1 + $0xb50] sm:$0xff] }
 0x152   :  { %5301 = vmatpush.bf16.msra.mxu0 %v12472_v33  ;;  %v12519_v33 = vld [vmem:[%s18045_s1 + $0xb90] sm:$0xff] }
 0x153   :  { %5314 = vmatpush.bf16.msra.mxu1 %v12480_v34  ;;  %v12527_v34 = vld [vmem:[%s18045_s1 + $0xbd0] sm:$0xff] }
 0x154   :  { %5327 = vmatpush.bf16.msra.mxu2 %v12488_v35  ;;  %v12502_v35 = vld [vmem:[%s18045_s1 + $0xb08] sm:$0xff] }
 0x155   :  { %5340 = vmatpush.bf16.msra.mxu3 %v12496_v36  ;;  %v12510_v36 = vld [vmem:[%s18045_s1 + $0xb48] sm:$0xff] }
 0x156   :  { %5302 = vmatpush.bf16.msra.mxu0 %v12471_v42  ;;  %v12509_v42 = vld [vmem:[%s18045_s1 + $0xb40] sm:$0xff] }
 0x157   :  { %5315 = vmatpush.bf16.msra.mxu1 %v12479_v43  ;;  %v12517_v43 = vld [vmem:[%s18045_s1 + $0xb80] sm:$0xff] }
 0x158   :  { %5328 = vmatpush.bf16.msra.mxu2 %v12487_v45  ;;  %v12540_v45 = vld [vmem:[%s18045_s1 + $0xc38] sm:$0xff] }
 0x159   :  { %5341 = vmatpush.bf16.msra.mxu3 %v12495_v46  ;;  %v65_v46 = vld [vmem:[%s18046_s0 + $0x160] sm:$0xff] }
 0x15a   :  { %5303 = vmatpush.bf16.msra.mxu0 %v12470_v47  ;;  %v67_v47 = vld [vmem:[%s18046_s0 + $0x170] sm:$0xff] }
 0x15b   :  { %5316 = vmatpush.bf16.msra.mxu1 %v12478_v48  ;;  %v12548_v48 = vld [vmem:[%s18045_s1 + $0xc78] sm:$0xff] }
 0x15c   :  { %5329 = vmatpush.bf16.msra.mxu2 %v12486_v49  ;;  %v66_v49 = vld [vmem:[%s18046_s0 + $0x168] sm:$0xff] }
 0x15d   :  { %5342 = vmatpush.bf16.msra.mxu3 %v12494_v50  ;;  %v68_v50 = vld [vmem:[%s18046_s0 + $0x178] sm:$0xff] }
 0x15e   :  { %5304 = vmatpush.bf16.msra.mxu0 %v12469_v53  ;;  %v5098_v13 = vpop.f32.mrf.mxu0  ;;  %v137_v53 = vpack.c.bf16 %v65_v46, %v65_v46  ;;  %v12579_v46 = vld [vmem:[%s18045_s1 + $0xd70] sm:$0xff] }
 0x15f   :  { %5317 = vmatpush.bf16.msra.mxu1 %v12477_v54  ;;  %v5099_v14 = vadd.f32 %v5098_v13, %v14346_v41  ;;  %v5111_v17 = vpop.f32.mrf.mxu1  ;;  %v12501_v41 = vld [vmem:[%s18045_s1 + $0xb00] sm:$0xff]  ;;  %v139_v54 = vpack.c.bf16 %v67_v47, %v67_v47  ;;  %v12587_v47 = vld [vmem:[%s18045_s1 + $0xdb0] sm:$0xff] }
 0x160   :  { %5330 = vmatpush.bf16.msra.mxu2 %v12485_v55  ;;  %v138_v55 = vpack.c.bf16 %v66_v49, %v66_v49  ;;  %v12570_v49 = vld [vmem:[%s18045_s1 + $0xd28] sm:$0xff] }
 0x161   :  { %5343 = vmatpush.bf16.msra.mxu3 %v12493_v56  ;;  %5305 = vmatmul.bf16.vlgmr.msra.gmra.mxu0 %v133_v1  ;;  %v5112_v20 = vadd.f32 %v5111_v17, %v5099_v14  ;;  %v140_v56 = vpack.c.bf16 %v68_v50, %v68_v50  ;;  %v12578_v50 = vld [vmem:[%s18045_s1 + $0xd68] sm:$0xff] }
 0x162   :  { %5349 = vmatpush.bf16.msrb.mxu0 %v12508_v57  ;;  %5318 = vmatmul.bf16.vlgmr.msra.gmra.mxu1 %v134_v3  ;;  %v12539_v57 = vld [vmem:[%s18045_s1 + $0xc30] sm:$0xff]  ;;  %v12537_v3 = vld [vmem:[%s18045_s1 + $0xc20] sm:$0xff] }
 0x163   :  { %5362 = vmatpush.bf16.msrb.mxu1 %v12516_v60  ;;  %5331 = vmatmul.bf16.vlgmr.msra.gmra.mxu2 %v135_v2  ;;  %v12563_v60 = vld [vmem:[%s18045_s1 + $0xcf0] sm:$0xff] }
 0x164   :  { %5375 = vmatpush.bf16.msrb.mxu2 %v12524_v63  ;;  %5344 = vmatmul.bf16.vlgmr.msra.gmra.mxu3 %v136_v4  ;;  %v12554_v63 = vld [vmem:[%s18045_s1 + $0xca8] sm:$0xff]  ;;  %v12545_v4 = vld [vmem:[%s18045_s1 + $0xc60] sm:$0xff] }
 0x165   :  { %5388 = vmatpush.bf16.msrb.mxu3 %v12532_v0  ;;  %v12562_v0 = vld [vmem:[%s18045_s1 + $0xce8] sm:$0xff] }
 0x166   :  { %5350 = vmatpush.bf16.msrb.mxu0 %v12507_v5  ;;  %v5124_v25 = vpop.f32.mrf.mxu2  ;;  %v5100_v28 = vpop.f32.mrf.mxu0 }
 0x167   :  { %5363 = vmatpush.bf16.msrb.mxu1 %v12515_v6  ;;  %v5125_v26 = vadd.f32 %v5124_v25, %v5112_v20  ;;  %v5137_v27 = vpop.f32.mrf.mxu3  ;;  %v5113_v32 = vpop.f32.mrf.mxu1  ;;  %v12553_v6 = vld [vmem:[%s18045_s1 + $0xca0] sm:$0xff]  ;;  %v12550_v25 = vld [vmem:[%s18045_s1 + $0xc88] sm:$0xff] }
 0x168   :  { %5376 = vmatpush.bf16.msrb.mxu2 %v12523_v7  ;;  %v12561_v7 = vld [vmem:[%s18045_s1 + $0xce0] sm:$0xff] }
 0x169   :  { %5389 = vmatpush.bf16.msrb.mxu3 %v12531_v8  ;;  %v14457_v29 = vadd.f32 %v5137_v27, %v5125_v26  ;;  %v12558_v26 = vld [vmem:[%s18045_s1 + $0xcc8] sm:$0xff]  ;;  %v12557_v32 = vld [vmem:[%s18045_s1 + $0xcc0] sm:$0xff] }
 0x16a   :  { %5351 = vmatpush.bf16.msrb.mxu0 %v12506_v9  ;;  %v12536_v9 = vld [vmem:[%s18045_s1 + $0xc18] sm:$0xff] }
 0x16b   :  { %5364 = vmatpush.bf16.msrb.mxu1 %v12514_v10  ;;  %v12544_v10 = vld [vmem:[%s18045_s1 + $0xc58] sm:$0xff] }
 0x16c   :  { %5377 = vmatpush.bf16.msrb.mxu2 %v12522_v11  ;;  %v12552_v11 = vld [vmem:[%s18045_s1 + $0xc98] sm:$0xff] }
 0x16d   :  { %5390 = vmatpush.bf16.msrb.mxu3 %v12530_v12  ;;  %v12560_v12 = vld [vmem:[%s18045_s1 + $0xcd8] sm:$0xff] }
 0x16e   :  { %5352 = vmatpush.bf16.msrb.mxu0 %v12505_v15  ;;  %v5126_v39 = vpop.f32.mrf.mxu2 }
 0x16f   :  { %5365 = vmatpush.bf16.msrb.mxu1 %v12513_v16  ;;  %v5139_v40 = vpop.f32.mrf.mxu3  ;;  %v12588_v39 = vld [vmem:[%s18045_s1 + $0xdb8] sm:$0xff] }
 0x170   :  { %5378 = vmatpush.bf16.msrb.mxu2 %v12521_v18  ;;  %v12535_v18 = vld [vmem:[%s18045_s1 + $0xc10] sm:$0xff]  ;;  %v12596_v40 = vld [vmem:[%s18045_s1 + $0xdf8] sm:$0xff] }
 0x171   :  { %5391 = vmatpush.bf16.msrb.mxu3 %v12529_v19  ;;  %v12543_v19 = vld [vmem:[%s18045_s1 + $0xc50] sm:$0xff] }
 0x172   :  { %5353 = vmatpush.bf16.msrb.mxu0 %v12504_v21  ;;  %v12551_v21 = vld [vmem:[%s18045_s1 + $0xc90] sm:$0xff] }
 0x173   :  { %5366 = vmatpush.bf16.msrb.mxu1 %v12512_v22  ;;  %v12559_v22 = vld [vmem:[%s18045_s1 + $0xcd0] sm:$0xff] }
 0x174   :  { %5379 = vmatpush.bf16.msrb.mxu2 %v12520_v23  ;;  %v12534_v23 = vld [vmem:[%s18045_s1 + $0xc08] sm:$0xff] }
 0x175   :  { %5392 = vmatpush.bf16.msrb.mxu3 %v12528_v24  ;;  %v12542_v24 = vld [vmem:[%s18045_s1 + $0xc48] sm:$0xff] }
 0x176   :  { %5354 = vmatpush.bf16.msrb.mxu0 %v12503_v30  ;;  %v12541_v30 = vld [vmem:[%s18045_s1 + $0xc40] sm:$0xff] }
 0x177   :  { %5367 = vmatpush.bf16.msrb.mxu1 %v12511_v31  ;;  %v12549_v31 = vld [vmem:[%s18045_s1 + $0xc80] sm:$0xff] }
 0x178   :  { %5380 = vmatpush.bf16.msrb.mxu2 %v12519_v33  ;;  %v12572_v33 = vld [vmem:[%s18045_s1 + $0xd38] sm:$0xff] }
 0x179   :  { %5393 = vmatpush.bf16.msrb.mxu3 %v12527_v34  ;;  %v69_v34 = vld [vmem:[%s18046_s0 + $0x180] sm:$0xff] }
 0x17a   :  { %5355 = vmatpush.bf16.msrb.mxu0 %v12502_v35  ;;  %v71_v35 = vld [vmem:[%s18046_s0 + $0x190] sm:$0xff] }
 0x17b   :  { %5368 = vmatpush.bf16.msrb.mxu1 %v12510_v36  ;;  %v12580_v36 = vld [vmem:[%s18045_s1 + $0xd78] sm:$0xff] }
 0x17c   :  { %5381 = vmatpush.bf16.msrb.mxu2 %v12518_v37  ;;  %v70_v37 = vld [vmem:[%s18046_s0 + $0x188] sm:$0xff] }
 0x17d   :  { %5394 = vmatpush.bf16.msrb.mxu3 %v12526_v38  ;;  %v72_v38 = vld [vmem:[%s18046_s0 + $0x198] sm:$0xff] }
 0x17e   :  { %5356 = vmatpush.bf16.msrb.mxu0 %v12501_v41  ;;  %v5150_v1 = vpop.f32.mrf.mxu0  ;;  %v141_v41 = vpack.c.bf16 %v69_v34, %v69_v34  ;;  %v12611_v34 = vld [vmem:[%s18045_s1 + $0xe70] sm:$0xff] }
 0x17f   :  { %5369 = vmatpush.bf16.msrb.mxu1 %v12509_v42  ;;  %v5151_v2 = vadd.f32 %v5150_v1, %v14457_v29  ;;  %v5163_v5 = vpop.f32.mrf.mxu1  ;;  %v12533_v29 = vld [vmem:[%s18045_s1 + $0xc00] sm:$0xff]  ;;  %v143_v42 = vpack.c.bf16 %v71_v35, %v71_v35  ;;  %v12619_v35 = vld [vmem:[%s18045_s1 + $0xeb0] sm:$0xff] }
 0x180   :  { %5382 = vmatpush.bf16.msrb.mxu2 %v12517_v43  ;;  %v142_v43 = vpack.c.bf16 %v70_v37, %v70_v37  ;;  %v12602_v37 = vld [vmem:[%s18045_s1 + $0xe28] sm:$0xff] }
 0x181   :  { %5395 = vmatpush.bf16.msrb.mxu3 %v12525_v44  ;;  %5357 = vmatmul.bf16.vlgmr.msrb.gmra.mxu0 %v137_v53  ;;  %v5164_v8 = vadd.f32 %v5163_v5, %v5151_v2  ;;  %v144_v44 = vpack.c.bf16 %v72_v38, %v72_v38  ;;  %v12610_v38 = vld [vmem:[%s18045_s1 + $0xe68] sm:$0xff] }
 0x182   :  { %5401 = vmatpush.bf16.msra.mxu0 %v12540_v45  ;;  %5370 = vmatmul.bf16.vlgmr.msrb.gmra.mxu1 %v138_v55  ;;  %v12571_v45 = vld [vmem:[%s18045_s1 + $0xd30] sm:$0xff]  ;;  %v12569_v55 = vld [vmem:[%s18045_s1 + $0xd20] sm:$0xff] }
 0x183   :  { %5414 = vmatpush.bf16.msra.mxu1 %v12548_v48  ;;  %5383 = vmatmul.bf16.vlgmr.msrb.gmra.mxu2 %v139_v54  ;;  %v12595_v48 = vld [vmem:[%s18045_s1 + $0xdf0] sm:$0xff] }
 0x184   :  { %5427 = vmatpush.bf16.msra.mxu2 %v12556_v51  ;;  %5396 = vmatmul.bf16.vlgmr.msrb.gmra.mxu3 %v140_v56  ;;  %v12586_v51 = vld [vmem:[%s18045_s1 + $0xda8] sm:$0xff]  ;;  %v12577_v56 = vld [vmem:[%s18045_s1 + $0xd60] sm:$0xff] }
 0x185   :  { %5440 = vmatpush.bf16.msra.mxu3 %v12564_v52  ;;  %v12594_v52 = vld [vmem:[%s18045_s1 + $0xde8] sm:$0xff] }
 0x186   :  { %5402 = vmatpush.bf16.msra.mxu0 %v12539_v57  ;;  %v5176_v13 = vpop.f32.mrf.mxu2  ;;  %v5152_v16 = vpop.f32.mrf.mxu0 }
 0x187   :  { %5415 = vmatpush.bf16.msra.mxu1 %v12547_v58  ;;  %v5177_v14 = vadd.f32 %v5176_v13, %v5164_v8  ;;  %v5189_v15 = vpop.f32.mrf.mxu3  ;;  %v5165_v20 = vpop.f32.mrf.mxu1  ;;  %v12585_v58 = vld [vmem:[%s18045_s1 + $0xda0] sm:$0xff]  ;;  %v12582_v13 = vld [vmem:[%s18045_s1 + $0xd88] sm:$0xff] }
 0x188   :  { %5428 = vmatpush.bf16.msra.mxu2 %v12555_v59  ;;  %v12593_v59 = vld [vmem:[%s18045_s1 + $0xde0] sm:$0xff] }
 0x189   :  { %5441 = vmatpush.bf16.msra.mxu3 %v12563_v60  ;;  %v14568_v17 = vadd.f32 %v5189_v15, %v5177_v14  ;;  %v12590_v14 = vld [vmem:[%s18045_s1 + $0xdc8] sm:$0xff]  ;;  %v12589_v20 = vld [vmem:[%s18045_s1 + $0xdc0] sm:$0xff] }
 0x18a   :  { %5403 = vmatpush.bf16.msra.mxu0 %v12538_v61  ;;  %v12568_v61 = vld [vmem:[%s18045_s1 + $0xd18] sm:$0xff] }
 0x18b   :  { %5416 = vmatpush.bf16.msra.mxu1 %v12546_v62  ;;  %v12576_v62 = vld [vmem:[%s18045_s1 + $0xd58] sm:$0xff] }
 0x18c   :  { %5429 = vmatpush.bf16.msra.mxu2 %v12554_v63  ;;  %v12584_v63 = vld [vmem:[%s18045_s1 + $0xd98] sm:$0xff] }
 0x18d   :  { %5442 = vmatpush.bf16.msra.mxu3 %v12562_v0  ;;  %v12592_v0 = vld [vmem:[%s18045_s1 + $0xdd8] sm:$0xff] }
 0x18e   :  { %5404 = vmatpush.bf16.msra.mxu0 %v12537_v3  ;;  %v5178_v27 = vpop.f32.mrf.mxu2 }
 0x18f   :  { %5417 = vmatpush.bf16.msra.mxu1 %v12545_v4  ;;  %v5191_v28 = vpop.f32.mrf.mxu3  ;;  %v12620_v27 = vld [vmem:[%s18045_s1 + $0xeb8] sm:$0xff] }
 0x190   :  { %5430 = vmatpush.bf16.msra.mxu2 %v12553_v6  ;;  %v12567_v6 = vld [vmem:[%s18045_s1 + $0xd10] sm:$0xff]  ;;  %v12628_v28 = vld [vmem:[%s18045_s1 + $0xef8] sm:$0xff] }
 0x191   :  { %5443 = vmatpush.bf16.msra.mxu3 %v12561_v7  ;;  %v12575_v7 = vld [vmem:[%s18045_s1 + $0xd50] sm:$0xff] }
 0x192   :  { %5405 = vmatpush.bf16.msra.mxu0 %v12536_v9  ;;  %v12583_v9 = vld [vmem:[%s18045_s1 + $0xd90] sm:$0xff] }
 0x193   :  { %5418 = vmatpush.bf16.msra.mxu1 %v12544_v10  ;;  %v12591_v10 = vld [vmem:[%s18045_s1 + $0xdd0] sm:$0xff] }
 0x194   :  { %5431 = vmatpush.bf16.msra.mxu2 %v12552_v11  ;;  %v12566_v11 = vld [vmem:[%s18045_s1 + $0xd08] sm:$0xff] }
 0x195   :  { %5444 = vmatpush.bf16.msra.mxu3 %v12560_v12  ;;  %v12574_v12 = vld [vmem:[%s18045_s1 + $0xd48] sm:$0xff] }
 0x196   :  { %5406 = vmatpush.bf16.msra.mxu0 %v12535_v18  ;;  %v12573_v18 = vld [vmem:[%s18045_s1 + $0xd40] sm:$0xff] }
 0x197   :  { %5419 = vmatpush.bf16.msra.mxu1 %v12543_v19  ;;  %v12581_v19 = vld [vmem:[%s18045_s1 + $0xd80] sm:$0xff] }
 0x198   :  { %5432 = vmatpush.bf16.msra.mxu2 %v12551_v21  ;;  %v12604_v21 = vld [vmem:[%s18045_s1 + $0xe38] sm:$0xff] }
 0x199   :  { %5445 = vmatpush.bf16.msra.mxu3 %v12559_v22  ;;  %v73_v22 = vld [vmem:[%s18046_s0 + $0x1a0] sm:$0xff] }
 0x19a   :  { %5407 = vmatpush.bf16.msra.mxu0 %v12534_v23  ;;  %v75_v23 = vld [vmem:[%s18046_s0 + $0x1b0] sm:$0xff] }
 0x19b   :  { %5420 = vmatpush.bf16.msra.mxu1 %v12542_v24  ;;  %v12612_v24 = vld [vmem:[%s18045_s1 + $0xe78] sm:$0xff] }
 0x19c   :  { %5433 = vmatpush.bf16.msra.mxu2 %v12550_v25  ;;  %v74_v25 = vld [vmem:[%s18046_s0 + $0x1a8] sm:$0xff] }
 0x19d   :  { %5446 = vmatpush.bf16.msra.mxu3 %v12558_v26  ;;  %v76_v26 = vld [vmem:[%s18046_s0 + $0x1b8] sm:$0xff] }
 0x19e   :  { %5408 = vmatpush.bf16.msra.mxu0 %v12533_v29  ;;  %v5202_v53 = vpop.f32.mrf.mxu0  ;;  %v145_v29 = vpack.c.bf16 %v73_v22, %v73_v22  ;;  %v12643_v22 = vld [vmem:[%s18045_s1 + $0xf70] sm:$0xff] }
 0x19f   :  { %5421 = vmatpush.bf16.msra.mxu1 %v12541_v30  ;;  %v5203_v54 = vadd.f32 %v5202_v53, %v14568_v17  ;;  %v5215_v57 = vpop.f32.mrf.mxu1  ;;  %v12565_v17 = vld [vmem:[%s18045_s1 + $0xd00] sm:$0xff]  ;;  %v147_v30 = vpack.c.bf16 %v75_v23, %v75_v23  ;;  %v12651_v23 = vld [vmem:[%s18045_s1 + $0xfb0] sm:$0xff] }
 0x1a0   :  { %5434 = vmatpush.bf16.msra.mxu2 %v12549_v31  ;;  %v146_v31 = vpack.c.bf16 %v74_v25, %v74_v25  ;;  %v12634_v25 = vld [vmem:[%s18045_s1 + $0xf28] sm:$0xff] }
 0x1a1   :  { %5447 = vmatpush.bf16.msra.mxu3 %v12557_v32  ;;  %5409 = vmatmul.bf16.vlgmr.msra.gmra.mxu0 %v141_v41  ;;  %v5216_v60 = vadd.f32 %v5215_v57, %v5203_v54  ;;  %v148_v32 = vpack.c.bf16 %v76_v26, %v76_v26  ;;  %v12642_v26 = vld [vmem:[%s18045_s1 + $0xf68] sm:$0xff] }
 0x1a2   :  { %5453 = vmatpush.bf16.msrb.mxu0 %v12572_v33  ;;  %5422 = vmatmul.bf16.vlgmr.msra.gmra.mxu1 %v142_v43  ;;  %v12603_v33 = vld [vmem:[%s18045_s1 + $0xe30] sm:$0xff]  ;;  %v12601_v43 = vld [vmem:[%s18045_s1 + $0xe20] sm:$0xff] }
 0x1a3   :  { %5466 = vmatpush.bf16.msrb.mxu1 %v12580_v36  ;;  %5435 = vmatmul.bf16.vlgmr.msra.gmra.mxu2 %v143_v42  ;;  %v12627_v36 = vld [vmem:[%s18045_s1 + $0xef0] sm:$0xff] }
 0x1a4   :  { %5479 = vmatpush.bf16.msrb.mxu2 %v12588_v39  ;;  %5448 = vmatmul.bf16.vlgmr.msra.gmra.mxu3 %v144_v44  ;;  %v12618_v39 = vld [vmem:[%s18045_s1 + $0xea8] sm:$0xff]  ;;  %v12609_v44 = vld [vmem:[%s18045_s1 + $0xe60] sm:$0xff] }
 0x1a5   :  { %5492 = vmatpush.bf16.msrb.mxu3 %v12596_v40  ;;  %v12626_v40 = vld [vmem:[%s18045_s1 + $0xee8] sm:$0xff] }
 0x1a6   :  { %5454 = vmatpush.bf16.msrb.mxu0 %v12571_v45  ;;  %v5228_v1 = vpop.f32.mrf.mxu2  ;;  %v5204_v4 = vpop.f32.mrf.mxu0 }
 0x1a7   :  { %5467 = vmatpush.bf16.msrb.mxu1 %v12579_v46  ;;  %v5229_v2 = vadd.f32 %v5228_v1, %v5216_v60  ;;  %v5241_v3 = vpop.f32.mrf.mxu3  ;;  %v5217_v8 = vpop.f32.mrf.mxu1  ;;  %v12617_v46 = vld [vmem:[%s18045_s1 + $0xea0] sm:$0xff]  ;;  %v12614_v1 = vld [vmem:[%s18045_s1 + $0xe88] sm:$0xff] }
 0x1a8   :  { %5480 = vmatpush.bf16.msrb.mxu2 %v12587_v47  ;;  %v12625_v47 = vld [vmem:[%s18045_s1 + $0xee0] sm:$0xff] }
 0x1a9   :  { %5493 = vmatpush.bf16.msrb.mxu3 %v12595_v48  ;;  %v14679_v5 = vadd.f32 %v5241_v3, %v5229_v2  ;;  %v12622_v2 = vld [vmem:[%s18045_s1 + $0xec8] sm:$0xff]  ;;  %v12621_v8 = vld [vmem:[%s18045_s1 + $0xec0] sm:$0xff] }
 0x1aa   :  { %5455 = vmatpush.bf16.msrb.mxu0 %v12570_v49  ;;  %v12600_v49 = vld [vmem:[%s18045_s1 + $0xe18] sm:$0xff] }
 0x1ab   :  { %5468 = vmatpush.bf16.msrb.mxu1 %v12578_v50  ;;  %v12608_v50 = vld [vmem:[%s18045_s1 + $0xe58] sm:$0xff] }
 0x1ac   :  { %5481 = vmatpush.bf16.msrb.mxu2 %v12586_v51  ;;  %v12616_v51 = vld [vmem:[%s18045_s1 + $0xe98] sm:$0xff] }
 0x1ad   :  { %5494 = vmatpush.bf16.msrb.mxu3 %v12594_v52  ;;  %v12624_v52 = vld [vmem:[%s18045_s1 + $0xed8] sm:$0xff] }
 0x1ae   :  { %5456 = vmatpush.bf16.msrb.mxu0 %v12569_v55  ;;  %v5230_v15 = vpop.f32.mrf.mxu2 }
 0x1af   :  { %5469 = vmatpush.bf16.msrb.mxu1 %v12577_v56  ;;  %v5243_v16 = vpop.f32.mrf.mxu3  ;;  %v12652_v15 = vld [vmem:[%s18045_s1 + $0xfb8] sm:$0xff] }
 0x1b0   :  { %5482 = vmatpush.bf16.msrb.mxu2 %v12585_v58  ;;  %v12599_v58 = vld [vmem:[%s18045_s1 + $0xe10] sm:$0xff]  ;;  %v12660_v16 = vld [vmem:[%s18045_s1 + $0xff8] sm:$0xff] }
 0x1b1   :  { %5495 = vmatpush.bf16.msrb.mxu3 %v12593_v59  ;;  %v12607_v59 = vld [vmem:[%s18045_s1 + $0xe50] sm:$0xff] }
 0x1b2   :  { %5457 = vmatpush.bf16.msrb.mxu0 %v12568_v61  ;;  %v12615_v61 = vld [vmem:[%s18045_s1 + $0xe90] sm:$0xff] }
 0x1b3   :  { %5470 = vmatpush.bf16.msrb.mxu1 %v12576_v62  ;;  %v12623_v62 = vld [vmem:[%s18045_s1 + $0xed0] sm:$0xff] }
 0x1b4   :  { %5483 = vmatpush.bf16.msrb.mxu2 %v12584_v63  ;;  %v12598_v63 = vld [vmem:[%s18045_s1 + $0xe08] sm:$0xff] }
 0x1b5   :  { %5496 = vmatpush.bf16.msrb.mxu3 %v12592_v0  ;;  %v12606_v0 = vld [vmem:[%s18045_s1 + $0xe48] sm:$0xff] }
 0x1b6   :  { %5458 = vmatpush.bf16.msrb.mxu0 %v12567_v6  ;;  %v12605_v6 = vld [vmem:[%s18045_s1 + $0xe40] sm:$0xff] }
 0x1b7   :  { %5471 = vmatpush.bf16.msrb.mxu1 %v12575_v7  ;;  %v12613_v7 = vld [vmem:[%s18045_s1 + $0xe80] sm:$0xff] }
 0x1b8   :  { %5484 = vmatpush.bf16.msrb.mxu2 %v12583_v9  ;;  %v12636_v9 = vld [vmem:[%s18045_s1 + $0xf38] sm:$0xff] }
 0x1b9   :  { %5497 = vmatpush.bf16.msrb.mxu3 %v12591_v10  ;;  %v77_v10 = vld [vmem:[%s18046_s0 + $0x1c0] sm:$0xff] }
 0x1ba   :  { %5459 = vmatpush.bf16.msrb.mxu0 %v12566_v11  ;;  %v79_v11 = vld [vmem:[%s18046_s0 + $0x1d0] sm:$0xff] }
 0x1bb   :  { %5472 = vmatpush.bf16.msrb.mxu1 %v12574_v12  ;;  %v12644_v12 = vld [vmem:[%s18045_s1 + $0xf78] sm:$0xff] }
 0x1bc   :  { %5485 = vmatpush.bf16.msrb.mxu2 %v12582_v13  ;;  %v78_v13 = vld [vmem:[%s18046_s0 + $0x1c8] sm:$0xff] }
 0x1bd   :  { %5498 = vmatpush.bf16.msrb.mxu3 %v12590_v14  ;;  %v80_v14 = vld [vmem:[%s18046_s0 + $0x1d8] sm:$0xff] }
 0x1be   :  { %5460 = vmatpush.bf16.msrb.mxu0 %v12565_v17  ;;  %v5254_v41 = vpop.f32.mrf.mxu0  ;;  %v149_v17 = vpack.c.bf16 %v77_v10, %v77_v10  ;;  %v12675_v10 = vld [vmem:[%s18045_s1 + $0x1070] sm:$0xff] }
 0x1bf   :  { %5473 = vmatpush.bf16.msrb.mxu1 %v12573_v18  ;;  %v5255_v42 = vadd.f32 %v5254_v41, %v14679_v5  ;;  %v5267_v45 = vpop.f32.mrf.mxu1  ;;  %v12597_v5 = vld [vmem:[%s18045_s1 + $0xe00] sm:$0xff]  ;;  %v151_v18 = vpack.c.bf16 %v79_v11, %v79_v11  ;;  %v12683_v11 = vld [vmem:[%s18045_s1 + $0x10b0] sm:$0xff] }
 0x1c0   :  { %5486 = vmatpush.bf16.msrb.mxu2 %v12581_v19  ;;  %v150_v19 = vpack.c.bf16 %v78_v13, %v78_v13  ;;  %v12666_v13 = vld [vmem:[%s18045_s1 + $0x1028] sm:$0xff] }
 0x1c1   :  { %5499 = vmatpush.bf16.msrb.mxu3 %v12589_v20  ;;  %5461 = vmatmul.bf16.vlgmr.msrb.gmra.mxu0 %v145_v29  ;;  %v5268_v48 = vadd.f32 %v5267_v45, %v5255_v42  ;;  %v152_v20 = vpack.c.bf16 %v80_v14, %v80_v14  ;;  %v12674_v14 = vld [vmem:[%s18045_s1 + $0x1068] sm:$0xff] }
 0x1c2   :  { %5505 = vmatpush.bf16.msra.mxu0 %v12604_v21  ;;  %5474 = vmatmul.bf16.vlgmr.msrb.gmra.mxu1 %v146_v31  ;;  %v12635_v21 = vld [vmem:[%s18045_s1 + $0xf30] sm:$0xff]  ;;  %v12633_v31 = vld [vmem:[%s18045_s1 + $0xf20] sm:$0xff] }
 0x1c3   :  { %5518 = vmatpush.bf16.msra.mxu1 %v12612_v24  ;;  %5487 = vmatmul.bf16.vlgmr.msrb.gmra.mxu2 %v147_v30  ;;  %v12659_v24 = vld [vmem:[%s18045_s1 + $0xff0] sm:$0xff] }
 0x1c4   :  { %5531 = vmatpush.bf16.msra.mxu2 %v12620_v27  ;;  %5500 = vmatmul.bf16.vlgmr.msrb.gmra.mxu3 %v148_v32  ;;  %v12650_v27 = vld [vmem:[%s18045_s1 + $0xfa8] sm:$0xff]  ;;  %v12641_v32 = vld [vmem:[%s18045_s1 + $0xf60] sm:$0xff] }
 0x1c5   :  { %5544 = vmatpush.bf16.msra.mxu3 %v12628_v28  ;;  %v12658_v28 = vld [vmem:[%s18045_s1 + $0xfe8] sm:$0xff] }
 0x1c6   :  { %5506 = vmatpush.bf16.msra.mxu0 %v12603_v33  ;;  %v5280_v53 = vpop.f32.mrf.mxu2  ;;  %v5256_v56 = vpop.f32.mrf.mxu0 }
 0x1c7   :  { %5519 = vmatpush.bf16.msra.mxu1 %v12611_v34  ;;  %v5281_v54 = vadd.f32 %v5280_v53, %v5268_v48  ;;  %v5293_v55 = vpop.f32.mrf.mxu3  ;;  %v5269_v60 = vpop.f32.mrf.mxu1  ;;  %v12649_v34 = vld [vmem:[%s18045_s1 + $0xfa0] sm:$0xff]  ;;  %v12646_v53 = vld [vmem:[%s18045_s1 + $0xf88] sm:$0xff] }
 0x1c8   :  { %5532 = vmatpush.bf16.msra.mxu2 %v12619_v35  ;;  %v12657_v35 = vld [vmem:[%s18045_s1 + $0xfe0] sm:$0xff] }
 0x1c9   :  { %5545 = vmatpush.bf16.msra.mxu3 %v12627_v36  ;;  %v14790_v57 = vadd.f32 %v5293_v55, %v5281_v54  ;;  %v12654_v54 = vld [vmem:[%s18045_s1 + $0xfc8] sm:$0xff]  ;;  %v12653_v60 = vld [vmem:[%s18045_s1 + $0xfc0] sm:$0xff] }
 0x1ca   :  { %5507 = vmatpush.bf16.msra.mxu0 %v12602_v37  ;;  %v12632_v37 = vld [vmem:[%s18045_s1 + $0xf18] sm:$0xff] }
 0x1cb   :  { %5520 = vmatpush.bf16.msra.mxu1 %v12610_v38  ;;  %v12640_v38 = vld [vmem:[%s18045_s1 + $0xf58] sm:$0xff] }
 0x1cc   :  { %5533 = vmatpush.bf16.msra.mxu2 %v12618_v39  ;;  %v12648_v39 = vld [vmem:[%s18045_s1 + $0xf98] sm:$0xff] }
 0x1cd   :  { %5546 = vmatpush.bf16.msra.mxu3 %v12626_v40  ;;  %v12656_v40 = vld [vmem:[%s18045_s1 + $0xfd8] sm:$0xff] }
 0x1ce   :  { %5508 = vmatpush.bf16.msra.mxu0 %v12601_v43  ;;  %v5282_v3 = vpop.f32.mrf.mxu2 }
 0x1cf   :  { %5521 = vmatpush.bf16.msra.mxu1 %v12609_v44  ;;  %v5295_v4 = vpop.f32.mrf.mxu3  ;;  %v12684_v3 = vld [vmem:[%s18045_s1 + $0x10b8] sm:$0xff] }
 0x1d0   :  { %5534 = vmatpush.bf16.msra.mxu2 %v12617_v46  ;;  %v12631_v46 = vld [vmem:[%s18045_s1 + $0xf10] sm:$0xff]  ;;  %v12692_v4 = vld [vmem:[%s18045_s1 + $0x10f8] sm:$0xff] }
 0x1d1   :  { %5547 = vmatpush.bf16.msra.mxu3 %v12625_v47  ;;  %v12639_v47 = vld [vmem:[%s18045_s1 + $0xf50] sm:$0xff] }
 0x1d2   :  { %5509 = vmatpush.bf16.msra.mxu0 %v12600_v49  ;;  %v12647_v49 = vld [vmem:[%s18045_s1 + $0xf90] sm:$0xff] }
 0x1d3   :  { %5522 = vmatpush.bf16.msra.mxu1 %v12608_v50  ;;  %v12655_v50 = vld [vmem:[%s18045_s1 + $0xfd0] sm:$0xff] }
 0x1d4   :  { %5535 = vmatpush.bf16.msra.mxu2 %v12616_v51  ;;  %v12630_v51 = vld [vmem:[%s18045_s1 + $0xf08] sm:$0xff] }
 0x1d5   :  { %5548 = vmatpush.bf16.msra.mxu3 %v12624_v52  ;;  %v12638_v52 = vld [vmem:[%s18045_s1 + $0xf48] sm:$0xff] }
 0x1d6   :  { %5510 = vmatpush.bf16.msra.mxu0 %v12599_v58  ;;  %v12637_v58 = vld [vmem:[%s18045_s1 + $0xf40] sm:$0xff] }
 0x1d7   :  { %5523 = vmatpush.bf16.msra.mxu1 %v12607_v59  ;;  %v12645_v59 = vld [vmem:[%s18045_s1 + $0xf80] sm:$0xff] }
 0x1d8   :  { %5536 = vmatpush.bf16.msra.mxu2 %v12615_v61  ;;  %v12668_v61 = vld [vmem:[%s18045_s1 + $0x1038] sm:$0xff] }
 0x1d9   :  { %5549 = vmatpush.bf16.msra.mxu3 %v12623_v62  ;;  %v81_v62 = vld [vmem:[%s18046_s0 + $0x1e0] sm:$0xff] }
 0x1da   :  { %5511 = vmatpush.bf16.msra.mxu0 %v12598_v63  ;;  %v83_v63 = vld [vmem:[%s18046_s0 + $0x1f0] sm:$0xff] }
 0x1db   :  { %5524 = vmatpush.bf16.msra.mxu1 %v12606_v0  ;;  %v12676_v0 = vld [vmem:[%s18045_s1 + $0x1078] sm:$0xff] }
 0x1dc   :  { %5537 = vmatpush.bf16.msra.mxu2 %v12614_v1  ;;  %v82_v1 = vld [vmem:[%s18046_s0 + $0x1e8] sm:$0xff] }
 0x1dd   :  { %5550 = vmatpush.bf16.msra.mxu3 %v12622_v2  ;;  %v84_v2 = vld [vmem:[%s18046_s0 + $0x1f8] sm:$0xff] }
 0x1de   :  { %5512 = vmatpush.bf16.msra.mxu0 %v12597_v5  ;;  %v5306_v29 = vpop.f32.mrf.mxu0  ;;  %v153_v5 = vpack.c.bf16 %v81_v62, %v81_v62  ;;  %v12707_v62 = vld [vmem:[%s18045_s1 + $0x1170] sm:$0xff] }
 0x1df   :  { %5525 = vmatpush.bf16.msra.mxu1 %v12605_v6  ;;  %v5307_v30 = vadd.f32 %v5306_v29, %v14790_v57  ;;  %v5319_v33 = vpop.f32.mrf.mxu1  ;;  %v12629_v57 = vld [vmem:[%s18045_s1 + $0xf00] sm:$0xff]  ;;  %v155_v6 = vpack.c.bf16 %v83_v63, %v83_v63  ;;  %v12715_v63 = vld [vmem:[%s18045_s1 + $0x11b0] sm:$0xff] }
 0x1e0   :  { %5538 = vmatpush.bf16.msra.mxu2 %v12613_v7  ;;  %v154_v7 = vpack.c.bf16 %v82_v1, %v82_v1  ;;  %v12698_v1 = vld [vmem:[%s18045_s1 + $0x1128] sm:$0xff] }
 0x1e1   :  { %5551 = vmatpush.bf16.msra.mxu3 %v12621_v8  ;;  %5513 = vmatmul.bf16.vlgmr.msra.gmra.mxu0 %v149_v17  ;;  %v5320_v36 = vadd.f32 %v5319_v33, %v5307_v30  ;;  %v156_v8 = vpack.c.bf16 %v84_v2, %v84_v2  ;;  %v12706_v2 = vld [vmem:[%s18045_s1 + $0x1168] sm:$0xff] }
 0x1e2   :  { %5557 = vmatpush.bf16.msrb.mxu0 %v12636_v9  ;;  %5526 = vmatmul.bf16.vlgmr.msra.gmra.mxu1 %v150_v19  ;;  %v12667_v9 = vld [vmem:[%s18045_s1 + $0x1030] sm:$0xff]  ;;  %v12665_v19 = vld [vmem:[%s18045_s1 + $0x1020] sm:$0xff] }
 0x1e3   :  { %5570 = vmatpush.bf16.msrb.mxu1 %v12644_v12  ;;  %5539 = vmatmul.bf16.vlgmr.msra.gmra.mxu2 %v151_v18  ;;  %v12691_v12 = vld [vmem:[%s18045_s1 + $0x10f0] sm:$0xff] }
 0x1e4   :  { %5583 = vmatpush.bf16.msrb.mxu2 %v12652_v15  ;;  %5552 = vmatmul.bf16.vlgmr.msra.gmra.mxu3 %v152_v20  ;;  %v12682_v15 = vld [vmem:[%s18045_s1 + $0x10a8] sm:$0xff]  ;;  %v12673_v20 = vld [vmem:[%s18045_s1 + $0x1060] sm:$0xff] }
 0x1e5   :  { %5596 = vmatpush.bf16.msrb.mxu3 %v12660_v16  ;;  %v12690_v16 = vld [vmem:[%s18045_s1 + $0x10e8] sm:$0xff] }
 0x1e6   :  { %5558 = vmatpush.bf16.msrb.mxu0 %v12635_v21  ;;  %v5332_v41 = vpop.f32.mrf.mxu2  ;;  %v5308_v44 = vpop.f32.mrf.mxu0 }
 0x1e7   :  { %5571 = vmatpush.bf16.msrb.mxu1 %v12643_v22  ;;  %v5333_v42 = vadd.f32 %v5332_v41, %v5320_v36  ;;  %v5345_v43 = vpop.f32.mrf.mxu3  ;;  %v5321_v48 = vpop.f32.mrf.mxu1  ;;  %v12681_v22 = vld [vmem:[%s18045_s1 + $0x10a0] sm:$0xff]  ;;  %v12678_v41 = vld [vmem:[%s18045_s1 + $0x1088] sm:$0xff] }
 0x1e8   :  { %5584 = vmatpush.bf16.msrb.mxu2 %v12651_v23  ;;  %v12689_v23 = vld [vmem:[%s18045_s1 + $0x10e0] sm:$0xff] }
 0x1e9   :  { %5597 = vmatpush.bf16.msrb.mxu3 %v12659_v24  ;;  %v14901_v45 = vadd.f32 %v5345_v43, %v5333_v42  ;;  %v12686_v42 = vld [vmem:[%s18045_s1 + $0x10c8] sm:$0xff]  ;;  %v12685_v48 = vld [vmem:[%s18045_s1 + $0x10c0] sm:$0xff] }
 0x1ea   :  { %5559 = vmatpush.bf16.msrb.mxu0 %v12634_v25  ;;  %v12664_v25 = vld [vmem:[%s18045_s1 + $0x1018] sm:$0xff] }
 0x1eb   :  { %5572 = vmatpush.bf16.msrb.mxu1 %v12642_v26  ;;  %v12672_v26 = vld [vmem:[%s18045_s1 + $0x1058] sm:$0xff] }
 0x1ec   :  { %5585 = vmatpush.bf16.msrb.mxu2 %v12650_v27  ;;  %v12680_v27 = vld [vmem:[%s18045_s1 + $0x1098] sm:$0xff] }
 0x1ed   :  { %5598 = vmatpush.bf16.msrb.mxu3 %v12658_v28  ;;  %v12688_v28 = vld [vmem:[%s18045_s1 + $0x10d8] sm:$0xff] }
 0x1ee   :  { %5560 = vmatpush.bf16.msrb.mxu0 %v12633_v31  ;;  %v5334_v55 = vpop.f32.mrf.mxu2 }
 0x1ef   :  { %5573 = vmatpush.bf16.msrb.mxu1 %v12641_v32  ;;  %v5347_v56 = vpop.f32.mrf.mxu3  ;;  %v12716_v55 = vld [vmem:[%s18045_s1 + $0x11b8] sm:$0xff] }
 0x1f0   :  { %5586 = vmatpush.bf16.msrb.mxu2 %v12649_v34  ;;  %v12663_v34 = vld [vmem:[%s18045_s1 + $0x1010] sm:$0xff]  ;;  %v12724_v56 = vld [vmem:[%s18045_s1 + $0x11f8] sm:$0xff] }
 0x1f1   :  { %5599 = vmatpush.bf16.msrb.mxu3 %v12657_v35  ;;  %v12671_v35 = vld [vmem:[%s18045_s1 + $0x1050] sm:$0xff] }
 0x1f2   :  { %5561 = vmatpush.bf16.msrb.mxu0 %v12632_v37  ;;  %v12679_v37 = vld [vmem:[%s18045_s1 + $0x1090] sm:$0xff] }
 0x1f3   :  { %5574 = vmatpush.bf16.msrb.mxu1 %v12640_v38  ;;  %v12687_v38 = vld [vmem:[%s18045_s1 + $0x10d0] sm:$0xff] }
 0x1f4   :  { %5587 = vmatpush.bf16.msrb.mxu2 %v12648_v39  ;;  %v12662_v39 = vld [vmem:[%s18045_s1 + $0x1008] sm:$0xff] }
 0x1f5   :  { %5600 = vmatpush.bf16.msrb.mxu3 %v12656_v40  ;;  %v12670_v40 = vld [vmem:[%s18045_s1 + $0x1048] sm:$0xff] }
 0x1f6   :  { %5562 = vmatpush.bf16.msrb.mxu0 %v12631_v46  ;;  %v12669_v46 = vld [vmem:[%s18045_s1 + $0x1040] sm:$0xff] }
 0x1f7   :  { %5575 = vmatpush.bf16.msrb.mxu1 %v12639_v47  ;;  %v12677_v47 = vld [vmem:[%s18045_s1 + $0x1080] sm:$0xff] }
 0x1f8   :  { %5588 = vmatpush.bf16.msrb.mxu2 %v12647_v49  ;;  %v12700_v49 = vld [vmem:[%s18045_s1 + $0x1138] sm:$0xff] }
 0x1f9   :  { %5601 = vmatpush.bf16.msrb.mxu3 %v12655_v50  ;;  %v85_v50 = vld [vmem:[%s18046_s0 + $0x200] sm:$0xff] }
 0x1fa   :  { %5563 = vmatpush.bf16.msrb.mxu0 %v12630_v51  ;;  %v87_v51 = vld [vmem:[%s18046_s0 + $0x210] sm:$0xff] }
 0x1fb   :  { %5576 = vmatpush.bf16.msrb.mxu1 %v12638_v52  ;;  %v12708_v52 = vld [vmem:[%s18045_s1 + $0x1178] sm:$0xff] }
 0x1fc   :  { %5589 = vmatpush.bf16.msrb.mxu2 %v12646_v53  ;;  %v86_v53 = vld [vmem:[%s18046_s0 + $0x208] sm:$0xff] }
 0x1fd   :  { %5602 = vmatpush.bf16.msrb.mxu3 %v12654_v54  ;;  %v88_v54 = vld [vmem:[%s18046_s0 + $0x218] sm:$0xff] }
 0x1fe   :  { %5564 = vmatpush.bf16.msrb.mxu0 %v12629_v57  ;;  %v5358_v17 = vpop.f32.mrf.mxu0  ;;  %v157_v57 = vpack.c.bf16 %v85_v50, %v85_v50 }
 0x1ff   :  { %5577 = vmatpush.bf16.msrb.mxu1 %v12637_v58  ;;  %v5359_v18 = vadd.f32 %v5358_v17, %v14901_v45  ;;  %v5371_v21 = vpop.f32.mrf.mxu1  ;;  %v12661_v45 = vld [vmem:[%s18045_s1 + $0x1000] sm:$0xff]  ;;  %v159_v58 = vpack.c.bf16 %v87_v51, %v87_v51 }
 0x200   :  { %5590 = vmatpush.bf16.msrb.mxu2 %v12645_v59  ;;  %v158_v59 = vpack.c.bf16 %v86_v53, %v86_v53 }
 0x201   :  { %5603 = vmatpush.bf16.msrb.mxu3 %v12653_v60  ;;  %5565 = vmatmul.bf16.vlgmr.msrb.gmra.mxu0 %v153_v5  ;;  %v5372_v24 = vadd.f32 %v5371_v21, %v5359_v18  ;;  %v160_v60 = vpack.c.bf16 %v88_v54, %v88_v54 }
 0x202   :  { %5609 = vmatpush.bf16.msra.mxu0 %v12668_v61  ;;  %5578 = vmatmul.bf16.vlgmr.msrb.gmra.mxu1 %v154_v7  ;;  %v12699_v61 = vld [vmem:[%s18045_s1 + $0x1130] sm:$0xff]  ;;  %v12697_v7 = vld [vmem:[%s18045_s1 + $0x1120] sm:$0xff] }
 0x203   :  { %5622 = vmatpush.bf16.msra.mxu1 %v12676_v0  ;;  %5591 = vmatmul.bf16.vlgmr.msrb.gmra.mxu2 %v155_v6  ;;  %v12723_v0 = vld [vmem:[%s18045_s1 + $0x11f0] sm:$0xff] }
 0x204   :  { %5635 = vmatpush.bf16.msra.mxu2 %v12684_v3  ;;  %5604 = vmatmul.bf16.vlgmr.msrb.gmra.mxu3 %v156_v8  ;;  %v12714_v3 = vld [vmem:[%s18045_s1 + $0x11a8] sm:$0xff]  ;;  %v12705_v8 = vld [vmem:[%s18045_s1 + $0x1160] sm:$0xff] }
 0x205   :  { %5648 = vmatpush.bf16.msra.mxu3 %v12692_v4  ;;  %v12722_v4 = vld [vmem:[%s18045_s1 + $0x11e8] sm:$0xff] }
 0x206   :  { %5610 = vmatpush.bf16.msra.mxu0 %v12667_v9  ;;  %v5384_v29 = vpop.f32.mrf.mxu2  ;;  %v5360_v32 = vpop.f32.mrf.mxu0 }
 0x207   :  { %5623 = vmatpush.bf16.msra.mxu1 %v12675_v10  ;;  %v5385_v30 = vadd.f32 %v5384_v29, %v5372_v24  ;;  %v5397_v31 = vpop.f32.mrf.mxu3  ;;  %v5373_v36 = vpop.f32.mrf.mxu1  ;;  %v12713_v10 = vld [vmem:[%s18045_s1 + $0x11a0] sm:$0xff]  ;;  %v12710_v29 = vld [vmem:[%s18045_s1 + $0x1188] sm:$0xff] }
 0x208   :  { %5636 = vmatpush.bf16.msra.mxu2 %v12683_v11  ;;  %v12721_v11 = vld [vmem:[%s18045_s1 + $0x11e0] sm:$0xff] }
 0x209   :  { %5649 = vmatpush.bf16.msra.mxu3 %v12691_v12  ;;  %v15012_v33 = vadd.f32 %v5397_v31, %v5385_v30  ;;  %v12718_v30 = vld [vmem:[%s18045_s1 + $0x11c8] sm:$0xff]  ;;  %v89_v36 = vld [vmem:[%s18046_s0 + $0x220] sm:$0xff] }
 0x20a   :  { %5611 = vmatpush.bf16.msra.mxu0 %v12666_v13  ;;  %v12696_v13 = vld [vmem:[%s18045_s1 + $0x1118] sm:$0xff] }
 0x20b   :  { %5624 = vmatpush.bf16.msra.mxu1 %v12674_v14  ;;  %v12704_v14 = vld [vmem:[%s18045_s1 + $0x1158] sm:$0xff] }
 0x20c   :  { %5637 = vmatpush.bf16.msra.mxu2 %v12682_v15  ;;  %v12712_v15 = vld [vmem:[%s18045_s1 + $0x1198] sm:$0xff] }
 0x20d   :  { %5650 = vmatpush.bf16.msra.mxu3 %v12690_v16  ;;  %v12720_v16 = vld [vmem:[%s18045_s1 + $0x11d8] sm:$0xff] }
 0x20e   :  { %5612 = vmatpush.bf16.msra.mxu0 %v12665_v19  ;;  %v5386_v43 = vpop.f32.mrf.mxu2 }
 0x20f   :  { %5625 = vmatpush.bf16.msra.mxu1 %v12673_v20  ;;  %v5399_v44 = vpop.f32.mrf.mxu3 }
 0x210   :  { %5638 = vmatpush.bf16.msra.mxu2 %v12681_v22  ;;  %v12695_v22 = vld [vmem:[%s18045_s1 + $0x1110] sm:$0xff] }
 0x211   :  { %5651 = vmatpush.bf16.msra.mxu3 %v12689_v23  ;;  %v12703_v23 = vld [vmem:[%s18045_s1 + $0x1150] sm:$0xff] }
 0x212   :  { %5613 = vmatpush.bf16.msra.mxu0 %v12664_v25  ;;  %v12711_v25 = vld [vmem:[%s18045_s1 + $0x1190] sm:$0xff] }
 0x213   :  { %5626 = vmatpush.bf16.msra.mxu1 %v12672_v26  ;;  %v12719_v26 = vld [vmem:[%s18045_s1 + $0x11d0] sm:$0xff] }
 0x214   :  { %5639 = vmatpush.bf16.msra.mxu2 %v12680_v27  ;;  %v12694_v27 = vld [vmem:[%s18045_s1 + $0x1108] sm:$0xff] }
 0x215   :  { %5652 = vmatpush.bf16.msra.mxu3 %v12688_v28  ;;  %v12702_v28 = vld [vmem:[%s18045_s1 + $0x1148] sm:$0xff] }
 0x216   :  { %5614 = vmatpush.bf16.msra.mxu0 %v12663_v34  ;;  %v12701_v34 = vld [vmem:[%s18045_s1 + $0x1140] sm:$0xff] }
 0x217   :  { %5627 = vmatpush.bf16.msra.mxu1 %v12671_v35  ;;  %v12709_v35 = vld [vmem:[%s18045_s1 + $0x1180] sm:$0xff] }
 0x218   :  { %5640 = vmatpush.bf16.msra.mxu2 %v12679_v37  ;;  %v90_v37 = vld [vmem:[%s18046_s0 + $0x228] sm:$0xff] }
 0x219   :  { %5653 = vmatpush.bf16.msra.mxu3 %v12687_v38  ;;  %v12717_v38 = vld [vmem:[%s18045_s1 + $0x11c0] sm:$0xff] }
 0x21a   :  { %5615 = vmatpush.bf16.msra.mxu0 %v12662_v39  ;;  %v91_v39 = vld [vmem:[%s18046_s0 + $0x230] sm:$0xff] }
 0x21b   :  { %5628 = vmatpush.bf16.msra.mxu1 %v12670_v40  ;;  %v92_v40 = vld [vmem:[%s18046_s0 + $0x238] sm:$0xff]  ;;  %v163_v43 = vpack.c.bf16 %v91_v39, %v91_v39 }
 0x21c   :  { %5641 = vmatpush.bf16.msra.mxu2 %v12678_v41  ;;  %v161_v41 = vpack.c.bf16 %v89_v36, %v89_v36  ;;  %v164_v44 = vpack.c.bf16 %v92_v40, %v92_v40  ;;  %v11431_v36 = vld [vmem:[%s18048_s3] sm:$0xf] }
 0x21d   :  { %5654 = vmatpush.bf16.msra.mxu3 %v12686_v42  ;;  %v162_v42 = vpack.c.bf16 %v90_v37, %v90_v37  ;;  %v12761_v37 = vld [vmem:[%s18048_s3 + $0x11c] sm:$0xf0] }
 0x21e   :  { %5616 = vmatpush.bf16.msra.mxu0 %v12661_v45  ;;  %v5410_v5 = vpop.f32.mrf.mxu0  ;;  %v11432_v40 = vor.u32 %v12761_v37, %v11431_v36  ;;  %v12766_v36 = vld [vmem:[%s18048_s3 + $0x144] sm:$0xf0] }
 0x21f   :  { %5629 = vmatpush.bf16.msra.mxu1 %v12669_v46  ;;  %v5411_v6 = vadd.f32 %v5410_v5, %v15012_v33  ;;  %v5423_v9 = vpop.f32.mrf.mxu1  ;;  %v12693_v33 = vld [vmem:[%s18045_s1 + $0x1100] sm:$0xff] }
 0x220   :  { %5642 = vmatpush.bf16.msra.mxu2 %v12677_v47 }
 0x221   :  { %5655 = vmatpush.bf16.msra.mxu3 %v12685_v48  ;;  %5617 = vmatmul.bf16.vlgmr.msra.gmra.mxu0 %v157_v57  ;;  %v5424_v12 = vadd.f32 %v5423_v9, %v5411_v6 }
 0x222   :  { %5661 = vmatpush.bf16.msrb.mxu0 %v12700_v49  ;;  %5630 = vmatmul.bf16.vlgmr.msra.gmra.mxu1 %v158_v59 }
 0x223   :  { %5674 = vmatpush.bf16.msrb.mxu1 %v12708_v52  ;;  %5643 = vmatmul.bf16.vlgmr.msra.gmra.mxu2 %v159_v58 }
 0x224   :  { %5687 = vmatpush.bf16.msrb.mxu2 %v12716_v55  ;;  %5656 = vmatmul.bf16.vlgmr.msra.gmra.mxu3 %v160_v60 }
 0x225   :  { %5700 = vmatpush.bf16.msrb.mxu3 %v12724_v56 }
 0x226   :  { %5662 = vmatpush.bf16.msrb.mxu0 %v12699_v61  ;;  %v5436_v17 = vpop.f32.mrf.mxu2  ;;  %v5412_v20 = vpop.f32.mrf.mxu0 }
 0x227   :  { %5675 = vmatpush.bf16.msrb.mxu1 %v12707_v62  ;;  %v5437_v18 = vadd.f32 %v5436_v17, %v5424_v12  ;;  %v5449_v19 = vpop.f32.mrf.mxu3  ;;  %v5425_v24 = vpop.f32.mrf.mxu1  ;;  %v12834_v12 = vld [vmem:[%s18048_s3 + $0x364] sm:$0xf0]  ;;  %v11719_v20 = vld [vmem:[%s18048_s3 + $0x240] sm:$0xf] }
 0x228   :  { %5688 = vmatpush.bf16.msrb.mxu2 %v12715_v63 }
 0x229   :  { %5701 = vmatpush.bf16.msrb.mxu3 %v12723_v0  ;;  %v5450_v21 = vadd.f32 %v5449_v19, %v5437_v18 }
 0x22a   :  { %5663 = vmatpush.bf16.msrb.mxu0 %v12698_v1 }
 0x22b   :  { %5676 = vmatpush.bf16.msrb.mxu1 %v12706_v2 }
 0x22c   :  { %5689 = vmatpush.bf16.msrb.mxu2 %v12714_v3 }
 0x22d   :  { %5702 = vmatpush.bf16.msrb.mxu3 %v12722_v4 }
 0x22e   :  { %5664 = vmatpush.bf16.msrb.mxu0 %v12697_v7  ;;  %v5438_v31 = vpop.f32.mrf.mxu2 }
 0x22f   :  { %5677 = vmatpush.bf16.msrb.mxu1 %v12705_v8  ;;  %v5451_v32 = vpop.f32.mrf.mxu3  ;;  %v12762_v31 = vld [vmem:[%s18048_s3 + $0x124] sm:$0xf0] }
 0x230   :  { %5690 = vmatpush.bf16.msrb.mxu2 %v12713_v10  ;;  %v12726_v32 = vld [vmem:[%s18048_s3 + $0xc] sm:$0xf] }
 0x231   :  { %5703 = vmatpush.bf16.msrb.mxu3 %v12721_v11  ;;  %v11727_v11 = vld [vmem:[%s18048_s3 + $0x248] sm:$0xf] }
 0x232   :  { %5665 = vmatpush.bf16.msrb.mxu0 %v12696_v13  ;;  %v12798_v13 = vld [vmem:[%s18048_s3 + $0x24c] sm:$0xf] }
 0x233   :  { %5678 = vmatpush.bf16.msrb.mxu1 %v12704_v14 }
 0x234   :  { %5691 = vmatpush.bf16.msrb.mxu2 %v12712_v15  ;;  %v11728_v15 = vor.u32 %v12834_v12, %v11727_v11 }
 0x235   :  { %5704 = vmatpush.bf16.msrb.mxu3 %v12720_v16  ;;  %v11729_v16 = vld [vmem:[%s18048_s3 + $0x368] sm:$0xf0] }
 0x236   :  { %5666 = vmatpush.bf16.msrb.mxu0 %v12695_v22  ;;  %v11732_v18 = vor.u32 %v12798_v13, %v11729_v16  ;;  %v12797_v22 = vld [vmem:[%s18048_s3 + $0x244] sm:$0xf] }
 0x237   :  { %5679 = vmatpush.bf16.msrb.mxu1 %v12703_v23 }
 0x238   :  { %5692 = vmatpush.bf16.msrb.mxu2 %v12711_v25  ;;  %v11721_v25 = vld [vmem:[%s18048_s3 + $0x360] sm:$0xf0] }
 0x239   :  { %5705 = vmatpush.bf16.msrb.mxu3 %v12719_v26  ;;  %v11724_v26 = vor.u32 %v12797_v22, %v11721_v25  ;;  %v12802_v25 = vld [vmem:[%s18048_s3 + $0x26c] sm:$0xf] }
 0x23a   :  { %5667 = vmatpush.bf16.msrb.mxu0 %v12694_v27 }
 0x23b   :  { %5680 = vmatpush.bf16.msrb.mxu1 %v12702_v28 }
 0x23c   :  { %5693 = vmatpush.bf16.msrb.mxu2 %v12710_v29 }
 0x23d   :  { %5706 = vmatpush.bf16.msrb.mxu3 %v12718_v30  ;;  %v11439_v30 = vld [vmem:[%s18048_s3 + $0x8] sm:$0xf] }
 0x23e   :  { %5668 = vmatpush.bf16.msrb.mxu0 %v12693_v33  ;;  %v5462_v45 = vpop.f32.mrf.mxu0 }
 0x23f   :  { %5681 = vmatpush.bf16.msrb.mxu1 %v12701_v34  ;;  %v5463_v46 = vadd.f32 %v5462_v45, %v5450_v21  ;;  %v5475_v47 = vpop.f32.mrf.mxu1  ;;  %v12833_v21 = vld [vmem:[%s18048_s3 + $0x35c] sm:$0xf0]  ;;  %v11440_v34 = vor.u32 %v12762_v31, %v11439_v30  ;;  %v12801_v30 = vld [vmem:[%s18048_s3 + $0x264] sm:$0xf] }
 0x240   :  { %5694 = vmatpush.bf16.msrb.mxu2 %v12709_v35  ;;  %v11720_v24 = vor.u32 %v12833_v21, %v11719_v20  ;;  %v11441_v35 = vld [vmem:[%s18048_s3 + $0x128] sm:$0xf0]  ;;  %v11753_v31 = vld [vmem:[%s18048_s3 + $0x380] sm:$0xf0] }
 0x241   :  { %5707 = vmatpush.bf16.msrb.mxu3 %v12717_v38  ;;  %5669 = vmatmul.bf16.vlgmr.msrb.gmra.mxu0 %v161_v41  ;;  %v5476_v48 = vadd.f32 %v5475_v47, %v5463_v46  ;;  %v11444_v39 = vor.u32 %v12726_v32, %v11441_v35  ;;  %v12725_v41 = vld [vmem:[%s18048_s3 + $0x4] sm:$0xf]  ;;  %v11743_v47 = vld [vmem:[%s18048_s3 + $0x258] sm:$0xf]  ;;  %v11471_v35 = vld [vmem:[%s18048_s3 + $0x28] sm:$0xf] }
 0x242   :  { %5682 = vmatmul.bf16.vlgmr.msrb.gmra.mxu1 %v162_v42  ;;  %6751 = vmatpush.bf16.msra.mxu0 %v11720_v24  ;;  %v11433_v42 = vld [vmem:[%s18048_s3 + $0x120] sm:$0xf0]  ;;  %v11759_v24 = vld [vmem:[%s18048_s3 + $0x268] sm:$0xf] }
 0x243   :  { %5695 = vmatmul.bf16.vlgmr.msrb.gmra.mxu2 %v163_v43  ;;  %6764 = vmatpush.bf16.msra.mxu1 %v11724_v26  ;;  %v11436_v43 = vor.u32 %v12725_v41, %v11433_v42  ;;  %v11761_v26 = vld [vmem:[%s18048_s3 + $0x388] sm:$0xf0] }
 0x244   :  { %5708 = vmatmul.bf16.vlgmr.msrb.gmra.mxu3 %v164_v44  ;;  %6777 = vmatpush.bf16.msra.mxu2 %v11728_v15  ;;  %v12730_v41 = vld [vmem:[%s18048_s3 + $0x2c] sm:$0xf] }
 0x245   :  { %6790 = vmatpush.bf16.msra.mxu3 %v11732_v18  ;;  %v11473_v42 = vld [vmem:[%s18048_s3 + $0x148] sm:$0xf0] }
 0x246   :  { %v5488_v49 = vpop.f32.mrf.mxu2  ;;  %v5464_v52 = vpop.f32.mrf.mxu0  ;;  %6752 = vmatpush.bf16.msra.mxu0 %v11432_v40  ;;  %v11756_v40 = vor.u32 %v12801_v30, %v11753_v31  ;;  %v11497_v30 = vld [vmem:[%s18048_s3 + $0x160] sm:$0xf0] }
 0x247   :  { %v5489_v50 = vadd.f32 %v5488_v49, %v5476_v48  ;;  %v5501_v51 = vpop.f32.mrf.mxu3  ;;  %v5477_v54 = vpop.f32.mrf.mxu1  ;;  %6765 = vmatpush.bf16.msra.mxu1 %v11436_v43  ;;  %v12836_v48 = vld [vmem:[%s18048_s3 + $0x374] sm:$0xf0]  ;;  %v12800_v49 = vld [vmem:[%s18048_s3 + $0x25c] sm:$0xf]  ;;  %v11463_v43 = vld [vmem:[%s18048_s3 + $0x20] sm:$0xf] }
 0x248   :  { %6778 = vmatpush.bf16.msra.mxu2 %v11440_v34  ;;  %v11745_v52 = vld [vmem:[%s18048_s3 + $0x378] sm:$0xf0]  ;;  %v12835_v54 = vld [vmem:[%s18048_s3 + $0x36c] sm:$0xf0]  ;;  %v11764_v34 = vor.u32 %v12802_v25, %v11761_v26  ;;  %v12734_v25 = vld [vmem:[%s18048_s3 + $0x4c] sm:$0xf] }
 0x249   :  { %v5502_v53 = vadd.f32 %v5501_v51, %v5489_v50  ;;  %6791 = vmatpush.bf16.msra.mxu3 %v11444_v39  ;;  %v11744_v51 = vor.u32 %v12836_v48, %v11743_v47  ;;  %v11472_v47 = vor.u32 %v12766_v36, %v11471_v35  ;;  %v11476_v48 = vor.u32 %v12730_v41, %v11473_v42  ;;  %v11505_v26 = vld [vmem:[%s18048_s3 + $0x168] sm:$0xf0]  ;;  %v11807_v36 = vld [vmem:[%s18048_s3 + $0x298] sm:$0xf]  ;;  %v12843_v41 = vld [vmem:[%s18048_s3 + $0x3ac] sm:$0xf0] }
 0x24a   :  { %v12807_v42 = vld [vmem:[%s18048_s3 + $0x294] sm:$0xf] }
 0x24c   :  { %6829 = vmatpush.bf16.msrb.mxu2 %v11744_v51  ;;  %v11775_v51 = vld [vmem:[%s18048_s3 + $0x278] sm:$0xf] }
 0x24e   :  { %v5490_v55 = vpop.f32.mrf.mxu2 }
 0x24f   :  { %v5503_v56 = vpop.f32.mrf.mxu3  ;;  %v11748_v55 = vor.u32 %v12800_v49, %v11745_v52  ;;  %v12840_v52 = vld [vmem:[%s18048_s3 + $0x394] sm:$0xf0] }
 0x251   :  { %6842 = vmatpush.bf16.msrb.mxu3 %v11748_v55  ;;  %v11767_v55 = vld [vmem:[%s18048_s3 + $0x270] sm:$0xf] }
 0x25e   :  { %v5514_v57 = vpop.f32.mrf.mxu0 }
 0x25f   :  { %v5515_v58 = vadd.f32 %v5514_v57, %v5502_v53  ;;  %v5527_v59 = vpop.f32.mrf.mxu1  ;;  %v11735_v53 = vld [vmem:[%s18048_s3 + $0x250] sm:$0xf]  ;;  %v12799_v57 = vld [vmem:[%s18048_s3 + $0x254] sm:$0xf] }
 0x260   :  { %v11736_v56 = vor.u32 %v12835_v54, %v11735_v53  ;;  %v12804_v53 = vld [vmem:[%s18048_s3 + $0x27c] sm:$0xf] }
 0x261   :  { %v5528_v60 = vadd.f32 %v5527_v59, %v5515_v58  ;;  %v11737_v58 = vld [vmem:[%s18048_s3 + $0x370] sm:$0xf0]  ;;  %v11455_v59 = vld [vmem:[%s18048_s3 + $0x18] sm:$0xf]  ;;  %v11777_v54 = vld [vmem:[%s18048_s3 + $0x398] sm:$0xf0] }
 0x262   :  { %6803 = vmatpush.bf16.msrb.mxu0 %v11736_v56  ;;  %v12839_v56 = vld [vmem:[%s18048_s3 + $0x38c] sm:$0xf0] }
 0x266   :  { %v5540_v61 = vpop.f32.mrf.mxu2  ;;  %v5516_v0 = vpop.f32.mrf.mxu0 }
 0x267   :  { %v5541_v62 = vadd.f32 %v5540_v61, %v5528_v60  ;;  %v5553_v63 = vpop.f32.mrf.mxu3  ;;  %v5529_v2 = vpop.f32.mrf.mxu1  ;;  %v11740_v61 = vor.u32 %v12799_v57, %v11737_v58  ;;  %v11457_v0 = vld [vmem:[%s18048_s3 + $0x138] sm:$0xf0]  ;;  %v12803_v57 = vld [vmem:[%s18048_s3 + $0x274] sm:$0xf] }
 0x268   :  { %v11769_v58 = vld [vmem:[%s18048_s3 + $0x390] sm:$0xf0] }
 0x269   :  { %v5554_v1 = vadd.f32 %v5553_v63, %v5541_v62  ;;  %v12764_v62 = vld [vmem:[%s18048_s3 + $0x134] sm:$0xf0]  ;;  %v12728_v63 = vld [vmem:[%s18048_s3 + $0x1c] sm:$0xf]  ;;  %6816 = vmatpush.bf16.msrb.mxu1 %v11740_v61 }
 0x26a   :  { %v11460_v2 = vor.u32 %v12728_v63, %v11457_v0  ;;  %v11487_v61 = vld [vmem:[%s18048_s3 + $0x38] sm:$0xf]  ;;  %v11768_v63 = vor.u32 %v12839_v56, %v11767_v55  ;;  %v11772_v0 = vor.u32 %v12803_v57, %v11769_v58  ;;  %v11513_v55 = vld [vmem:[%s18048_s3 + $0x170] sm:$0xf0] }
 0x26c   :  { %6843 = vmatpush.bf16.msrb.mxu3 %v11460_v2  ;;  %v11489_v2 = vld [vmem:[%s18048_s3 + $0x158] sm:$0xf0] }
 0x26e   :  { %v5542_v3 = vpop.f32.mrf.mxu2 }
 0x26f   :  { %v5555_v4 = vpop.f32.mrf.mxu3  ;;  %v11447_v3 = vld [vmem:[%s18048_s3 + $0x10] sm:$0xf] }
 0x270   :  { %v12763_v4 = vld [vmem:[%s18048_s3 + $0x12c] sm:$0xf0] }
 0x27e   :  { %v5566_v5 = vpop.f32.mrf.mxu0 }
 0x27f   :  { %v5579_v6 = vpop.f32.mrf.mxu1  ;;  %v5567_v28 = vadd.f32 %v5566_v5, %v5554_v1  ;;  %v11456_v1 = vor.u32 %v12764_v62, %v11455_v59  ;;  %v12727_v5 = vld [vmem:[%s18048_s3 + $0x14] sm:$0xf]  ;;  %v11776_v59 = vor.u32 %v12840_v52, %v11775_v51  ;;  %v12768_v62 = vld [vmem:[%s18048_s3 + $0x154] sm:$0xf0]  ;;  %v11521_v51 = vld [vmem:[%s18048_s3 + $0x178] sm:$0xf0] }
 0x280   :  { %v11511_v52 = vld [vmem:[%s18048_s3 + $0x50] sm:$0xf] }
 0x281   :  { %v5580_v44 = vadd.f32 %v5579_v6, %v5567_v28  ;;  %6830 = vmatpush.bf16.msrb.mxu2 %v11456_v1  ;;  %v12837_v28 = vld [vmem:[%s18048_s3 + $0x37c] sm:$0xf0]  ;;  %v12732_v1 = vld [vmem:[%s18048_s3 + $0x3c] sm:$0xf] }
 0x286   :  { %v5592_v7 = vpop.f32.mrf.mxu2  ;;  %v5568_v9 = vpop.f32.mrf.mxu0 }
 0x287   :  { %v5605_v8 = vpop.f32.mrf.mxu3  ;;  %v5581_v10 = vpop.f32.mrf.mxu1  ;;  %v5593_v45 = vadd.f32 %v5592_v7, %v5580_v44  ;;  %v11448_v7 = vor.u32 %v12763_v4, %v11447_v3  ;;  %v12765_v44 = vld [vmem:[%s18048_s3 + $0x13c] sm:$0xf0]  ;;  %v11479_v3 = vld [vmem:[%s18048_s3 + $0x30] sm:$0xf] }
 0x288   :  { %v11464_v49 = vor.u32 %v12765_v44, %v11463_v43  ;;  %v12767_v4 = vld [vmem:[%s18048_s3 + $0x14c] sm:$0xf0]  ;;  %v11801_v43 = vld [vmem:[%s18048_s3 + $0x3b0] sm:$0xf0] }
 0x289   :  { %v5606_v60 = vadd.f32 %v5605_v8, %v5593_v45  ;;  %v11449_v8 = vld [vmem:[%s18048_s3 + $0x130] sm:$0xf0]  ;;  %6804 = vmatpush.bf16.msrb.mxu0 %v11448_v7  ;;  %v12729_v45 = vld [vmem:[%s18048_s3 + $0x24] sm:$0xf]  ;;  %v11488_v7 = vor.u32 %v12768_v62, %v11487_v61  ;;  %v12846_v61 = vld [vmem:[%s18048_s3 + $0x3c4] sm:$0xf0] }
 0x28a   :  { %v11452_v9 = vor.u32 %v12727_v5, %v11449_v8  ;;  %v12731_v5 = vld [vmem:[%s18048_s3 + $0x34] sm:$0xf]  ;;  %v11492_v8 = vor.u32 %v12732_v1, %v11489_v2  ;;  %v12810_v62 = vld [vmem:[%s18048_s3 + $0x2ac] sm:$0xf]  ;;  %v12845_v1 = vld [vmem:[%s18048_s3 + $0x3bc] sm:$0xf0] }
 0x28b   :  { %v12809_v2 = vld [vmem:[%s18048_s3 + $0x2a4] sm:$0xf] }
 0x28c   :  { %6817 = vmatpush.bf16.msrb.mxu1 %v11452_v9  ;;  %v11480_v9 = vor.u32 %v12767_v4, %v11479_v3  ;;  %v11817_v3 = vld [vmem:[%s18048_s3 + $0x3c0] sm:$0xf0] }
 0x28e   :  { %v5594_v14 = vpop.f32.mrf.mxu2 }
 0x28f   :  { %v5607_v17 = vpop.f32.mrf.mxu3 }
 0x29e   :  { %v5618_v19 = vpop.f32.mrf.mxu0 }
 0x29f   :  { %v15192_v23 = vpop.f32.mrf.mxu1  ;;  %v5619_v6 = vadd.f32 %v5618_v19, %v5606_v60  ;;  %v11780_v60 = vor.u32 %v12804_v53, %v11777_v54  ;;  %v12771_v53 = vld [vmem:[%s18048_s3 + $0x16c] sm:$0xf0]  ;;  %v12735_v54 = vld [vmem:[%s18048_s3 + $0x54] sm:$0xf] }
 0x2a0   :  { %v11512_v58 = vor.u32 %v12771_v53, %v11511_v52  ;;  %v11849_v52 = vld [vmem:[%s18048_s3 + $0x3e0] sm:$0xf0] }
 0x2a1   :  { %v5632_v10 = vadd.f32 %v15192_v23, %v5619_v6  ;;  %v12838_v23 = vld [vmem:[%s18048_s3 + $0x384] sm:$0xf0]  ;;  %v11481_v6 = vld [vmem:[%s18048_s3 + $0x150] sm:$0xf0] }
 0x2a6   :  { %v5644_v27 = vpop.f32.mrf.mxu2  ;;  %v5620_v33 = vpop.f32.mrf.mxu0 }
 0x2a7   :  { %v5657_v29 = vpop.f32.mrf.mxu3  ;;  %v5633_v38 = vpop.f32.mrf.mxu1  ;;  %v5645_v11 = vadd.f32 %v5644_v27, %v5632_v10  ;;  %v11751_v27 = vld [vmem:[%s18048_s3 + $0x260] sm:$0xf]  ;;  %v11760_v33 = vor.u32 %v12838_v23, %v11759_v24  ;;  %v11484_v10 = vor.u32 %v12731_v5, %v11481_v6  ;;  %v11535_v6 = vld [vmem:[%s18048_s3 + $0x68] sm:$0xf] }
 0x2a8   :  { %v11752_v39 = vor.u32 %v12837_v28, %v11751_v27  ;;  %v11495_v27 = vld [vmem:[%s18048_s3 + $0x40] sm:$0xf] }
 0x2a9   :  { %v5658_v12 = vadd.f32 %v5657_v29, %v5645_v11  ;;  %v11791_v11 = vld [vmem:[%s18048_s3 + $0x288] sm:$0xf]  ;;  %v12769_v28 = vld [vmem:[%s18048_s3 + $0x15c] sm:$0xf0] }
 0x2ae   :  { %v5646_v46 = vpop.f32.mrf.mxu2 }
 0x2af   :  { %v5659_v50 = vpop.f32.mrf.mxu3  ;;  %v11465_v46 = vld [vmem:[%s18048_s3 + $0x140] sm:$0xf0] }
 0x2b0   :  { %v11468_v50 = vor.u32 %v12729_v45, %v11465_v46  ;;  %v11519_v46 = vld [vmem:[%s18048_s3 + $0x58] sm:$0xf] }
 0x2be   :  { %v5670_v13 = vpop.f32.mrf.mxu0 }
 0x2bf   :  { %v5683_v14 = vpop.f32.mrf.mxu1  ;;  %v5671_v15 = vadd.f32 %v5670_v13, %v5658_v12  ;;  %v12842_v12 = vld [vmem:[%s18048_s3 + $0x3a4] sm:$0xf0]  ;;  %v12806_v13 = vld [vmem:[%s18048_s3 + $0x28c] sm:$0xf] }
 0x2c1   :  { %v5684_v16 = vadd.f32 %v5683_v14, %v5671_v15  ;;  %v11793_v14 = vld [vmem:[%s18048_s3 + $0x3a8] sm:$0xf0]  ;;  %v11783_v15 = vld [vmem:[%s18048_s3 + $0x280] sm:$0xf] }
 0x2c6   :  { %v5696_v17 = vpop.f32.mrf.mxu2  ;;  %v5672_v20 = vpop.f32.mrf.mxu0 }
 0x2c7   :  { %v5709_v18 = vpop.f32.mrf.mxu3  ;;  %v5697_v19 = vadd.f32 %v5696_v17, %v5684_v16  ;;  %v5685_v21 = vpop.f32.mrf.mxu1  ;;  %v12841_v16 = vld [vmem:[%s18048_s3 + $0x39c] sm:$0xf0]  ;;  %v12805_v17 = vld [vmem:[%s18048_s3 + $0x284] sm:$0xf]  ;;  %v11796_v20 = vor.u32 %v12806_v13, %v11793_v14 }
 0x2c8   :  { %v11503_v21 = vld [vmem:[%s18048_s3 + $0x48] sm:$0xf]  ;;  %v11784_v24 = vor.u32 %v12841_v16, %v11783_v15  ;;  %v12773_v13 = vld [vmem:[%s18048_s3 + $0x17c] sm:$0xf0]  ;;  %v12737_v14 = vld [vmem:[%s18048_s3 + $0x64] sm:$0xf] }
 0x2c9   :  { %v5710_v22 = vadd.f32 %v5709_v18, %v5697_v19  ;;  %v11785_v18 = vld [vmem:[%s18048_s3 + $0x3a0] sm:$0xf0]  ;;  %v11792_v19 = vor.u32 %v12842_v12, %v11791_v11  ;;  %v11537_v11 = vld [vmem:[%s18048_s3 + $0x188] sm:$0xf0]  ;;  %v11527_v12 = vld [vmem:[%s18048_s3 + $0x60] sm:$0xf] }
 0x2ca   :  { %v11788_v23 = vor.u32 %v12805_v17, %v11785_v18  ;;  %v11529_v15 = vld [vmem:[%s18048_s3 + $0x180] sm:$0xf0]  ;;  %v11528_v18 = vor.u32 %v12773_v13, %v11527_v12  ;;  %v11865_v12 = vld [vmem:[%s18048_s3 + $0x3f0] sm:$0xf0] }
 0x2cb   :  { %v5713_v29 = vmax.f32 %v5710_v22, 0.0  ;;  %v12770_v22 = vld [vmem:[%s18048_s3 + $0x164] sm:$0xf0] }
 0x2cc   :  { %v11504_v31 = vor.u32 %v12770_v22, %v11503_v21  ;;  %v12848_v21 = vld [vmem:[%s18048_s3 + $0x3d4] sm:$0xf0]  ;;  %v12812_v22 = vld [vmem:[%s18048_s3 + $0x2bc] sm:$0xf] }
 0x2cd   :  { %v15294_v32 = vpack.c.bf16 %v5713_v29, %v5713_v29  ;;  %v12733_v29 = vld [vmem:[%s18048_s3 + $0x44] sm:$0xf] }
 0x2ce   :  { %v5698_v37 = vpop.f32.mrf.mxu2  ;;  %v11500_v35 = vor.u32 %v12733_v29, %v11497_v30  ;;  %v11551_v30 = vld [vmem:[%s18048_s3 + $0x78] sm:$0xf] }
 0x2cf   :  { %v5711_v38 = vpop.f32.mrf.mxu3  ;;  %12005 = vmatmul.msk.bf16.vlgmr.msra.gmra.mxu0 %vm6741_vm0, %v15294_v32  ;;  %12006 = vmatmul.msk.bf16.vlgmr.msra.gmra.mxu1 %vm6741_vm0, %v15294_v32  ;;  %v12844_v37 = vld [vmem:[%s18048_s3 + $0x3b4] sm:$0xf0] }
 0x2d0   :  { %12007 = vmatmul.msk.bf16.vlgmr.msra.gmra.mxu2 %vm6741_vm0, %v15294_v32  ;;  %12008 = vmatmul.msk.bf16.vlgmr.msra.gmra.mxu3 %vm6741_vm0, %v15294_v32  ;;  %v12808_v38 = vld [vmem:[%s18048_s3 + $0x29c] sm:$0xf]  ;;  %v11808_v44 = vor.u32 %v12844_v37, %v11807_v36  ;;  %v11543_v37 = vld [vmem:[%s18048_s3 + $0x70] sm:$0xf] }
 0x2d1   :  { %6881 = vmatpush.bf16.msra.mxu2 %v11760_v33  ;;  %6894 = vmatpush.bf16.msra.mxu3 %v11764_v34  ;;  %v11508_v33 = vor.u32 %v12734_v25, %v11505_v26  ;;  %v11496_v34 = vor.u32 %v12769_v28, %v11495_v27  ;;  %v12847_v25 = vld [vmem:[%s18048_s3 + $0x3cc] sm:$0xf0]  ;;  %v12811_v26 = vld [vmem:[%s18048_s3 + $0x2b4] sm:$0xf]  ;;  %v11553_v36 = vld [vmem:[%s18048_s3 + $0x198] sm:$0xf0] }
 0x2d2   :  { %6855 = vmatpush.bf16.msra.mxu0 %v11752_v39  ;;  %6868 = vmatpush.bf16.msra.mxu1 %v11756_v40  ;;  %v11809_v39 = vld [vmem:[%s18048_s3 + $0x3b8] sm:$0xf0]  ;;  %v11799_v40 = vld [vmem:[%s18048_s3 + $0x290] sm:$0xf]  ;;  %v11833_v27 = vld [vmem:[%s18048_s3 + $0x3d0] sm:$0xf0] }
 0x2d3   :  { %v11812_v45 = vor.u32 %v12808_v38, %v11809_v39  ;;  %v12775_v38 = vld [vmem:[%s18048_s3 + $0x18c] sm:$0xf0]  ;;  %v12739_v39 = vld [vmem:[%s18048_s3 + $0x74] sm:$0xf] }
 0x2d5   :  { %6882 = vmatpush.bf16.msra.mxu2 %v11472_v47  ;;  %6895 = vmatpush.bf16.msra.mxu3 %v11476_v48  ;;  %v12772_v47 = vld [vmem:[%s18048_s3 + $0x174] sm:$0xf0]  ;;  %v11800_v48 = vor.u32 %v12843_v41, %v11799_v40  ;;  %v11545_v40 = vld [vmem:[%s18048_s3 + $0x190] sm:$0xf0] }
 0x2d6   :  { %6856 = vmatpush.bf16.msra.mxu0 %v11464_v49  ;;  %6869 = vmatpush.bf16.msra.mxu1 %v11468_v50  ;;  %v11804_v49 = vor.u32 %v12807_v42, %v11801_v43  ;;  %v12736_v50 = vld [vmem:[%s18048_s3 + $0x5c] sm:$0xf]  ;;  %v11520_v56 = vor.u32 %v12772_v47, %v11519_v46  ;;  %v11544_v43 = vor.u32 %v12775_v38, %v11543_v37  ;;  %v12850_v46 = vld [vmem:[%s18048_s3 + $0x3e4] sm:$0xf0]  ;;  %v12814_v47 = vld [vmem:[%s18048_s3 + $0x2cc] sm:$0xf] }
 0x2d7   :  { %v11524_v57 = vor.u32 %v12736_v50, %v11521_v51  ;;  %v12849_v50 = vld [vmem:[%s18048_s3 + $0x3dc] sm:$0xf0]  ;;  %v12813_v51 = vld [vmem:[%s18048_s3 + $0x2c4] sm:$0xf]  ;;  %v11889_v38 = vld [vmem:[%s18048_s3 + $0x408] sm:$0xf0] }
 0x2df   :  { %12009 = vmatmul.msk.bf16.vlgmr.msrb.gmra.mxu0 %vm6741_vm0, %v15294_v32  ;;  %12010 = vmatmul.msk.bf16.vlgmr.msrb.gmra.mxu1 %vm6741_vm0, %v15294_v32 }
 0x2e0   :  { %12011 = vmatmul.msk.bf16.vlgmr.msrb.gmra.mxu2 %vm6741_vm0, %v15294_v32  ;;  %12012 = vmatmul.msk.bf16.vlgmr.msrb.gmra.mxu3 %vm6741_vm0, %v15294_v32 }
 0x2e1   :  { %6933 = vmatpush.bf16.msrb.mxu2 %v11776_v59  ;;  %6946 = vmatpush.bf16.msrb.mxu3 %v11780_v60  ;;  %v11516_v59 = vor.u32 %v12735_v54, %v11513_v55  ;;  %v11823_v60 = vld [vmem:[%s18048_s3 + $0x2a8] sm:$0xf] }
 0x2e2   :  { %6907 = vmatpush.bf16.msrb.mxu0 %v11768_v63  ;;  %6920 = vmatpush.bf16.msrb.mxu1 %v11772_v0  ;;  %v11825_v63 = vld [vmem:[%s18048_s3 + $0x3c8] sm:$0xf0]  ;;  %v11815_v0 = vld [vmem:[%s18048_s3 + $0x2a0] sm:$0xf]  ;;  %v11824_v4 = vor.u32 %v12846_v61, %v11823_v60  ;;  %v11567_v55 = vld [vmem:[%s18048_s3 + $0x88] sm:$0xf] }
 0x2e3   :  { %v11828_v5 = vor.u32 %v12810_v62, %v11825_v63  ;;  %v11569_v60 = vld [vmem:[%s18048_s3 + $0x1a8] sm:$0xf0]  ;;  %v11559_v61 = vld [vmem:[%s18048_s3 + $0x80] sm:$0xf]  ;;  %v12741_v63 = vld [vmem:[%s18048_s3 + $0x84] sm:$0xf] }
 0x2e4   :  { %v12777_v62 = vld [vmem:[%s18048_s3 + $0x19c] sm:$0xf0] }
 0x2e5   :  { %6934 = vmatpush.bf16.msrb.mxu2 %v11488_v7  ;;  %6947 = vmatpush.bf16.msrb.mxu3 %v11492_v8  ;;  %v12774_v7 = vld [vmem:[%s18048_s3 + $0x184] sm:$0xf0]  ;;  %v11816_v8 = vor.u32 %v12845_v1, %v11815_v0  ;;  %v11561_v0 = vld [vmem:[%s18048_s3 + $0x1a0] sm:$0xf0] }
 0x2e6   :  { %6908 = vmatpush.bf16.msrb.mxu0 %v11480_v9  ;;  %6921 = vmatpush.bf16.msrb.mxu1 %v11484_v10  ;;  %v11820_v9 = vor.u32 %v12809_v2, %v11817_v3  ;;  %v12738_v10 = vld [vmem:[%s18048_s3 + $0x6c] sm:$0xf]  ;;  %v11536_v16 = vor.u32 %v12774_v7, %v11535_v6  ;;  %v11560_v3 = vor.u32 %v12777_v62, %v11559_v61  ;;  %v12852_v6 = vld [vmem:[%s18048_s3 + $0x3f4] sm:$0xf0]  ;;  %v12816_v7 = vld [vmem:[%s18048_s3 + $0x2dc] sm:$0xf] }
 0x2e7   :  { %v11540_v17 = vor.u32 %v12738_v10, %v11537_v11  ;;  %v12851_v10 = vld [vmem:[%s18048_s3 + $0x3ec] sm:$0xf0]  ;;  %v12815_v11 = vld [vmem:[%s18048_s3 + $0x2d4] sm:$0xf] }
 0x2ef   :  { %12013 = vmatmul.msk.bf16.vlgmr.msra.gmra.mxu0 %vm6741_vm0, %v15294_v32  ;;  %12014 = vmatmul.msk.bf16.vlgmr.msra.gmra.mxu1 %vm6741_vm0, %v15294_v32 }
 0x2f0   :  { %12015 = vmatmul.msk.bf16.vlgmr.msra.gmra.mxu2 %vm6741_vm0, %v15294_v32  ;;  %12016 = vmatmul.msk.bf16.vlgmr.msra.gmra.mxu3 %vm6741_vm0, %v15294_v32 }
 0x2f1   :  { %6985 = vmatpush.bf16.msra.mxu2 %v11792_v19  ;;  %6998 = vmatpush.bf16.msra.mxu3 %v11796_v20  ;;  %v11532_v19 = vor.u32 %v12737_v14, %v11529_v15  ;;  %v11839_v20 = vld [vmem:[%s18048_s3 + $0x2b8] sm:$0xf] }
 0x2f2   :  { %6959 = vmatpush.bf16.msra.mxu0 %v11784_v24  ;;  %6972 = vmatpush.bf16.msra.mxu1 %v11788_v23  ;;  %v11841_v24 = vld [vmem:[%s18048_s3 + $0x3d8] sm:$0xf0]  ;;  %v11831_v23 = vld [vmem:[%s18048_s3 + $0x2b0] sm:$0xf]  ;;  %v11840_v28 = vor.u32 %v12848_v21, %v11839_v20  ;;  %v11583_v15 = vld [vmem:[%s18048_s3 + $0x98] sm:$0xf] }
 0x2f3   :  { %v11844_v29 = vor.u32 %v12812_v22, %v11841_v24  ;;  %v11585_v20 = vld [vmem:[%s18048_s3 + $0x1b8] sm:$0xf0]  ;;  %v11575_v21 = vld [vmem:[%s18048_s3 + $0x90] sm:$0xf]  ;;  %v12743_v24 = vld [vmem:[%s18048_s3 + $0x94] sm:$0xf] }
 0x2f4   :  { %v12779_v22 = vld [vmem:[%s18048_s3 + $0x1ac] sm:$0xf0] }
 0x2f5   :  { %6986 = vmatpush.bf16.msra.mxu2 %v11504_v31  ;;  %6999 = vmatpush.bf16.msra.mxu3 %v11508_v33  ;;  %v12776_v31 = vld [vmem:[%s18048_s3 + $0x194] sm:$0xf0]  ;;  %v11832_v33 = vor.u32 %v12847_v25, %v11831_v23  ;;  %v11577_v23 = vld [vmem:[%s18048_s3 + $0x1b0] sm:$0xf0] }
 0x2f6   :  { %6960 = vmatpush.bf16.msra.mxu0 %v11496_v34  ;;  %6973 = vmatpush.bf16.msra.mxu1 %v11500_v35  ;;  %v11836_v34 = vor.u32 %v12811_v26, %v11833_v27  ;;  %v12740_v35 = vld [vmem:[%s18048_s3 + $0x7c] sm:$0xf]  ;;  %v11552_v41 = vor.u32 %v12776_v31, %v11551_v30  ;;  %v11576_v27 = vor.u32 %v12779_v22, %v11575_v21  ;;  %v15798_v22 = vld [vmem:[%s18049_s4 + $0x8] sm:$0xff] }
 0x2f7   :  { %v11556_v42 = vor.u32 %v12740_v35, %v11553_v36  ;;  %v12818_v35 = vld [vmem:[%s18048_s3 + $0x2ec] sm:$0xf] }
 0x2ff   :  { %12017 = vmatmul.msk.bf16.vlgmr.msrb.gmra.mxu0 %vm6741_vm0, %v15294_v32  ;;  %12018 = vmatmul.msk.bf16.vlgmr.msrb.gmra.mxu1 %vm6741_vm0, %v15294_v32 }
 0x300   :  { %12019 = vmatmul.msk.bf16.vlgmr.msrb.gmra.mxu2 %vm6741_vm0, %v15294_v32  ;;  %12020 = vmatmul.msk.bf16.vlgmr.msrb.gmra.mxu3 %vm6741_vm0, %v15294_v32 }
 0x301   :  { %7037 = vmatpush.bf16.msrb.mxu2 %v11808_v44  ;;  %7050 = vmatpush.bf16.msrb.mxu3 %v11812_v45  ;;  %v11548_v44 = vor.u32 %v12739_v39, %v11545_v40  ;;  %v11855_v45 = vld [vmem:[%s18048_s3 + $0x2c8] sm:$0xf]  ;;  %v11879_v39 = vld [vmem:[%s18048_s3 + $0x2e0] sm:$0xf] }
 0x302   :  { %7011 = vmatpush.bf16.msrb.mxu0 %v11800_v48  ;;  %7024 = vmatpush.bf16.msrb.mxu1 %v11804_v49  ;;  %v11857_v48 = vld [vmem:[%s18048_s3 + $0x3e8] sm:$0xf0]  ;;  %v11847_v49 = vld [vmem:[%s18048_s3 + $0x2c0] sm:$0xf]  ;;  %v11856_v53 = vor.u32 %v12850_v46, %v11855_v45  ;;  %v12817_v45 = vld [vmem:[%s18048_s3 + $0x2e4] sm:$0xf] }
 0x303   :  { %v11860_v54 = vor.u32 %v12814_v47, %v11857_v48  ;;  %v12853_v40 = vld [vmem:[%s18048_s3 + $0x3fc] sm:$0xf0]  ;;  %v11881_v46 = vld [vmem:[%s18048_s3 + $0x400] sm:$0xf0] }
 0x305   :  { %7038 = vmatpush.bf16.msrb.mxu2 %v11520_v56  ;;  %7051 = vmatpush.bf16.msrb.mxu3 %v11524_v57  ;;  %v12778_v56 = vld [vmem:[%s18048_s3 + $0x1a4] sm:$0xf0]  ;;  %v11848_v57 = vor.u32 %v12849_v50, %v11847_v49  ;;  %v11880_v49 = vor.u32 %v12853_v40, %v11879_v39  ;;  %v11884_v50 = vor.u32 %v12817_v45, %v11881_v46  ;;  %v5887_v45 = vperm.slane %v15798_v22, 2 }
 0x306   :  { %7012 = vmatpush.bf16.msrb.mxu0 %v11512_v58  ;;  %7025 = vmatpush.bf16.msrb.mxu1 %v11516_v59  ;;  %v11852_v58 = vor.u32 %v12813_v51, %v11849_v52  ;;  %v12742_v59 = vld [vmem:[%s18048_s3 + $0x8c] sm:$0xf]  ;;  %v11568_v1 = vor.u32 %v12778_v56, %v11567_v55 }
 0x307   :  { %v11572_v2 = vor.u32 %v12742_v59, %v11569_v60  ;;  %v12746_v55 = vld [vmem:[%s18048_s3 + $0xac] sm:$0xf] }
 0x308   :  { %v11601_v56 = vld [vmem:[%s18048_s3 + $0x1c8] sm:$0xf0] }
 0x30f   :  { %12021 = vmatmul.msk.bf16.vlgmr.msra.gmra.mxu0 %vm6741_vm0, %v15294_v32  ;;  %12022 = vmatmul.msk.bf16.vlgmr.msra.gmra.mxu1 %vm6741_vm0, %v15294_v32 }
 0x310   :  { %12023 = vmatmul.msk.bf16.vlgmr.msra.gmra.mxu2 %vm6741_vm0, %v15294_v32  ;;  %12024 = vmatmul.msk.bf16.vlgmr.msra.gmra.mxu3 %vm6741_vm0, %v15294_v32 }
 0x311   :  { %7089 = vmatpush.bf16.msra.mxu2 %v11824_v4  ;;  %7102 = vmatpush.bf16.msra.mxu3 %v11828_v5  ;;  %v11564_v4 = vor.u32 %v12741_v63, %v11561_v0  ;;  %v11871_v5 = vld [vmem:[%s18048_s3 + $0x2d8] sm:$0xf] }
 0x312   :  { %7063 = vmatpush.bf16.msra.mxu0 %v11816_v8  ;;  %7076 = vmatpush.bf16.msra.mxu1 %v11820_v9  ;;  %v11873_v8 = vld [vmem:[%s18048_s3 + $0x3f8] sm:$0xf0]  ;;  %v11863_v9 = vld [vmem:[%s18048_s3 + $0x2d0] sm:$0xf]  ;;  %v11872_v13 = vor.u32 %v12852_v6, %v11871_v5  ;;  %v11593_v5 = vld [vmem:[%s18048_s3 + $0x1c0] sm:$0xf0] }
 0x313   :  { %v11876_v14 = vor.u32 %v12816_v7, %v11873_v8 }
 0x315   :  { %7090 = vmatpush.bf16.msra.mxu2 %v11536_v16  ;;  %7103 = vmatpush.bf16.msra.mxu3 %v11540_v17  ;;  %v11864_v16 = vor.u32 %v12851_v10, %v11863_v9  ;;  %v11868_v17 = vor.u32 %v12815_v11, %v11865_v12 }
 0x316   :  { %7064 = vmatpush.bf16.msra.mxu0 %v11528_v18  ;;  %7077 = vmatpush.bf16.msra.mxu1 %v11532_v19  ;;  %v12780_v18 = vld [vmem:[%s18048_s3 + $0x1b4] sm:$0xf0]  ;;  %v12744_v19 = vld [vmem:[%s18048_s3 + $0x9c] sm:$0xf] }
 0x317   :  { %v11584_v25 = vor.u32 %v12780_v18, %v11583_v15  ;;  %v11588_v26 = vor.u32 %v12744_v19, %v11585_v20 }
 0x31f   :  { %12025 = vmatmul.msk.bf16.vlgmr.msrb.gmra.mxu0 %vm6741_vm0, %v15294_v32  ;;  %12026 = vmatmul.msk.bf16.vlgmr.msrb.gmra.mxu1 %vm6741_vm0, %v15294_v32 }
 0x320   :  { %12027 = vmatmul.msk.bf16.vlgmr.msrb.gmra.mxu2 %vm6741_vm0, %v15294_v32  ;;  %12028 = vmatmul.msk.bf16.vlgmr.msrb.gmra.mxu3 %vm6741_vm0, %v15294_v32 }
 0x321   :  { %7141 = vmatpush.bf16.msrb.mxu2 %v11840_v28  ;;  %7154 = vmatpush.bf16.msrb.mxu3 %v11844_v29  ;;  %v11580_v28 = vor.u32 %v12743_v24, %v11577_v23  ;;  %v15723_v29 = vld [vmem:[%s18049_s4] sm:$0xff] }
 0x322   :  { %7115 = vmatpush.bf16.msrb.mxu0 %v11832_v33  ;;  %7128 = vmatpush.bf16.msrb.mxu1 %v11836_v34  ;;  %v5877_v30 = vperm.slane %v15723_v29, 0  ;;  %v5878_v31 = vperm.slane %v15723_v29, 1  ;;  %v11887_v33 = vld [vmem:[%s18048_s3 + $0x2e8] sm:$0xf]  ;;  %v5879_v47 = vperm.slane %v15723_v29, 2  ;;  %v5880_v48 = vperm.slane %v15723_v29, 3 }
 0x323   :  { %v12854_v34 = vld [vmem:[%s18048_s3 + $0x404] sm:$0xf0] }
 0x325   :  { %7142 = vmatpush.bf16.msrb.mxu2 %v11552_v41  ;;  %7155 = vmatpush.bf16.msrb.mxu3 %v11556_v42 }
 0x326   :  { %7116 = vmatpush.bf16.msrb.mxu0 %v11544_v43  ;;  %7129 = vmatpush.bf16.msrb.mxu1 %v11548_v44  ;;  %v11888_v43 = vor.u32 %v12854_v34, %v11887_v33  ;;  %v11892_v44 = vor.u32 %v12818_v35, %v11889_v38  ;;  %v5885_v35 = vperm.slane %v15798_v22, 0 }
 0x32f   :  { %12029 = vmatmul.msk.bf16.vlgmr.msra.gmra.mxu0 %vm6741_vm0, %v15294_v32  ;;  %12030 = vmatmul.msk.bf16.vlgmr.msra.gmra.mxu1 %vm6741_vm0, %v15294_v32 }
 0x330   :  { %12031 = vmatmul.msk.bf16.vlgmr.msra.gmra.mxu2 %vm6741_vm0, %v15294_v32  ;;  %12032 = vmatmul.msk.bf16.vlgmr.msra.gmra.mxu3 %vm6741_vm0, %v15294_v32 }
 0x331   :  { %7193 = vmatpush.bf16.msra.mxu2 %v11856_v53  ;;  %7206 = vmatpush.bf16.msra.mxu3 %v11860_v54  ;;  %v11599_v53 = vld [vmem:[%s18048_s3 + $0xa8] sm:$0xf] }
 0x332   :  { %7167 = vmatpush.bf16.msra.mxu0 %v11848_v57  ;;  %7180 = vmatpush.bf16.msra.mxu1 %v11852_v58  ;;  %v12782_v54 = vld [vmem:[%s18048_s3 + $0x1c4] sm:$0xf0]  ;;  %v11604_v58 = vor.u32 %v12746_v55, %v11601_v56 }
 0x333   :  { %v11600_v57 = vor.u32 %v12782_v54, %v11599_v53 }
 0x335   :  { %7194 = vmatpush.bf16.msra.mxu2 %v11568_v1  ;;  %7207 = vmatpush.bf16.msra.mxu3 %v11572_v2  ;;  %v11591_v1 = vld [vmem:[%s18048_s3 + $0xa0] sm:$0xf] }
 0x336   :  { %7168 = vmatpush.bf16.msra.mxu0 %v11560_v3  ;;  %7181 = vmatpush.bf16.msra.mxu1 %v11564_v4  ;;  %v12781_v2 = vld [vmem:[%s18048_s3 + $0x1bc] sm:$0xf0]  ;;  %v12745_v4 = vld [vmem:[%s18048_s3 + $0xa4] sm:$0xf] }
 0x337   :  { %v11592_v3 = vor.u32 %v12781_v2, %v11591_v1  ;;  %v11596_v8 = vor.u32 %v12745_v4, %v11593_v5  ;;  %v12819_v2 = vld [vmem:[%s18048_s3 + $0x2f4] sm:$0xf] }
 0x33f   :  { %12033 = vmatmul.msk.bf16.vlgmr.msrb.gmra.mxu0 %vm6741_vm0, %v15294_v32  ;;  %12034 = vmatmul.msk.bf16.vlgmr.msrb.gmra.mxu1 %vm6741_vm0, %v15294_v32 }
 0x340   :  { %12035 = vmatmul.msk.bf16.vlgmr.msrb.gmra.mxu2 %vm6741_vm0, %v15294_v32  ;;  %12036 = vmatmul.msk.bf16.vlgmr.msrb.gmra.mxu3 %vm6741_vm0, %v15294_v32 }
 0x341   :  { %7245 = vmatpush.bf16.msrb.mxu2 %v11872_v13  ;;  %7258 = vmatpush.bf16.msrb.mxu3 %v11876_v14  ;;  %v5881_v13 = vperm.slane %v15723_v29, 4  ;;  %v5882_v14 = vperm.slane %v15723_v29, 5 }
 0x342   :  { %7219 = vmatpush.bf16.msrb.mxu0 %v11864_v16  ;;  %7232 = vmatpush.bf16.msrb.mxu1 %v11868_v17 }
 0x345   :  { %7246 = vmatpush.bf16.msrb.mxu2 %v11584_v25  ;;  %7259 = vmatpush.bf16.msrb.mxu3 %v11588_v26 }
 0x346   :  { %7220 = vmatpush.bf16.msrb.mxu0 %v11576_v27  ;;  %7233 = vmatpush.bf16.msrb.mxu1 %v11580_v28 }
 0x34c   :  { %v6754_v36 = vpop.f32.mrf.mxu0  ;;  %v6767_v37 = vpop.f32.mrf.mxu1 }
 0x34d   :  { %v6755_v41 = vadd.f32 %v6754_v36, %v5877_v30  ;;  %v6768_v42 = vadd.f32 %v6767_v37, %v5878_v31  ;;  %v5883_v30 = vperm.slane %v15723_v29, 6  ;;  %v5884_v31 = vperm.slane %v15723_v29, 7 }
 0x34e   :  { %v5886_v36 = vperm.slane %v15798_v22, 1 }
 0x34f   :  { %v12077_v51 = vmul.f32 -1.442695, %v6755_v41  ;;  %v12078_v52 = vmul.f32 -1.442695, %v6768_v42  ;;  %12037 = vmatmul.msk.bf16.vlgmr.msra.gmra.mxu0 %vm6741_vm0, %v15294_v32  ;;  %12038 = vmatmul.msk.bf16.vlgmr.msra.gmra.mxu1 %vm6741_vm0, %v15294_v32 }
 0x350   :  { %12039 = vmatmul.msk.bf16.vlgmr.msra.gmra.mxu2 %vm6741_vm0, %v15294_v32  ;;  %12040 = vmatmul.msk.bf16.vlgmr.msra.gmra.mxu3 %vm6741_vm0, %v15294_v32 }
 0x351   :  { %12870 = vpow2.f32 %v12077_v51  ;;  %7297 = vmatpush.bf16.msra.mxu2 %v11888_v43  ;;  %7310 = vmatpush.bf16.msra.mxu3 %v11892_v44  ;;  %v11903_v44 = vld [vmem:[%s18048_s3 + $0x2f8] sm:$0xf]  ;;  %v12820_v51 = vld [vmem:[%s18048_s3 + $0x2fc] sm:$0xf] }
 0x352   :  { %12872 = vpow2.f32 %v12078_v52  ;;  %7271 = vmatpush.bf16.msra.mxu0 %v11880_v49  ;;  %7284 = vmatpush.bf16.msra.mxu1 %v11884_v50  ;;  %v12856_v50 = vld [vmem:[%s18048_s3 + $0x414] sm:$0xf0] }
 0x353   :  { %v6780_v59 = vpop.f32.mrf.mxu2  ;;  %v6793_v60 = vpop.f32.mrf.mxu3 }
 0x354   :  { %v6781_v61 = vadd.f32 %v6780_v59, %v5879_v47  ;;  %v6794_v62 = vadd.f32 %v6793_v60, %v5880_v48  ;;  %v6756_v63 = vpop.f32.mrf.mxu0  ;;  %v6769_v0 = vpop.f32.mrf.mxu1 }
 0x355   :  { %7298 = vmatpush.bf16.msra.mxu2 %v11600_v57  ;;  %7311 = vmatpush.bf16.msra.mxu3 %v11604_v58  ;;  %v11905_v57 = vld [vmem:[%s18048_s3 + $0x418] sm:$0xf0] }
 0x356   :  { %v12079_v6 = vmul.f32 -1.442695, %v6781_v61  ;;  %v12080_v7 = vmul.f32 -1.442695, %v6794_v62  ;;  %7272 = vmatpush.bf16.msra.mxu0 %v11592_v3  ;;  %7285 = vmatpush.bf16.msra.mxu1 %v11596_v8  ;;  %v11895_v61 = vld [vmem:[%s18048_s3 + $0x2f0] sm:$0xf]  ;;  %v11908_v8 = vor.u32 %v12820_v51, %v11905_v57 }
 0x357   :  { %v12871_v9 = vpop.eup %12870  ;;  %v12855_v62 = vld [vmem:[%s18048_s3 + $0x40c] sm:$0xf0]  ;;  %v11897_v3 = vld [vmem:[%s18048_s3 + $0x410] sm:$0xf0] }
 0x358   :  { %v12873_v10 = vpop.eup %12872  ;;  %v15785_v11 = vadd.f32 1.0, %v12871_v9  ;;  %12874 = vpow2.f32 %v12079_v6 }
 0x359   :  { %v15787_v12 = vadd.f32 1.0, %v12873_v10  ;;  %12876 = vpow2.f32 %v12080_v7  ;;  %v11904_v7 = vor.u32 %v12856_v50, %v11903_v44  ;;  %v5888_v44 = vperm.slane %v15798_v22, 3 }
 0x35a   :  { %12878 = vrcp.f32 %v15785_v11  ;;  %v7978_v19 = vand.u32 2147483647, %v15785_v11  ;;  %v7980_v20 = vand.u32 2147483648, %v15785_v11  ;;  %vm7974_vm1 = vweird.f32 %v15785_v11 }
 0x35b   :  { %12880 = vrcp.f32 %v15787_v12  ;;  %v6782_v15 = vpop.f32.mrf.mxu2  ;;  %v6795_v16 = vpop.f32.mrf.mxu3  ;;  %v7993_v23 = vand.u32 2147483647, %v15787_v12  ;;  %v7995_v27 = vand.u32 2147483648, %v15787_v12  ;;  %vm7989_vm7 = vweird.f32 %v15787_v12 }
 0x35c   :  { %v6806_v17 = vpop.f32.mrf.mxu0  ;;  %v6819_v18 = vpop.f32.mrf.mxu1  ;;  %vm15825_vm2 = vcmp.eq.f32.partialorder %v7978_v19, 8.507059e+37  ;;  %v7981_v39 = vor.u32 1.1754944e-38, %v7980_v20  ;;  %v11615_v15 = vld [vmem:[%s18048_s3 + $0xb8] sm:$0xf]  ;;  %v12748_v19 = vld [vmem:[%s18048_s3 + $0xbc] sm:$0xf] }
 0x35d   :  { %v6807_v21 = vadd.f32 %v6806_v17, %v5881_v13  ;;  %v6820_v25 = vadd.f32 %v6819_v18, %v5882_v14  ;;  %vm15832_vm3 = vcmp.eq.f32.partialorder %v7993_v23, 8.507059e+37  ;;  %v7996_v47 = vor.u32 1.1754944e-38, %v7995_v27  ;;  %v11617_v20 = vld [vmem:[%s18048_s3 + $0x1d8] sm:$0xf0] }
 0x35e   :  { %v12875_v24 = vpop.eup %12874  ;;  %v11900_v18 = vor.u32 %v12819_v2, %v11897_v3  ;;  %v11620_v42 = vor.u32 %v12748_v19, %v11617_v20  ;;  %v5889_v2 = vperm.slane %v15798_v22, 4 }
 0x35f   :  { %v12877_v26 = vpop.eup %12876  ;;  %v15802_v28 = vadd.f32 1.0, %v12875_v24  ;;  %12041 = vmatmul.msk.bf16.vlgmr.msrb.gmra.mxu0 %vm6741_vm0, %v15294_v32  ;;  %12042 = vmatmul.msk.bf16.vlgmr.msrb.gmra.mxu1 %vm6741_vm0, %v15294_v32  ;;  %v12081_v40 = vmul.f32 -1.442695, %v6807_v21  ;;  %v12082_v43 = vmul.f32 -1.442695, %v6820_v25 }
 0x360   :  { %v15810_v33 = vpop.eup %12878  ;;  %v15813_v34 = vadd.f32 1.0, %v12877_v26  ;;  %12043 = vmatmul.msk.bf16.vlgmr.msrb.gmra.mxu2 %vm6741_vm0, %v15294_v32  ;;  %12044 = vmatmul.msk.bf16.vlgmr.msrb.gmra.mxu3 %vm6741_vm0, %v15294_v32 }
 0x361   :  { %v15821_v37 = vpop.eup %12880  ;;  %v7970_v29 = vmul.f32 %v15810_v33, %v15785_v11  ;;  %12882 = vrcp.f32 %v15802_v28  ;;  %vm7975_vm4 = vweird.f32 %v15810_v33  ;;  %v8008_v53 = vand.u32 2147483647, %v15802_v28  ;;  %v12784_v11 = vld [vmem:[%s18048_s3 + $0x1d4] sm:$0xf0]  ;;  %7349 = vmatpush.bf16.msrb.mxu2 %v11904_v7  ;;  %7362 = vmatpush.bf16.msrb.mxu3 %v11908_v8 }
 0x362   :  { %v7985_v41 = vmul.f32 %v15821_v37, %v15787_v12  ;;  %12884 = vrcp.f32 %v15813_v34  ;;  %vm7990_vm5 = vweird.f32 %v15821_v37  ;;  %v8010_v54 = vand.u32 2147483648, %v15802_v28  ;;  %vm15877_vm6 = vmor %vm7974_vm1, %vm7975_vm4  ;;  %7336 = vmatpush.bf16.msrb.mxu1 %v11900_v18  ;;  %v11609_v18 = vld [vmem:[%s18048_s3 + $0x1d0] sm:$0xf0] }
 0x363   :  { %v7971_v46 = vsub.f32 1.0, %v7970_v29  ;;  %v6832_v48 = vpop.f32.mrf.mxu2  ;;  %v6845_v49 = vpop.f32.mrf.mxu3  ;;  %v8023_v59 = vand.u32 2147483647, %v15813_v34  ;;  %12886 = vpow2.f32 %v12081_v40  ;;  %v8025_v0 = vand.u32 2147483648, %v15813_v34  ;;  %vm7991_vm8 = vmor %vm7989_vm7, %vm7990_vm5 }
 0x364   :  { %v7986_v52 = vsub.f32 1.0, %v7985_v41  ;;  %v6808_v55 = vpop.f32.mrf.mxu0  ;;  %v6821_v56 = vpop.f32.mrf.mxu1  ;;  %v6833_v60 = vadd.f32 %v6832_v48, %v5883_v30  ;;  %12888 = vpow2.f32 %v12082_v43  ;;  %v6846_v1 = vadd.f32 %v6845_v49, %v5884_v31 }
 0x365   :  { %v7972_v58 = vmul.f32 %v15810_v33, %v7971_v46  ;;  %v11896_v12 = vor.u32 %v12855_v62, %v11895_v61  ;;  %vm8004_vm10 = vweird.f32 %v15802_v28  ;;  %vm8019_vm11 = vweird.f32 %v15813_v34  ;;  %7363 = vmatpush.bf16.msrb.mxu3 %v11620_v42 }
 0x366   :  { %v7987_v63 = vmul.f32 %v15821_v37, %v7986_v52  ;;  %v12083_v6 = vmul.f32 -1.442695, %v6833_v60  ;;  %v12084_v14 = vmul.f32 -1.442695, %v6846_v1  ;;  %vm8009_vm14 = vcmp.eq.f32.partialorder %v8008_v53, 8.507059e+37 }
 0x367   :  { %v15870_v4 = vpop.eup %12882  ;;  %v7973_v5 = vadd.f32 %v15810_v33, %v7972_v58  ;;  %7323 = vmatpush.bf16.msrb.mxu0 %v11896_v12  ;;  %v8011_v49 = vor.u32 1.1754944e-38, %v8010_v54  ;;  %vm15938_vm15 = vcmp.eq.f32.partialorder %v8023_v59, 8.507059e+37 }
 0x368   :  { %v7988_v10 = vadd.f32 %v15821_v37, %v7987_v63  ;;  %v8000_v13 = vmul.f32 %v15870_v4, %v15802_v28  ;;  %v15891_v16 = vpop.eup %12884  ;;  %12890 = vpow2.f32 %v12083_v6  ;;  %vm8005_vm9 = vweird.f32 %v15870_v4  ;;  %v12783_v6 = vld [vmem:[%s18048_s3 + $0x1cc] sm:$0xf0] }
 0x369   :  { %v7977_v17 = vsel %vm15877_vm6, %v15810_v33, %v7973_v5  ;;  %v8015_v25 = vmul.f32 %v15891_v16, %v15813_v34  ;;  %v12887_v26 = vpop.eup %12886  ;;  %12892 = vpow2.f32 %v12084_v14  ;;  %v11616_v33 = vor.u32 %v12784_v11, %v11615_v15  ;;  %vm8006_vm13 = vmor %vm8004_vm10, %vm8005_vm9  ;;  %v11607_v5 = vld [vmem:[%s18048_s3 + $0xb0] sm:$0xf]  ;;  %v12747_v15 = vld [vmem:[%s18048_s3 + $0xb4] sm:$0xf] }
 0x36a   :  { %v7982_v21 = vsel %vm15825_vm2, %v7981_v39, %v7977_v17  ;;  %v7992_v24 = vsel %vm7991_vm8, %v15821_v37, %v7988_v10  ;;  %v8001_v23 = vsub.f32 1.0, %v8000_v13  ;;  %v12889_v37 = vpop.eup %12888  ;;  %v15919_v39 = vadd.f32 1.0, %v12887_v26 }
 0x36b   :  { %9049 = vst [vmem:[%s18050_s5] sm:$0xff] %v7982_v21  ;;  %v7997_v27 = vsel %vm15832_vm3, %v7996_v47, %v7992_v24  ;;  %v6834_v30 = vpop.f32.mrf.mxu2  ;;  %v6847_v31 = vpop.f32.mrf.mxu3  ;;  %v8016_v38 = vsub.f32 1.0, %v8015_v25  ;;  %v15923_v43 = vadd.f32 1.0, %v12889_v37  ;;  %7350 = vmatpush.bf16.msrb.mxu2 %v11616_v33  ;;  %vm8020_vm12 = vweird.f32 %v15891_v16  ;;  %v11919_v37 = vld [vmem:[%s18048_s3 + $0x308] sm:$0xf] }
 0x36c   :  { %9050 = vst [vmem:[%s18050_s5 + $0x8] sm:$0xff] %v7997_v27  ;;  %v8002_v29 = vmul.f32 %v15870_v4, %v8001_v23  ;;  %v6858_v40 = vpop.f32.mrf.mxu0  ;;  %v6871_v41 = vpop.f32.mrf.mxu1  ;;  %12894 = vrcp.f32 %v15919_v39  ;;  %v8026_v28 = vor.u32 1.1754944e-38, %v8025_v0  ;;  %v8040_v53 = vand.u32 2147483648, %v15919_v39  ;;  %vm8021_vm1 = vmor %vm8019_vm11, %vm8020_vm12 }
 0x36d   :  { %v8017_v47 = vmul.f32 %v15891_v16, %v8016_v38  ;;  %12896 = vrcp.f32 %v15923_v43  ;;  %v8038_v56 = vand.u32 2147483647, %v15919_v39  ;;  %v8055_v57 = vand.u32 2147483648, %v15923_v43 }
 0x36e   :  { %v8003_v46 = vadd.f32 %v15870_v4, %v8002_v29  ;;  %v12891_v48 = vpop.eup %12890  ;;  %v8053_v60 = vand.u32 2147483647, %v15923_v43  ;;  %v6859_v34 = vadd.f32 %v6858_v40, %v5885_v35  ;;  %v6872_v63 = vadd.f32 %v6871_v41, %v5886_v36 }
 0x36f   :  { %12045 = vmatmul.msk.bf16.vlgmr.msra.gmra.mxu0 %vm6741_vm0, %v15294_v32  ;;  %12046 = vmatmul.msk.bf16.vlgmr.msra.gmra.mxu1 %vm6741_vm0, %v15294_v32  ;;  %v8018_v52 = vadd.f32 %v15891_v16, %v8017_v47  ;;  %v12893_v54 = vpop.eup %12892  ;;  %v15962_v58 = vadd.f32 1.0, %v12891_v48  ;;  %vm8034_vm2 = vweird.f32 %v15919_v39  ;;  %v15985_v35 = vor.u32 1.1754944e-38, %v8040_v53 }
 0x370   :  { %v8007_v51 = vsel %vm8006_vm13, %v15870_v4, %v8003_v46  ;;  %12047 = vmatmul.msk.bf16.vlgmr.msra.gmra.mxu2 %vm6741_vm0, %v15294_v32  ;;  %12048 = vmatmul.msk.bf16.vlgmr.msra.gmra.mxu3 %vm6741_vm0, %v15294_v32  ;;  %v15969_v61 = vadd.f32 1.0, %v12893_v54  ;;  %vm8049_vm3 = vweird.f32 %v15923_v43  ;;  %vm15999_vm4 = vcmp.eq.f32.partialorder %v8038_v56, 8.507059e+37  ;;  %v11921_v56 = vld [vmem:[%s18048_s3 + $0x428] sm:$0xf0] }
 0x371   :  { %v8012_v55 = vsel %vm8009_vm14, %v8011_v49, %v8007_v51  ;;  %v8022_v59 = vsel %vm8021_vm1, %v15891_v16, %v8018_v52  ;;  %12898 = vrcp.f32 %v15962_v58  ;;  %v8056_v10 = vor.u32 1.1754944e-38, %v8055_v57 }
 0x372   :  { %9051 = vst [vmem:[%s18050_s5 + $0x10] sm:$0xff] %v8012_v55  ;;  %v8027_v62 = vsel %vm15938_vm15, %v8026_v28, %v8022_v59  ;;  %v15979_v3 = vpop.eup %12894  ;;  %12900 = vrcp.f32 %v15969_v61  ;;  %v8068_v13 = vand.u32 2147483647, %v15962_v58  ;;  %v8070_v14 = vand.u32 2147483648, %v15962_v58  ;;  %v12822_v55 = vld [vmem:[%s18048_s3 + $0x30c] sm:$0xf] }
 0x373   :  { %v6884_v0 = vpop.f32.mrf.mxu2  ;;  %v6897_v1 = vpop.f32.mrf.mxu3  ;;  %9052 = vst [vmem:[%s18050_s5 + $0x18] sm:$0xff] %v8027_v62  ;;  %v8030_v8 = vmul.f32 %v15979_v3, %v15919_v39  ;;  %vm8035_vm5 = vweird.f32 %v15979_v3  ;;  %vm16011_vm6 = vcmp.eq.f32.partialorder %v8053_v60, 8.507059e+37  ;;  %v8083_v17 = vand.u32 2147483647, %v15969_v61 }
 0x374   :  { %v6860_v4 = vpop.f32.mrf.mxu0  ;;  %v6873_v36 = vpop.f32.mrf.mxu1  ;;  %v8085_v12 = vand.u32 2147483648, %v15969_v61  ;;  %v12085_v20 = vmul.f32 -1.442695, %v6859_v34  ;;  %v12086_v21 = vmul.f32 -1.442695, %v6872_v63  ;;  %vm8064_vm8 = vweird.f32 %v15962_v58  ;;  %vm8036_vm12 = vmor %vm8034_vm2, %vm8035_vm5 }
 0x375   :  { %v15995_v7 = vpop.eup %12896  ;;  %v8031_v19 = vsub.f32 1.0, %v8030_v8  ;;  %v6885_v23 = vadd.f32 %v6884_v0, %v5887_v45  ;;  %v6898_v25 = vadd.f32 %v6897_v1, %v5888_v44  ;;  %v5890_v26 = vperm.slane %v15798_v22, 5  ;;  %v12858_v45 = vld [vmem:[%s18048_s3 + $0x424] sm:$0xf0] }
 0x376   :  { %v8045_v11 = vmul.f32 %v15995_v7, %v15923_v43  ;;  %vm8050_vm7 = vweird.f32 %v15995_v7  ;;  %vm8079_vm9 = vweird.f32 %v15969_v61  ;;  %12902 = vpow2.f32 %v12085_v20 }
 0x377   :  { %v16027_v27 = vpop.eup %12898  ;;  %v8032_v30 = vmul.f32 %v15979_v3, %v8031_v19  ;;  %v11608_v31 = vor.u32 %v12783_v6, %v11607_v5  ;;  %v11612_v33 = vor.u32 %v12747_v15, %v11609_v18  ;;  %12904 = vpow2.f32 %v12086_v21  ;;  %vm8051_vm13 = vmor %vm8049_vm3, %vm8050_vm7 }
 0x378   :  { %v8046_v24 = vsub.f32 1.0, %v8045_v11  ;;  %v16037_v29 = vpop.eup %12900  ;;  %v8060_v40 = vmul.f32 %v16027_v27, %v15962_v58  ;;  %vm8065_vm10 = vweird.f32 %v16027_v27  ;;  %v12087_v44 = vmul.f32 -1.442695, %v6885_v23 }
 0x379   :  { %v8033_v41 = vadd.f32 %v15979_v3, %v8032_v30  ;;  %v8075_v42 = vmul.f32 %v16037_v29, %v15969_v61  ;;  %vm8080_vm11 = vweird.f32 %v16037_v29  ;;  %7324 = vmatpush.bf16.msrb.mxu0 %v11608_v31  ;;  %7337 = vmatpush.bf16.msrb.mxu1 %v11612_v33  ;;  %v12088_v50 = vmul.f32 -1.442695, %v6898_v25  ;;  %vm8066_vm15 = vmor %vm8064_vm8, %vm8065_vm10  ;;  %v12857_v30 = vld [vmem:[%s18048_s3 + $0x41c] sm:$0xf0] }
 0x37a   :  { %v8047_v38 = vmul.f32 %v15995_v7, %v8046_v24  ;;  %v8061_v49 = vsub.f32 1.0, %v8060_v40  ;;  %v11920_v28 = vor.u32 %v12858_v45, %v11919_v37  ;;  %12906 = vpow2.f32 %v12087_v44  ;;  %vm8081_vm1 = vmor %vm8079_vm9, %vm8080_vm11  ;;  %v12821_v40 = vld [vmem:[%s18048_s3 + $0x304] sm:$0xf] }
 0x37b   :  { %v6886_v46 = vpop.f32.mrf.mxu2  ;;  %v6899_v47 = vpop.f32.mrf.mxu3  ;;  %v8037_v53 = vsel %vm8036_vm12, %v15979_v3, %v8033_v41  ;;  %v8076_v54 = vsub.f32 1.0, %v8075_v42  ;;  %12908 = vpow2.f32 %v12088_v50  ;;  %vm16084_vm14 = vcmp.eq.f32.partialorder %v8068_v13, 8.507059e+37  ;;  %v11913_v41 = vld [vmem:[%s18048_s3 + $0x420] sm:$0xf0] }
 0x37c   :  { %v8048_v48 = vadd.f32 %v15995_v7, %v8047_v38  ;;  %v6910_v51 = vpop.f32.mrf.mxu0  ;;  %v6923_v52 = vpop.f32.mrf.mxu1  ;;  %v8042_v57 = vsel %vm15999_vm4, %v15985_v35, %v8037_v53  ;;  %v8062_v59 = vmul.f32 %v16027_v27, %v8061_v49  ;;  %7401 = vmatpush.bf16.msra.mxu2 %v11920_v28  ;;  %v11924_v4 = vor.u32 %v12822_v55, %v11921_v56 }
 0x37d   :  { %v6911_v39 = vadd.f32 %v6910_v51, %v5889_v2  ;;  %v12903_v60 = vpop.eup %12902  ;;  %9053 = vst [vmem:[%s18050_s5 + $0x20] sm:$0xff] %v8042_v57  ;;  %v8077_v62 = vmul.f32 %v16037_v29, %v8076_v54  ;;  %v6924_v0 = vadd.f32 %v6923_v52, %v5890_v26  ;;  %v8071_v36 = vor.u32 1.1754944e-38, %v8070_v14 }
 0x37e   :  { %v8052_v43 = vsel %vm8051_vm13, %v15995_v7, %v8048_v48  ;;  %v12905_v1 = vpop.eup %12904  ;;  %v8063_v2 = vadd.f32 %v16027_v27, %v8062_v59  ;;  %v16088_v35 = vadd.f32 1.0, %v12903_v60  ;;  %v8086_v8 = vor.u32 1.1754944e-38, %v8085_v12  ;;  %7414 = vmatpush.bf16.msra.mxu3 %v11924_v4 }
 0x37f   :  { %v8057_v34 = vsel %vm16011_vm6, %v8056_v10, %v8052_v43  ;;  %v12089_v63 = vmul.f32 -1.442695, %v6911_v39  ;;  %12049 = vmatmul.msk.bf16.vlgmr.msrb.gmra.mxu0 %vm6741_vm0, %v15294_v32  ;;  %12050 = vmatmul.msk.bf16.vlgmr.msrb.gmra.mxu1 %vm6741_vm0, %v15294_v32  ;;  %v8078_v5 = vadd.f32 %v16037_v29, %v8077_v62  ;;  %v16101_v6 = vadd.f32 1.0, %v12905_v1 }
 0x380   :  { %9054 = vst [vmem:[%s18050_s5 + $0x28] sm:$0xff] %v8057_v34  ;;  %12051 = vmatmul.msk.bf16.vlgmr.msrb.gmra.mxu2 %vm6741_vm0, %v15294_v32  ;;  %12052 = vmatmul.msk.bf16.vlgmr.msrb.gmra.mxu3 %vm6741_vm0, %v15294_v32  ;;  %v8067_v7 = vsel %vm8066_vm15, %v16027_v27, %v8063_v2  ;;  %v12090_v58 = vmul.f32 -1.442695, %v6924_v0  ;;  %v12907_v9 = vpop.eup %12906  ;;  %vm8084_vm2 = vcmp.eq.f32.partialorder %v8083_v17, 8.507059e+37  ;;  %v5891_v12 = vperm.slane %v15798_v22, 6 }
 0x381   :  { %12910 = vpow2.f32 %v12089_v63  ;;  %v8072_v10 = vsel %vm16084_vm14, %v8071_v36, %v8067_v7  ;;  %v8082_v13 = vsel %vm8081_vm1, %v16037_v29, %v8078_v5  ;;  %v12909_v11 = vpop.eup %12908  ;;  %v8098_v61 = vand.u32 2147483647, %v16088_v35  ;;  %v11911_v27 = vld [vmem:[%s18048_s3 + $0x300] sm:$0xf] }
 0x382   :  { %12912 = vrcp.f32 %v16088_v35  ;;  %9055 = vst [vmem:[%s18050_s5 + $0x30] sm:$0xff] %v8072_v10  ;;  %v8087_v16 = vsel %vm8084_vm2, %v8086_v8, %v8082_v13  ;;  %v8100_v17 = vand.u32 2147483648, %v16088_v35  ;;  %v16128_v20 = vadd.f32 1.0, %v12907_v9 }
 0x383   :  { %12914 = vrcp.f32 %v16101_v6  ;;  %v6936_v14 = vpop.f32.mrf.mxu2  ;;  %v6949_v15 = vpop.f32.mrf.mxu3  ;;  %9056 = vst [vmem:[%s18050_s5 + $0x38] sm:$0xff] %v8087_v16  ;;  %v16130_v21 = vadd.f32 1.0, %v12909_v11  ;;  %v8113_v24 = vand.u32 2147483647, %v16101_v6  ;;  %v8115_v23 = vand.u32 2147483648, %v16101_v6 }
 0x384   :  { %v6912_v18 = vpop.f32.mrf.mxu0  ;;  %v6925_v19 = vpop.f32.mrf.mxu1  ;;  %12916 = vpow2.f32 %v12090_v58  ;;  %vm8094_vm3 = vweird.f32 %v16088_v35  ;;  %vm8109_vm4 = vweird.f32 %v16101_v6  ;;  %vm16147_vm5 = vcmp.eq.f32.partialorder %v8098_v61, 8.507059e+37  ;;  %v11633_v61 = vld [vmem:[%s18048_s3 + $0x1e8] sm:$0xf0] }
 0x385   :  { %12918 = vrcp.f32 %v16128_v20  ;;  %v8101_v45 = vor.u32 1.1754944e-38, %v8100_v17  ;;  %v6937_v29 = vadd.f32 %v6936_v14, %v5891_v12  ;;  %v5892_v38 = vperm.slane %v15798_v22, 7  ;;  %v12750_v19 = vld [vmem:[%s18048_s3 + $0xcc] sm:$0xf] }
 0x386   :  { %12920 = vrcp.f32 %v16130_v21  ;;  %vm16160_vm6 = vcmp.eq.f32.partialorder %v8113_v24, 8.507059e+37  ;;  %v8116_v46 = vor.u32 1.1754944e-38, %v8115_v23  ;;  %v8128_v47 = vand.u32 2147483647, %v16128_v20 }
 0x387   :  { %v12911_v25 = vpop.eup %12910  ;;  %v8130_v22 = vand.u32 2147483648, %v16128_v20  ;;  %v8143_v49 = vand.u32 2147483647, %v16130_v21  ;;  %vm8124_vm8 = vweird.f32 %v16128_v20  ;;  %v11912_v54 = vor.u32 %v12857_v30, %v11911_v27  ;;  %v16247_v27 = vld [vmem:[%s18049_s4 + $0x10] sm:$0xff] }
 0x388   :  { %v12913_v26 = vpop.eup %12912  ;;  %v16167_v50 = vadd.f32 1.0, %v12911_v25  ;;  %v11916_v39 = vor.u32 %v12821_v40, %v11913_v41  ;;  %vm8139_vm9 = vweird.f32 %v16130_v21  ;;  %v12091_v59 = vmul.f32 -1.442695, %v6937_v29  ;;  %v11623_v29 = vld [vmem:[%s18048_s3 + $0xc0] sm:$0xf] }
 0x389   :  { %v16144_v31 = vpop.eup %12914  ;;  %v8090_v33 = vmul.f32 %v12913_v26, %v16088_v35  ;;  %vm8095_vm7 = vweird.f32 %v12913_v26  ;;  %v6950_v60 = vadd.f32 %v6949_v15, %v5892_v38  ;;  %vm16184_vm11 = vcmp.eq.f32.partialorder %v8128_v47, 8.507059e+37  ;;  %7375 = vmatpush.bf16.msra.mxu0 %v11912_v54  ;;  %v11631_v15 = vld [vmem:[%s18048_s3 + $0xc8] sm:$0xf]  ;;  %v12785_v38 = vld [vmem:[%s18048_s3 + $0x1dc] sm:$0xf0] }
 0x38a   :  { %v8105_v42 = vmul.f32 %v16144_v31, %v16101_v6  ;;  %v12917_v28 = vpop.eup %12916  ;;  %12922 = vrcp.f32 %v16167_v50  ;;  %vm8110_vm10 = vweird.f32 %v16144_v31  ;;  %v8145_v1 = vand.u32 2147483648, %v16130_v21  ;;  %7388 = vmatpush.bf16.msra.mxu1 %v11916_v39  ;;  %vm8096_vm13 = vmor %vm8094_vm3, %vm8095_vm7  ;;  %v12786_v6 = vld [vmem:[%s18048_s3 + $0x1e4] sm:$0xf0] }
 0x38b   :  { %v8091_v48 = vsub.f32 1.0, %v8090_v33  ;;  %v6938_v51 = vpop.f32.mrf.mxu2  ;;  %v6951_v52 = vpop.f32.mrf.mxu3  ;;  %v8131_v3 = vor.u32 1.1754944e-38, %v8130_v22  ;;  %vm16191_vm12 = vcmp.eq.f32.partialorder %v8143_v49, 8.507059e+37  ;;  %v16200_v8 = vadd.f32 1.0, %v12917_v28  ;;  %vm8111_vm15 = vmor %vm8109_vm4, %vm8110_vm10 }
 0x38c   :  { %v8106_v53 = vsub.f32 1.0, %v8105_v42  ;;  %v16170_v55 = vpop.f32.mrf.mxu0  ;;  %v16172_v56 = vpop.f32.mrf.mxu1  ;;  %12924 = vpow2.f32 %v12091_v59  ;;  %v12092_v10 = vmul.f32 -1.442695, %v6950_v60  ;;  %v8146_v18 = vor.u32 1.1754944e-38, %v8145_v1 }
 0x38d   :  { %v16174_v57 = vpop.eup %12918  ;;  %v8092_v43 = vmul.f32 %v12913_v26, %v8091_v48  ;;  %12926 = vrcp.f32 %v16200_v8  ;;  %vm8154_vm2 = vweird.f32 %v16167_v50  ;;  %v8160_v37 = vand.u32 2147483648, %v16167_v50 }
 0x38e   :  { %v16178_v34 = vpop.eup %12920  ;;  %v8107_v62 = vmul.f32 %v16144_v31, %v8106_v53  ;;  %v8120_v63 = vmul.f32 %v16174_v57, %v16128_v20  ;;  %vm8125_vm14 = vweird.f32 %v16174_v57  ;;  %12928 = vpow2.f32 %v12092_v10  ;;  %v11927_v10 = vld [vmem:[%s18048_s3 + $0x310] sm:$0xf] }
 0x38f   :  { %v8093_v2 = vadd.f32 %v12913_v26, %v8092_v43  ;;  %v8135_v4 = vmul.f32 %v16178_v34, %v16130_v21  ;;  %vm8140_vm1 = vweird.f32 %v16178_v34  ;;  %vm8126_vm3 = vmor %vm8124_vm8, %vm8125_vm14  ;;  %v11636_v41 = vor.u32 %v12750_v19, %v11633_v61  ;;  %v11625_v43 = vld [vmem:[%s18048_s3 + $0x1e0] sm:$0xf0]  ;;  %v11929_v19 = vld [vmem:[%s18048_s3 + $0x430] sm:$0xf0] }
 0x390   :  { %v8108_v5 = vadd.f32 %v16144_v31, %v8107_v62  ;;  %v8121_v7 = vsub.f32 1.0, %v8120_v63  ;;  %v16217_v11 = vpop.eup %12922  ;;  %vm8141_vm4 = vmor %vm8139_vm9, %vm8140_vm1  ;;  %v5893_v47 = vperm.slane %v16247_v27, 0  ;;  %v5894_v48 = vperm.slane %v16247_v27, 1  ;;  %v12824_v62 = vld [vmem:[%s18048_s3 + $0x31c] sm:$0xf] }
 0x391   :  { %v8097_v58 = vsel %vm8096_vm13, %v12913_v26, %v8093_v2  ;;  %v8136_v9 = vsub.f32 1.0, %v8135_v4  ;;  %v8150_v25 = vmul.f32 %v16217_v11, %v16167_v50  ;;  %v8158_v26 = vand.u32 2147483647, %v16167_v50  ;;  %7415 = vmatpush.bf16.msra.mxu3 %v11636_v41 }
 0x392   :  { %v8102_v35 = vsel %vm16147_vm5, %v8101_v45, %v8097_v58  ;;  %v8112_v13 = vsel %vm8111_vm15, %v16144_v31, %v8108_v5  ;;  %v8122_v14 = vmul.f32 %v16174_v57, %v8121_v7  ;;  %v11632_v45 = vor.u32 %v12786_v6, %v11631_v15  ;;  %v12925_v42 = vpop.eup %12924 }
 0x393   :  { %9057 = vst [vmem:[%s18050_s5 + $0x40] sm:$0xff] %v8102_v35  ;;  %v8117_v16 = vsel %vm16160_vm6, %v8116_v46, %v8112_v13  ;;  %v8137_v12 = vmul.f32 %v16178_v34, %v8136_v9  ;;  %v16232_v17 = vpop.f32.mrf.mxu2  ;;  %v16234_v24 = vpop.f32.mrf.mxu3  ;;  %v8151_v20 = vsub.f32 1.0, %v8150_v25  ;;  %vm8155_vm5 = vweird.f32 %v16217_v11  ;;  %v11937_v9 = vld [vmem:[%s18048_s3 + $0x438] sm:$0xf0] }
 0x394   :  { %9058 = vst [vmem:[%s18050_s5 + $0x48] sm:$0xff] %v8117_v16  ;;  %v8123_v23 = vadd.f32 %v16174_v57, %v8122_v14  ;;  %v6964_v30 = vpop.f32.mrf.mxu0  ;;  %v6977_v31 = vpop.f32.mrf.mxu1  ;;  %7402 = vmatpush.bf16.msra.mxu2 %v11632_v45  ;;  %v16280_v51 = vadd.f32 1.0, %v12925_v42  ;;  %v11624_v52 = vor.u32 %v12785_v38, %v11623_v29  ;;  %vm16285_vm6 = vcmp.eq.f32.partialorder %v8158_v26, 8.507059e+37  ;;  %vm16318_vm7 = vmor %vm8154_vm2, %vm8155_vm5  ;;  %12056 = vmatmul.msk.bf16.vlgmr.msra.gmra.mxu3 %vm6741_vm0, %v15294_v32  ;;  %v12823_v16 = vld [vmem:[%s18048_s3 + $0x314] sm:$0xf] }
 0x395   :  { %v8138_v33 = vadd.f32 %v16178_v34, %v8137_v12  ;;  %v16272_v22 = vpop.eup %12926  ;;  %v8152_v49 = vmul.f32 %v16217_v11, %v8151_v20  ;;  %v6963_v54 = vadd.f32 %v16170_v55, %v5893_v47  ;;  %v6976_v39 = vadd.f32 %v16172_v56, %v5894_v48  ;;  %v11935_v55 = vld [vmem:[%s18048_s3 + $0x318] sm:$0xf]  ;;  %v12752_v30 = vld [vmem:[%s18048_s3 + $0xdc] sm:$0xf] }
 0x396   :  { %v8127_v40 = vsel %vm8126_vm3, %v16174_v57, %v8123_v23  ;;  %v8165_v53 = vmul.f32 %v16272_v22, %v16200_v8  ;;  %v12749_v57 = vld [vmem:[%s18048_s3 + $0xc4] sm:$0xf]  ;;  %v8173_v60 = vand.u32 2147483647, %v16200_v8  ;;  %12930 = vrcp.f32 %v16280_v51  ;;  %7376 = vmatpush.bf16.msra.mxu0 %v11624_v52  ;;  %v12860_v56 = vld [vmem:[%s18048_s3 + $0x434] sm:$0xf0]  ;;  %v12929_v63 = vpop.eup %12928 }
 0x397   :  { %v8132_v44 = vsel %vm16184_vm11, %v8131_v3, %v8127_v40  ;;  %v8142_v46 = vsel %vm8141_vm4, %v16178_v34, %v8138_v33  ;;  %v8153_v59 = vadd.f32 %v16217_v11, %v8152_v49  ;;  %v8175_v34 = vand.u32 2147483648, %v16200_v8  ;;  %12055 = vmatmul.msk.bf16.vlgmr.msra.gmra.mxu2 %vm6741_vm0, %v15294_v32  ;;  %v12788_v26 = vld [vmem:[%s18048_s3 + $0x1f4] sm:$0xf0]  ;;  %v11649_v29 = vld [vmem:[%s18048_s3 + $0x1f8] sm:$0xf0] }
 0x398   :  { %9059 = vst [vmem:[%s18050_s5 + $0x50] sm:$0xff] %v8132_v44  ;;  %v8147_v21 = vsel %vm16191_vm12, %v8146_v18, %v8142_v46  ;;  %v8161_v1 = vor.u32 1.1754944e-38, %v8160_v37  ;;  %v8166_v2 = vsub.f32 1.0, %v8165_v53  ;;  %v12093_v3 = vmul.f32 -1.442695, %v6963_v54 }
 0x399   :  { %9060 = vst [vmem:[%s18050_s5 + $0x58] sm:$0xff] %v8147_v21  ;;  %v12094_v4 = vmul.f32 -1.442695, %v6976_v39  ;;  %v8157_v7 = vsel %vm16318_vm7, %v16217_v11, %v8153_v59  ;;  %vm8170_vm8 = vweird.f32 %v16272_v22  ;;  %v16328_v50 = vadd.f32 1.0, %v12929_v63  ;;  %12053 = vmatmul.msk.bf16.vlgmr.msra.gmra.mxu0 %vm6741_vm0, %v15294_v32  ;;  %v12859_v11 = vld [vmem:[%s18048_s3 + $0x42c] sm:$0xf0] }
 0x39a   :  { %v11628_v58 = vor.u32 %v12749_v57, %v11625_v43  ;;  %v8162_v14 = vsel %vm16285_vm6, %v8161_v1, %v8157_v7  ;;  %v8167_v15 = vmul.f32 %v16272_v22, %v8166_v2  ;;  %v8188_v6 = vand.u32 2147483647, %v16280_v51  ;;  %v11639_v1 = vld [vmem:[%s18048_s3 + $0xd0] sm:$0xf]  ;;  %v11641_v7 = vld [vmem:[%s18048_s3 + $0x1f0] sm:$0xf0] }
 0x39b   :  { %v6990_v36 = vpop.f32.mrf.mxu2  ;;  %v7003_v5 = vpop.f32.mrf.mxu3  ;;  %12932 = vpow2.f32 %v12093_v3  ;;  %9061 = vst [vmem:[%s18050_s5 + $0x60] sm:$0xff] %v8162_v14  ;;  %vm8169_vm9 = vweird.f32 %v16200_v8  ;;  %vm16356_vm10 = vcmp.eq.f32.partialorder %v8173_v60, 8.507059e+37  ;;  %v8176_v18 = vor.u32 1.1754944e-38, %v8175_v34  ;;  %v11647_v8 = vld [vmem:[%s18048_s3 + $0xd8] sm:$0xf] }
 0x39c   :  { %v16336_v35 = vpop.f32.mrf.mxu0  ;;  %v16338_v13 = vpop.f32.mrf.mxu1  ;;  %12934 = vrcp.f32 %v16328_v50  ;;  %7389 = vmatpush.bf16.msra.mxu1 %v11628_v58  ;;  %v8168_v61 = vadd.f32 %v16272_v22, %v8167_v15  ;;  %v11936_v23 = vor.u32 %v12860_v56, %v11935_v55  ;;  %v11940_v25 = vor.u32 %v12824_v62, %v11937_v9  ;;  %vm8171_vm11 = vmor %vm8169_vm9, %vm8170_vm8  ;;  %v12787_v2 = vld [vmem:[%s18048_s3 + $0x1ec] sm:$0xf0]  ;;  %v12751_v5 = vld [vmem:[%s18048_s3 + $0xd4] sm:$0xf] }
 0x39d   :  { %12936 = vpow2.f32 %v12094_v4  ;;  %v16374_v31 = vpop.eup %12930  ;;  %vm8184_vm12 = vweird.f32 %v16280_v51  ;;  %v8190_v33 = vand.u32 2147483648, %v16280_v51  ;;  %v5895_v37 = vperm.slane %v16247_v27, 2  ;;  %v11951_v9 = vld [vmem:[%s18048_s3 + $0x328] sm:$0xf]  ;;  %v12826_v15 = vld [vmem:[%s18048_s3 + $0x32c] sm:$0xf] }
 0x39e   :  { %v5896_v45 = vperm.slane %v16247_v27, 3  ;;  %v8172_v38 = vsel %vm8171_vm11, %v16272_v22, %v8168_v61  ;;  %v8180_v40 = vmul.f32 %v16374_v31, %v16280_v51  ;;  %vm16388_vm13 = vcmp.eq.f32.partialorder %v8188_v6, 8.507059e+37  ;;  %7453 = vmatpush.bf16.msrb.mxu2 %v11936_v23  ;;  %7466 = vmatpush.bf16.msrb.mxu3 %v11940_v25  ;;  %v11953_v6 = vld [vmem:[%s18048_s3 + $0x448] sm:$0xf0] }
 0x39f   :  { %12054 = vmatmul.msk.bf16.vlgmr.msra.gmra.mxu1 %vm6741_vm0, %v15294_v32  ;;  %v11928_v41 = vor.u32 %v12859_v11, %v11927_v10  ;;  %v8177_v42 = vsel %vm16356_vm10, %v8176_v18, %v8172_v38  ;;  %v6989_v44 = vadd.f32 %v16232_v17, %v5895_v37  ;;  %v11932_v47 = vor.u32 %v12823_v16, %v11929_v19  ;;  %v12862_v10 = vld [vmem:[%s18048_s3 + $0x444] sm:$0xf0]  ;;  %v11943_v37 = vld [vmem:[%s18048_s3 + $0x320] sm:$0xf] }
 0x3a0   :  { %v7002_v46 = vadd.f32 %v16234_v24, %v5896_v45  ;;  %9062 = vst [vmem:[%s18050_s5 + $0x68] sm:$0xff] %v8177_v42  ;;  %v8181_v22 = vsub.f32 1.0, %v8180_v40  ;;  %v11648_v21 = vor.u32 %v12788_v26, %v11647_v8  ;;  %v11652_v49 = vor.u32 %v12752_v30, %v11649_v29 }
 0x3a1   :  { %v12933_v48 = vpop.eup %12932  ;;  %7427 = vmatpush.bf16.msrb.mxu0 %v11928_v41  ;;  %v5897_v52 = vperm.slane %v16247_v27, 4  ;;  %v8191_v17 = vor.u32 1.1754944e-38, %v8190_v33  ;;  %v12095_v39 = vmul.f32 -1.442695, %v6989_v44  ;;  %7440 = vmatpush.bf16.msrb.mxu1 %v11932_v47  ;;  %vm8185_vm14 = vweird.f32 %v16374_v31 }
 0x3a2   :  { %v16406_v54 = vpop.eup %12934  ;;  %v16408_v24 = vadd.f32 1.0, %v12933_v48  ;;  %v12096_v57 = vmul.f32 -1.442695, %v7002_v46  ;;  %v8182_v34 = vmul.f32 %v16374_v31, %v8181_v22  ;;  %7454 = vmatpush.bf16.msrb.mxu2 %v11648_v21  ;;  %v8203_v62 = vand.u32 2147483647, %v16328_v50  ;;  %7467 = vmatpush.bf16.msrb.mxu3 %v11652_v49  ;;  %vm8186_vm15 = vmor %vm8184_vm12, %vm8185_vm14 }
 0x3a3   :  { %v16402_v28 = vpop.f32.mrf.mxu2  ;;  %v16404_v53 = vpop.f32.mrf.mxu3  ;;  %v8195_v55 = vmul.f32 %v16406_v54, %v16328_v50  ;;  %v7015_v56 = vadd.f32 %v16336_v35, %v5897_v52  ;;  %v8205_v63 = vand.u32 2147483648, %v16328_v50  ;;  %v5898_v0 = vperm.slane %v16247_v27, 5 }
 0x3a4   :  { %v7016_v43 = vpop.f32.mrf.mxu0  ;;  %v7029_v59 = vpop.f32.mrf.mxu1  ;;  %12938 = vrcp.f32 %v16408_v24  ;;  %v8183_v3 = vadd.f32 %v16374_v31, %v8182_v34  ;;  %vm8199_vm1 = vweird.f32 %v16328_v50  ;;  %vm8200_vm2 = vweird.f32 %v16406_v54  ;;  %v12861_v50 = vld [vmem:[%s18048_s3 + $0x43c] sm:$0xf0] }
 0x3a5   :  { %v12937_v60 = vpop.eup %12936  ;;  %v8196_v4 = vsub.f32 1.0, %v8195_v55  ;;  %12940 = vpow2.f32 %v12095_v39  ;;  %v12097_v58 = vmul.f32 -1.442695, %v7015_v56  ;;  %v8218_v51 = vand.u32 2147483647, %v16408_v24  ;;  %vm16475_vm4 = vmor %vm8199_vm1, %vm8200_vm2  ;;  %12060 = vmatmul.msk.bf16.vlgmr.msrb.gmra.mxu3 %vm6741_vm0, %v15294_v32 }
 0x3a6   :  { %v16426_v36 = vadd.f32 1.0, %v12937_v60  ;;  %12942 = vpow2.f32 %v12096_v57  ;;  %v8187_v35 = vsel %vm8186_vm15, %v16374_v31, %v8183_v3  ;;  %vm16458_vm3 = vcmp.eq.f32.partialorder %v8203_v62, 8.507059e+37 }
 0x3a7   :  { %v8197_v14 = vmul.f32 %v16406_v54, %v8196_v4  ;;  %v8192_v11 = vsel %vm16388_vm13, %v8191_v17, %v8187_v35  ;;  %v8206_v12 = vor.u32 1.1754944e-38, %v8205_v63  ;;  %12059 = vmatmul.msk.bf16.vlgmr.msrb.gmra.mxu2 %vm6741_vm0, %v15294_v32  ;;  %v7028_v19 = vadd.f32 %v16338_v13, %v5898_v0 }
 0x3a8   :  { %12944 = vrcp.f32 %v16426_v36  ;;  %9063 = vst [vmem:[%s18050_s5 + $0x70] sm:$0xff] %v8192_v11  ;;  %v11640_v61 = vor.u32 %v12787_v2, %v11639_v1  ;;  %v11644_v23 = vor.u32 %v12751_v5, %v11641_v7  ;;  %vm8214_vm5 = vweird.f32 %v16408_v24  ;;  %v11663_v11 = vld [vmem:[%s18048_s3 + $0xe8] sm:$0xf] }
 0x3a9   :  { %12946 = vpow2.f32 %v12097_v58  ;;  %v8198_v18 = vadd.f32 %v16406_v54, %v8197_v14  ;;  %v8220_v31 = vand.u32 2147483648, %v16408_v24  ;;  %v11952_v13 = vor.u32 %v12862_v10, %v11951_v9 }
 0x3aa   :  { %v16469_v26 = vpop.eup %12938  ;;  %v11956_v33 = vor.u32 %v12826_v15, %v11953_v6  ;;  %vm16498_vm6 = vcmp.eq.f32.partialorder %v8218_v51, 8.507059e+37  ;;  %v12098_v42 = vmul.f32 -1.442695, %v7028_v19  ;;  %7428 = vmatpush.bf16.msrb.mxu0 %v11640_v61  ;;  %7441 = vmatpush.bf16.msrb.mxu1 %v11644_v23  ;;  %v8233_v47 = vand.u32 2147483647, %v16426_v36 }
 0x3ab   :  { %v7042_v25 = vpop.f32.mrf.mxu2  ;;  %v7055_v8 = vpop.f32.mrf.mxu3  ;;  %v8202_v40 = vsel %vm16475_vm4, %v16406_v54, %v8198_v18  ;;  %v8210_v20 = vmul.f32 %v16469_v26, %v16408_v24  ;;  %v8235_v48 = vand.u32 2147483648, %v16426_v36  ;;  %7505 = vmatpush.bf16.msra.mxu2 %v11952_v13  ;;  %v11944_v54 = vor.u32 %v12861_v50, %v11943_v37  ;;  %v12825_v15 = vld [vmem:[%s18048_s3 + $0x324] sm:$0xf]  ;;  %v11969_v18 = vld [vmem:[%s18048_s3 + $0x458] sm:$0xf0] }
 0x3ac   :  { %v16489_v45 = vpop.f32.mrf.mxu0  ;;  %v16491_v29 = vpop.f32.mrf.mxu1  ;;  %v8207_v46 = vsel %vm16458_vm3, %v8206_v12, %v8202_v40  ;;  %7518 = vmatpush.bf16.msra.mxu3 %v11956_v33  ;;  %12948 = vpow2.f32 %v12098_v42  ;;  %v8221_v39 = vor.u32 1.1754944e-38, %v8220_v31  ;;  %v5899_v43 = vperm.slane %v16247_v27, 6  ;;  %v11945_v6 = vld [vmem:[%s18048_s3 + $0x440] sm:$0xf0]  ;;  %v12754_v33 = vld [vmem:[%s18048_s3 + $0xec] sm:$0xf] }
 0x3ad   :  { %v12941_v38 = vpop.eup %12940  ;;  %9064 = vst [vmem:[%s18050_s5 + $0x78] sm:$0xff] %v8207_v46  ;;  %v8211_v49 = vsub.f32 1.0, %v8210_v20  ;;  %12057 = vmatmul.msk.bf16.vlgmr.msrb.gmra.mxu0 %vm6741_vm0, %v15294_v32  ;;  %vm8215_vm7 = vweird.f32 %v16469_v26  ;;  %vm8229_vm8 = vweird.f32 %v16426_v36  ;;  %vm16524_vm9 = vcmp.eq.f32.partialorder %v8233_v47, 8.507059e+37  ;;  %v16610_v46 = vld [vmem:[%s18049_s4 + $0x18] sm:$0xff]  ;;  %v11655_v47 = vld [vmem:[%s18048_s3 + $0xe0] sm:$0xf] }
 0x3ae   :  { %v12943_v44 = vpop.eup %12942  ;;  %v16506_v22 = vadd.f32 1.0, %v12941_v38  ;;  %7479 = vmatpush.bf16.msra.mxu0 %v11944_v54  ;;  %v8236_v55 = vor.u32 1.1754944e-38, %v8235_v48  ;;  %v5900_v56 = vperm.slane %v16247_v27, 7  ;;  %vm8216_vm10 = vmor %vm8214_vm5, %vm8215_vm7  ;;  %v7041_v5 = vadd.f32 %v16402_v28, %v5899_v43  ;;  %v11665_v38 = vld [vmem:[%s18048_s3 + $0x208] sm:$0xf0] }
 0x3af   :  { %v12945_v21 = vpop.eup %12944  ;;  %v16511_v52 = vadd.f32 1.0, %v12943_v44  ;;  %v8212_v59 = vmul.f32 %v16469_v26, %v8211_v49  ;;  %12058 = vmatmul.msk.bf16.vlgmr.msrb.gmra.mxu1 %vm6741_vm0, %v15294_v32  ;;  %v11948_v42 = vor.u32 %v12825_v15, %v11945_v6  ;;  %v12789_v48 = vld [vmem:[%s18048_s3 + $0x1fc] sm:$0xf0]  ;;  %v12828_v15 = vld [vmem:[%s18048_s3 + $0x33c] sm:$0xf] }
 0x3b0   :  { %v12947_v17 = vpop.eup %12946  ;;  %v8225_v57 = vmul.f32 %v12945_v21, %v16426_v36  ;;  %12950 = vrcp.f32 %v16506_v22  ;;  %v8248_v63 = vand.u32 2147483647, %v16506_v22  ;;  %v8250_v0 = vand.u32 2147483648, %v16506_v22  ;;  %v12863_v8 = vld [vmem:[%s18048_s3 + $0x44c] sm:$0xf0] }
 0x3b1   :  { %12952 = vrcp.f32 %v16511_v52  ;;  %v8213_v62 = vadd.f32 %v16469_v26, %v8212_v59  ;;  %v16532_v1 = vadd.f32 1.0, %v12947_v17  ;;  %vm8230_vm11 = vweird.f32 %v12945_v21  ;;  %7492 = vmatpush.bf16.msra.mxu1 %v11948_v42 }
 0x3b2   :  { %v8226_v60 = vsub.f32 1.0, %v8225_v57  ;;  %v8263_v27 = vand.u32 2147483647, %v16511_v52  ;;  %v12949_v9 = vpop.eup %12948  ;;  %vm8244_vm12 = vweird.f32 %v16506_v22  ;;  %v8265_v35 = vand.u32 2147483648, %v16511_v52  ;;  %vm8231_vm14 = vmor %vm8229_vm8, %vm8230_vm11  ;;  %v11657_v57 = vld [vmem:[%s18048_s3 + $0x200] sm:$0xf0] }
 0x3b3   :  { %v16534_v2 = vpop.f32.mrf.mxu2  ;;  %v16536_v3 = vpop.f32.mrf.mxu3  ;;  %v8217_v10 = vsel %vm8216_vm10, %v16469_v26, %v8213_v62  ;;  %12954 = vrcp.f32 %v16532_v1  ;;  %vm8259_vm13 = vweird.f32 %v16511_v52  ;;  %v16553_v28 = vadd.f32 1.0, %v12949_v9  ;;  %v12790_v26 = vld [vmem:[%s18048_s3 + $0x204] sm:$0xf0]  ;;  %v11967_v9 = vld [vmem:[%s18048_s3 + $0x338] sm:$0xf] }
 0x3b4   :  { %v8227_v4 = vmul.f32 %v12945_v21, %v8226_v60  ;;  %v7068_v7 = vpop.f32.mrf.mxu0  ;;  %v7081_v58 = vpop.f32.mrf.mxu1  ;;  %v8222_v24 = vsel %vm16498_vm6, %v8221_v39, %v8217_v10  ;;  %vm16574_vm15 = vcmp.eq.f32.partialorder %v8248_v63, 8.507059e+37  ;;  %v8251_v19 = vor.u32 1.1754944e-38, %v8250_v0  ;;  %v12753_v39 = vld [vmem:[%s18048_s3 + $0xe4] sm:$0xf]  ;;  %v12864_v10 = vld [vmem:[%s18048_s3 + $0x454] sm:$0xf0] }
 0x3b5   :  { %9065 = vst [vmem:[%s18050_s5 + $0x80] sm:$0xff] %v8222_v24  ;;  %v12099_v61 = vmul.f32 -1.442695, %v7041_v5  ;;  %vm16580_vm1 = vcmp.eq.f32.partialorder %v8263_v27, 8.507059e+37  ;;  %v8278_v36 = vand.u32 2147483647, %v16532_v1  ;;  %12956 = vrcp.f32 %v16553_v28 }
 0x3b6   :  { %v16548_v14 = vpop.eup %12950  ;;  %v8228_v51 = vadd.f32 %v12945_v21, %v8227_v4  ;;  %v8266_v13 = vor.u32 1.1754944e-38, %v8265_v35  ;;  %vm8274_vm3 = vweird.f32 %v16532_v1  ;;  %v8280_v50 = vand.u32 2147483648, %v16532_v1 }
 0x3b7   :  { %v16564_v16 = vpop.eup %12952  ;;  %v8240_v12 = vmul.f32 %v16548_v14, %v16506_v22  ;;  %vm8245_vm2 = vweird.f32 %v16548_v14  ;;  %12958 = vpow2.f32 %v12099_v61  ;;  %v7054_v41 = vadd.f32 %v16404_v53, %v5900_v56  ;;  %v12791_v56 = vld [vmem:[%s18048_s3 + $0x20c] sm:$0xf0]  ;;  %v11673_v22 = vld [vmem:[%s18048_s3 + $0x210] sm:$0xf0] }
 0x3b8   :  { %v8232_v23 = vsel %vm8231_vm14, %v12945_v21, %v8228_v51  ;;  %v8255_v25 = vmul.f32 %v16564_v16, %v16511_v52  ;;  %v11664_v44 = vor.u32 %v12790_v26, %v11663_v11  ;;  %vm8260_vm4 = vweird.f32 %v16564_v16  ;;  %vm16642_vm7 = vmor %vm8244_vm12, %vm8245_vm2 }
 0x3b9   :  { %v8237_v30 = vsel %vm16524_vm9, %v8236_v55, %v8232_v23  ;;  %v8241_v31 = vsub.f32 1.0, %v8240_v12  ;;  %v16603_v40 = vpop.eup %12954  ;;  %vm16622_vm5 = vcmp.eq.f32.partialorder %v8278_v36, 8.507059e+37  ;;  %v12100_v34 = vmul.f32 -1.442695, %v7054_v41  ;;  %vm16658_vm8 = vmor %vm8259_vm13, %vm8260_vm4 }
 0x3ba   :  { %9066 = vst [vmem:[%s18050_s5 + $0x88] sm:$0xff] %v8237_v30  ;;  %v8256_v37 = vsub.f32 1.0, %v8255_v25  ;;  %v8270_v53 = vmul.f32 %v16603_v40, %v16532_v1  ;;  %vm8275_vm6 = vweird.f32 %v16603_v40  ;;  %7506 = vmatpush.bf16.msra.mxu2 %v11664_v44  ;;  %v11668_v55 = vor.u32 %v12754_v33, %v11665_v38  ;;  %v12827_v30 = vld [vmem:[%s18048_s3 + $0x334] sm:$0xf] }
 0x3bb   :  { %v8242_v20 = vmul.f32 %v16548_v14, %v8241_v31  ;;  %v7094_v21 = vpop.f32.mrf.mxu2  ;;  %v7107_v49 = vpop.f32.mrf.mxu3  ;;  %v5901_v0 = vperm.slane %v16610_v46, 0  ;;  %v5902_v4 = vperm.slane %v16610_v46, 1  ;;  %12960 = vpow2.f32 %v12100_v34  ;;  %vm16710_vm9 = vmor %vm8274_vm3, %vm8275_vm6  ;;  %v11961_v38 = vld [vmem:[%s18048_s3 + $0x450] sm:$0xf0]  ;;  %v11671_v34 = vld [vmem:[%s18048_s3 + $0xf0] sm:$0xf] }
 0x3bc   :  { %v8257_v54 = vmul.f32 %v16564_v16, %v8256_v37  ;;  %v16632_v43 = vpop.f32.mrf.mxu0  ;;  %v16634_v59 = vpop.f32.mrf.mxu1  ;;  %v8271_v63 = vsub.f32 1.0, %v8270_v53  ;;  %7519 = vmatpush.bf16.msra.mxu3 %v11668_v55  ;;  %v11656_v7 = vor.u32 %v12789_v48, %v11655_v47  ;;  %v11660_v58 = vor.u32 %v12753_v39, %v11657_v57  ;;  %v11679_v48 = vld [vmem:[%s18048_s3 + $0xf8] sm:$0xf]  ;;  %v12756_v53 = vld [vmem:[%s18048_s3 + $0xfc] sm:$0xf] }
 0x3bd   :  { %v8243_v60 = vadd.f32 %v16548_v14, %v8242_v20  ;;  %v16649_v27 = vpop.eup %12956  ;;  %12063 = vmatmul.msk.bf16.vlgmr.msra.gmra.mxu2 %vm6741_vm0, %v15294_v32  ;;  %v8295_v11 = vand.u32 2147483648, %v16553_v28  ;;  %v7067_v12 = vadd.f32 %v16489_v45, %v5901_v0  ;;  %v7080_v23 = vadd.f32 %v16491_v29, %v5902_v4  ;;  %v11959_v45 = vld [vmem:[%s18048_s3 + $0x330] sm:$0xf]  ;;  %v12792_v21 = vld [vmem:[%s18048_s3 + $0x214] sm:$0xf0] }
 0x3be   :  { %v8258_v62 = vadd.f32 %v16564_v16, %v8257_v54  ;;  %v12959_v35 = vpop.eup %12958  ;;  %v8272_v24 = vmul.f32 %v16603_v40, %v8271_v63  ;;  %v8285_v51 = vmul.f32 %v16649_v27, %v16553_v28  ;;  %7480 = vmatpush.bf16.msra.mxu0 %v11656_v7  ;;  %7493 = vmatpush.bf16.msra.mxu1 %v11660_v58  ;;  %v8281_v29 = vor.u32 1.1754944e-38, %v8280_v50  ;;  %v11983_v7 = vld [vmem:[%s18048_s3 + $0x348] sm:$0xf] }
 0x3bf   :  { %v8247_v5 = vsel %vm16642_vm7, %v16548_v14, %v8243_v60  ;;  %12064 = vmatmul.msk.bf16.vlgmr.msra.gmra.mxu3 %vm6741_vm0, %v15294_v32  ;;  %v11968_v25 = vor.u32 %v12864_v10, %v11967_v9  ;;  %vm8290_vm10 = vweird.f32 %v16649_v27  ;;  %v8293_v26 = vand.u32 2147483647, %v16553_v28  ;;  %v11681_v60 = vld [vmem:[%s18048_s3 + $0x218] sm:$0xf0]  ;;  %v12866_v10 = vld [vmem:[%s18048_s3 + $0x464] sm:$0xf0] }
 0x3c0   :  { %v8252_v52 = vsel %vm16574_vm15, %v8251_v19, %v8247_v5  ;;  %v8262_v14 = vsel %vm16658_vm8, %v16564_v16, %v8258_v62  ;;  %v16687_v16 = vadd.f32 1.0, %v12959_v35  ;;  %v8273_v19 = vadd.f32 %v16603_v40, %v8272_v24  ;;  %v12755_v62 = vld [vmem:[%s18048_s3 + $0xf4] sm:$0xf] }
 0x3c1   :  { %9067 = vst [vmem:[%s18050_s5 + $0x90] sm:$0xff] %v8252_v52  ;;  %v8267_v6 = vsel %vm16580_vm1, %v8266_v13, %v8262_v14  ;;  %v8286_v61 = vsub.f32 1.0, %v8285_v51  ;;  %v12101_v37 = vmul.f32 -1.442695, %v7067_v12  ;;  %v12102_v50 = vmul.f32 -1.442695, %v7080_v23  ;;  %12061 = vmatmul.msk.bf16.vlgmr.msra.gmra.mxu0 %vm6741_vm0, %v15294_v32  ;;  %12062 = vmatmul.msk.bf16.vlgmr.msra.gmra.mxu1 %vm6741_vm0, %v15294_v32  ;;  %v12961_v42 = vpop.eup %12960 }
 0x3c2   :  { %9068 = vst [vmem:[%s18050_s5 + $0x98] sm:$0xff] %v8267_v6  ;;  %12962 = vrcp.f32 %v16687_v16  ;;  %v8277_v33 = vsel %vm16710_vm9, %v16603_v40, %v8273_v19  ;;  %vm8289_vm11 = vweird.f32 %v16553_v28  ;;  %v8296_v44 = vor.u32 1.1754944e-38, %v8295_v11  ;;  %7557 = vmatpush.bf16.msrb.mxu2 %v11968_v25 }
 0x3c3   :  { %v16722_v31 = vpop.f32.mrf.mxu2  ;;  %v16724_v13 = vpop.f32.mrf.mxu3  ;;  %v8287_v1 = vmul.f32 %v16649_v27, %v8286_v61  ;;  %v8282_v40 = vsel %vm16622_vm5, %v8281_v29, %v8277_v33  ;;  %v11972_v47 = vor.u32 %v12828_v15, %v11969_v18  ;;  %v16750_v54 = vadd.f32 1.0, %v12961_v42  ;;  %vm8291_vm12 = vmor %vm8289_vm11, %vm8290_vm10  ;;  %v11985_v42 = vld [vmem:[%s18048_s3 + $0x468] sm:$0xf0] }
 0x3c4   :  { %v7120_v20 = vpop.f32.mrf.mxu0  ;;  %v7133_v41 = vpop.f32.mrf.mxu1  ;;  %9069 = vst [vmem:[%s18050_s5 + $0xa0] sm:$0xff] %v8282_v40  ;;  %12964 = vpow2.f32 %v12101_v37  ;;  %v5903_v28 = vperm.slane %v16610_v46, 2  ;;  %v5904_v17 = vperm.slane %v16610_v46, 3  ;;  %v11960_v39 = vor.u32 %v12863_v8, %v11959_v45 }
 0x3c5   :  { %v8288_v49 = vadd.f32 %v16649_v27, %v8287_v1  ;;  %12966 = vpow2.f32 %v12102_v50  ;;  %7570 = vmatpush.bf16.msrb.mxu3 %v11972_v47  ;;  %v11964_v57 = vor.u32 %v12827_v30, %v11961_v38  ;;  %vm8294_vm13 = vcmp.eq.f32.partialorder %v8293_v26, 8.507059e+37 }
 0x3c6   :  { %12968 = vrcp.f32 %v16750_v54  ;;  %v8308_v4 = vand.u32 2147483647, %v16687_v16  ;;  %v7093_v5 = vadd.f32 %v16534_v2, %v5903_v28  ;;  %7531 = vmatpush.bf16.msrb.mxu0 %v11960_v39  ;;  %v8310_v2 = vand.u32 2147483648, %v16687_v16 }
 0x3c7   :  { %v8292_v55 = vsel %vm8291_vm12, %v16649_v27, %v8288_v49  ;;  %v7106_v27 = vadd.f32 %v16536_v3, %v5904_v17  ;;  %7544 = vmatpush.bf16.msrb.mxu1 %v11964_v57  ;;  %v8323_v3 = vand.u32 2147483647, %v16750_v54  ;;  %v11680_v9 = vor.u32 %v12792_v21, %v11679_v48 }
 0x3c8   :  { %v16773_v63 = vpop.eup %12962  ;;  %v8297_v0 = vsel %vm8294_vm13, %v8296_v44, %v8292_v55  ;;  %v8325_v35 = vand.u32 2147483648, %v16750_v54  ;;  %v12103_v52 = vmul.f32 -1.442695, %v7093_v5  ;;  %v11684_v24 = vor.u32 %v12756_v53, %v11681_v60 }
 0x3c9   :  { %9070 = vst [vmem:[%s18050_s5 + $0xa8] sm:$0xff] %v8297_v0  ;;  %v8300_v58 = vmul.f32 %v16773_v63, %v16687_v16  ;;  %v12104_v14 = vmul.f32 -1.442695, %v7106_v27  ;;  %vm8305_vm14 = vweird.f32 %v16773_v63  ;;  %7558 = vmatpush.bf16.msrb.mxu2 %v11680_v9  ;;  %v5905_v12 = vperm.slane %v16610_v46, 4 }
 0x3ca   :  { %v12965_v6 = vpop.eup %12964  ;;  %v11672_v18 = vor.u32 %v12791_v56, %v11671_v34  ;;  %12970 = vpow2.f32 %v12103_v52  ;;  %7571 = vmatpush.bf16.msrb.mxu3 %v11684_v24  ;;  %v11676_v45 = vor.u32 %v12755_v62, %v11673_v22  ;;  %v11984_v8 = vor.u32 %v12866_v10, %v11983_v7 }
 0x3cb   :  { %v7146_v51 = vpop.f32.mrf.mxu2  ;;  %v7159_v15 = vpop.f32.mrf.mxu3  ;;  %v8301_v11 = vsub.f32 1.0, %v8300_v58  ;;  %v16801_v25 = vadd.f32 1.0, %v12965_v6  ;;  %12972 = vpow2.f32 %v12104_v14  ;;  %v7119_v30 = vadd.f32 %v16632_v43, %v5905_v12  ;;  %v12830_v43 = vld [vmem:[%s18048_s3 + $0x34c] sm:$0xf] }
 0x3cc   :  { %v16797_v19 = vpop.f32.mrf.mxu0  ;;  %v16799_v61 = vpop.f32.mrf.mxu1  ;;  %7532 = vmatpush.bf16.msrb.mxu0 %v11672_v18  ;;  %vm8304_vm15 = vweird.f32 %v16687_v16  ;;  %vm16810_vm1 = vcmp.eq.f32.partialorder %v8308_v4, 8.507059e+37  ;;  %7545 = vmatpush.bf16.msrb.mxu1 %v11676_v45  ;;  %v8311_v50 = vor.u32 1.1754944e-38, %v8310_v2  ;;  %vm8319_vm2 = vweird.f32 %v16750_v54 }
 0x3cd   :  { %v12967_v23 = vpop.eup %12966  ;;  %v8302_v29 = vmul.f32 %v16773_v63, %v8301_v11  ;;  %12974 = vrcp.f32 %v16801_v25  ;;  %7609 = vmatpush.bf16.msra.mxu2 %v11984_v8  ;;  %vm8306_vm3 = vmor %vm8304_vm15, %vm8305_vm14  ;;  %vm16827_vm4 = vcmp.eq.f32.partialorder %v8323_v3, 8.507059e+37  ;;  %v8326_v20 = vor.u32 1.1754944e-38, %v8325_v35 }
 0x3ce   :  { %v16803_v36 = vpop.eup %12968  ;;  %v16806_v26 = vadd.f32 1.0, %v12967_v23  ;;  %12067 = vmatmul.msk.bf16.vlgmr.msrb.gmra.mxu2 %vm6741_vm0, %v15294_v32  ;;  %v5906_v41 = vperm.slane %v16610_v46, 5  ;;  %v8338_v44 = vand.u32 2147483647, %v16801_v25  ;;  %v12105_v47 = vmul.f32 -1.442695, %v7119_v30 }
 0x3cf   :  { %v8315_v1 = vmul.f32 %v16803_v36, %v16750_v54  ;;  %v8303_v37 = vadd.f32 %v16773_v63, %v8302_v29  ;;  %vm8320_vm5 = vweird.f32 %v16803_v36  ;;  %12068 = vmatmul.msk.bf16.vlgmr.msrb.gmra.mxu3 %vm6741_vm0, %v15294_v32  ;;  %v8340_v28 = vand.u32 2147483648, %v16801_v25 }
 0x3d0   :  { %12976 = vrcp.f32 %v16806_v26  ;;  %v12971_v48 = vpop.eup %12970  ;;  %v8353_v53 = vand.u32 2147483647, %v16806_v26  ;;  %vm8334_vm6 = vweird.f32 %v16801_v25  ;;  %v11988_v34 = vor.u32 %v12830_v43, %v11985_v42  ;;  %vm8321_vm8 = vmor %vm8319_vm2, %vm8320_vm5  ;;  %v12829_v43 = vld [vmem:[%s18048_s3 + $0x344] sm:$0xf] }
 0x3d1   :  { %v8316_v16 = vsub.f32 1.0, %v8315_v1  ;;  %v8307_v40 = vsel %vm8306_vm3, %v16773_v63, %v8303_v37  ;;  %v12973_v57 = vpop.eup %12972  ;;  %v16853_v60 = vadd.f32 1.0, %v12971_v48  ;;  %12978 = vpow2.f32 %v12105_v47  ;;  %12065 = vmatmul.msk.bf16.vlgmr.msrb.gmra.mxu0 %vm6741_vm0, %v15294_v32  ;;  %12066 = vmatmul.msk.bf16.vlgmr.msrb.gmra.mxu1 %vm6741_vm0, %v15294_v32 }
 0x3d2   :  { %v8312_v21 = vsel %vm16810_vm1, %v8311_v50, %v8307_v40  ;;  %vm8349_vm7 = vweird.f32 %v16806_v26  ;;  %v8355_v0 = vand.u32 2147483648, %v16806_v26  ;;  %v16864_v4 = vadd.f32 1.0, %v12973_v57  ;;  %7622 = vmatpush.bf16.msra.mxu3 %v11988_v34  ;;  %v12865_v50 = vld [vmem:[%s18048_s3 + $0x45c] sm:$0xf0]  ;;  %v11695_v40 = vld [vmem:[%s18048_s3 + $0x108] sm:$0xf] }
 0x3d3   :  { %v8317_v49 = vmul.f32 %v16803_v36, %v8316_v16  ;;  %v16845_v17 = vpop.f32.mrf.mxu2  ;;  %v16847_v39 = vpop.f32.mrf.mxu3  ;;  %9071 = vst [vmem:[%s18050_s5 + $0xb0] sm:$0xff] %v8312_v21  ;;  %vm16874_vm9 = vcmp.eq.f32.partialorder %v8338_v44, 8.507059e+37  ;;  %12980 = vrcp.f32 %v16853_v60  ;;  %v7132_v7 = vadd.f32 %v16634_v59, %v5906_v41  ;;  %v11977_v16 = vld [vmem:[%s18048_s3 + $0x460] sm:$0xf0]  ;;  %v12794_v44 = vld [vmem:[%s18048_s3 + $0x224] sm:$0xf0] }
 0x3d4   :  { %v7172_v55 = vpop.f32.mrf.mxu0  ;;  %v7185_v56 = vpop.f32.mrf.mxu1  ;;  %v8341_v2 = vor.u32 1.1754944e-38, %v8340_v28  ;;  %vm16883_vm10 = vcmp.eq.f32.partialorder %v8353_v53, 8.507059e+37  ;;  %12982 = vrcp.f32 %v16864_v4  ;;  %v5907_v35 = vperm.slane %v16610_v46, 6  ;;  %v12758_v57 = vld [vmem:[%s18048_s3 + $0x10c] sm:$0xf] }
 0x3d5   :  { %v16859_v62 = vpop.eup %12974  ;;  %v8318_v63 = vadd.f32 %v16803_v36, %v8317_v49  ;;  %v8356_v52 = vor.u32 1.1754944e-38, %v8355_v0  ;;  %v8368_v14 = vand.u32 2147483647, %v16853_v60  ;;  %v5908_v24 = vperm.slane %v16610_v46, 7  ;;  %v11697_v34 = vld [vmem:[%s18048_s3 + $0x228] sm:$0xf0] }
 0x3d6   :  { %v16866_v5 = vpop.eup %12976  ;;  %v8330_v27 = vmul.f32 %v16859_v62, %v16801_v25  ;;  %vm8335_vm11 = vweird.f32 %v16859_v62  ;;  %v8370_v6 = vand.u32 2147483648, %v16853_v60  ;;  %v12106_v11 = vmul.f32 -1.442695, %v7132_v7  ;;  %v11975_v25 = vld [vmem:[%s18048_s3 + $0x340] sm:$0xf] }
 0x3d7   :  { %v8322_v58 = vsel %vm8321_vm8, %v16803_v36, %v8318_v63  ;;  %v8345_v3 = vmul.f32 %v16866_v5, %v16806_v26  ;;  %v12979_v51 = vpop.eup %12978  ;;  %vm8350_vm12 = vweird.f32 %v16866_v5  ;;  %v8383_v18 = vand.u32 2147483647, %v16864_v4  ;;  %vm16911_vm14 = vmor %vm8334_vm6, %vm8335_vm11  ;;  %v16990_v63 = vld [vmem:[%s18049_s4 + $0x20] sm:$0xff] }
 0x3d8   :  { %v8327_v9 = vsel %vm16827_vm4, %v8326_v20, %v8322_v58  ;;  %v8331_v10 = vsub.f32 1.0, %v8330_v27  ;;  %v16902_v23 = vadd.f32 1.0, %v12979_v51  ;;  %vm8364_vm13 = vweird.f32 %v16853_v60  ;;  %vm16946_vm2 = vmor %vm8349_vm7, %vm8350_vm12 }
 0x3d9   :  { %9072 = vst [vmem:[%s18050_s5 + $0xb8] sm:$0xff] %v8327_v9  ;;  %v8346_v59 = vsub.f32 1.0, %v8345_v3  ;;  %v16904_v36 = vpop.eup %12980  ;;  %12984 = vpow2.f32 %v12106_v11  ;;  %v7145_v29 = vadd.f32 %v16722_v31, %v5907_v35  ;;  %vm16918_vm15 = vcmp.eq.f32.partialorder %v8368_v14, 8.507059e+37 }
 0x3da   :  { %v8332_v15 = vmul.f32 %v16859_v62, %v8331_v10  ;;  %v8360_v1 = vmul.f32 %v16904_v36, %v16853_v60  ;;  %vm8379_vm1 = vweird.f32 %v16864_v4  ;;  %12986 = vrcp.f32 %v16902_v23  ;;  %v16937_v38 = vpop.eup %12982  ;;  %v12793_v60 = vld [vmem:[%s18048_s3 + $0x21c] sm:$0xf0] }
 0x3db   :  { %v8347_v12 = vmul.f32 %v16866_v5, %v8346_v59  ;;  %v7198_v45 = vpop.f32.mrf.mxu2  ;;  %v7211_v8 = vpop.f32.mrf.mxu3  ;;  %v7158_v31 = vadd.f32 %v16724_v13, %v5908_v24  ;;  %vm8365_vm3 = vweird.f32 %v16904_v36  ;;  %v8371_v41 = vor.u32 1.1754944e-38, %v8370_v6 }
 0x3dc   :  { %v8333_v46 = vadd.f32 %v16859_v62, %v8332_v15  ;;  %v8385_v42 = vand.u32 2147483648, %v16864_v4  ;;  %v16958_v47 = vpop.f32.mrf.mxu0  ;;  %v16960_v26 = vpop.f32.mrf.mxu1  ;;  %v8361_v49 = vsub.f32 1.0, %v8360_v1  ;;  %v8375_v28 = vmul.f32 %v16937_v38, %v16864_v4  ;;  %vm17006_vm6 = vmor %vm8364_vm13, %vm8365_vm3  ;;  %v11687_v15 = vld [vmem:[%s18048_s3 + $0x100] sm:$0xf]  ;;  %v12757_v45 = vld [vmem:[%s18048_s3 + $0x104] sm:$0xf] }
 0x3dd   :  { %v8348_v33 = vadd.f32 %v16866_v5, %v8347_v12  ;;  %vm16969_vm4 = vcmp.eq.f32.partialorder %v8383_v18, 8.507059e+37  ;;  %vm8380_vm5 = vweird.f32 %v16937_v38  ;;  %v8398_v56 = vand.u32 2147483647, %v16902_v23  ;;  %v11689_v8 = vld [vmem:[%s18048_s3 + $0x220] sm:$0xf0] }
 0x3de   :  { %v8337_v13 = vsel %vm16911_vm14, %v16859_v62, %v8333_v46  ;;  %v8400_v62 = vand.u32 2147483648, %v16902_v23  ;;  %v8362_v0 = vmul.f32 %v16904_v36, %v8361_v49  ;;  %v12107_v27 = vmul.f32 -1.442695, %v7145_v29  ;;  %vm8381_vm8 = vmor %vm8379_vm1, %vm8380_vm5  ;;  %v12868_v1 = vld [vmem:[%s18048_s3 + $0x474] sm:$0xf0] }
 0x3df   :  { %v8342_v48 = vsel %vm16874_vm9, %v8341_v2, %v8337_v13  ;;  %v8352_v21 = vsel %vm16946_vm2, %v16866_v5, %v8348_v33  ;;  %v8376_v5 = vsub.f32 1.0, %v8375_v28  ;;  %v12108_v22 = vmul.f32 -1.442695, %v7158_v31  ;;  %v12985_v7 = vpop.eup %12984  ;;  %v12001_v13 = vld [vmem:[%s18048_s3 + $0x478] sm:$0xf0] }
 0x3e0   :  { %9073 = vst [vmem:[%s18050_s5 + $0xc0] sm:$0xff] %v8342_v48  ;;  %v8357_v55 = vsel %vm16883_vm10, %v8356_v52, %v8352_v21  ;;  %v11976_v58 = vor.u32 %v12865_v50, %v11975_v25  ;;  %v11980_v2 = vor.u32 %v12829_v43, %v11977_v16  ;;  %v11696_v3 = vor.u32 %v12794_v44, %v11695_v40  ;;  %v16996_v9 = vpop.eup %12986  ;;  %v12832_v16 = vld [vmem:[%s18048_s3 + $0x35c] sm:$0xf] }
 0x3e1   :  { %9074 = vst [vmem:[%s18050_s5 + $0xc8] sm:$0xff] %v8357_v55  ;;  %v11700_v54 = vor.u32 %v12758_v57, %v11697_v34  ;;  %v8363_v10 = vadd.f32 %v16904_v36, %v8362_v0  ;;  %v8377_v35 = vmul.f32 %v16937_v38, %v8376_v5  ;;  %v17000_v59 = vadd.f32 1.0, %v12985_v7  ;;  %v11705_v55 = vld [vmem:[%s18048_s3 + $0x230] sm:$0xf0] }
 0x3e2   :  { %12988 = vpow2.f32 %v12107_v27  ;;  %v8386_v14 = vor.u32 1.1754944e-38, %v8385_v42  ;;  %v8390_v24 = vmul.f32 %v16996_v9, %v16902_v23  ;;  %7583 = vmatpush.bf16.msra.mxu0 %v11976_v58  ;;  %7596 = vmatpush.bf16.msra.mxu1 %v11980_v2  ;;  %v5909_v51 = vperm.slane %v16990_v63, 0  ;;  %v11991_v27 = vld [vmem:[%s18048_s3 + $0x350] sm:$0xf] }
 0x3e3   :  { %12990 = vpow2.f32 %v12108_v22  ;;  %v17019_v6 = vpop.f32.mrf.mxu2  ;;  %v17021_v11 = vpop.f32.mrf.mxu3  ;;  %v8367_v12 = vsel %vm17006_vm6, %v16904_v36, %v8363_v10  ;;  %v8378_v18 = vadd.f32 %v16937_v38, %v8377_v35  ;;  %vm8394_vm7 = vweird.f32 %v16902_v23  ;;  %7610 = vmatpush.bf16.msra.mxu2 %v11696_v3  ;;  %7623 = vmatpush.bf16.msra.mxu3 %v11700_v54  ;;  %v11999_v36 = vld [vmem:[%s18048_s3 + $0x358] sm:$0xf]  ;;  %v12867_v2 = vld [vmem:[%s18048_s3 + $0x46c] sm:$0xf0]  ;;  %v12831_v3 = vld [vmem:[%s18048_s3 + $0x354] sm:$0xf] }
 0x3e4   :  { %12992 = vrcp.f32 %v17000_v59  ;;  %v8372_v46 = vsel %vm16918_vm15, %v8371_v41, %v8367_v12  ;;  %v8391_v29 = vsub.f32 1.0, %v8390_v24  ;;  %vm17044_vm9 = vcmp.eq.f32.partialorder %v8398_v56, 8.507059e+37  ;;  %v7224_v31 = vpop.f32.mrf.mxu0  ;;  %v7237_v25 = vpop.f32.mrf.mxu1  ;;  %v11993_v54 = vld [vmem:[%s18048_s3 + $0x470] sm:$0xf0]  ;;  %v11711_v10 = vld [vmem:[%s18048_s3 + $0x118] sm:$0xf] }
 0x3e5   :  { %v8401_v33 = vor.u32 1.1754944e-38, %v8400_v62  ;;  %9075 = vst [vmem:[%s18050_s5 + $0xd0] sm:$0xff] %v8372_v46  ;;  %v8382_v37 = vsel %vm8381_vm8, %v16937_v38, %v8378_v18  ;;  %v7171_v4 = vadd.f32 %v16797_v19, %v5909_v51  ;;  %v5910_v50 = vperm.slane %v16990_v63, 1  ;;  %v12796_v35 = vld [vmem:[%s18048_s3 + $0x234] sm:$0xf0] }
 0x3e6   :  { %v11688_v43 = vor.u32 %v12793_v60, %v11687_v15  ;;  %v8387_v20 = vsel %vm16969_vm4, %v8386_v14, %v8382_v37  ;;  %v8392_v41 = vmul.f32 %v16996_v9, %v8391_v29  ;;  %vm8395_vm10 = vweird.f32 %v16996_v9  ;;  %12071 = vmatmul.msk.bf16.vlgmr.msra.gmra.mxu2 %vm6741_vm0, %v15294_v32  ;;  %12072 = vmatmul.msk.bf16.vlgmr.msra.gmra.mxu3 %vm6741_vm0, %v15294_v32  ;;  %v12760_v60 = vld [vmem:[%s18048_s3 + $0x11c] sm:$0xf] }
 0x3e7   :  { %v8413_v19 = vand.u32 2147483647, %v17000_v59  ;;  %9076 = vst [vmem:[%s18050_s5 + $0xd8] sm:$0xff] %v8387_v20  ;;  %v12109_v42 = vmul.f32 -1.442695, %v7171_v4  ;;  %v7184_v40 = vadd.f32 %v16799_v61, %v5910_v50  ;;  %v11692_v44 = vor.u32 %v12757_v45, %v11689_v8  ;;  %vm17086_vm11 = vmor %vm8394_vm7, %vm8395_vm10 }
 0x3e8   :  { %v12989_v38 = vpop.eup %12988  ;;  %7584 = vmatpush.bf16.msra.mxu0 %v11688_v43  ;;  %v12000_v48 = vor.u32 %v12868_v1, %v11999_v36  ;;  %v8393_v49 = vadd.f32 %v16996_v9, %v8392_v41  ;;  %v8415_v28 = vand.u32 2147483648, %v17000_v59  ;;  %v12004_v57 = vor.u32 %v12832_v16, %v12001_v13  ;;  %v11713_v12 = vld [vmem:[%s18048_s3 + $0x238] sm:$0xf0] }
 0x3e9   :  { %v12991_v21 = vpop.eup %12990  ;;  %v17078_v53 = vadd.f32 1.0, %v12989_v38  ;;  %12994 = vpow2.f32 %v12109_v42  ;;  %v12110_v56 = vmul.f32 -1.442695, %v7184_v40  ;;  %7597 = vmatpush.bf16.msra.mxu1 %v11692_v44  ;;  %v5911_v62 = vperm.slane %v16990_v63, 2  ;;  %v11703_v40 = vld [vmem:[%s18048_s3 + $0x110] sm:$0xf] }
 0x3ea   :  { %v17080_v34 = vpop.eup %12992  ;;  %v17090_v61 = vadd.f32 1.0, %v12991_v21  ;;  %7661 = vmatpush.bf16.msrb.mxu2 %v12000_v48  ;;  %v8397_v0 = vsel %vm17086_vm11, %v16996_v9, %v8393_v49  ;;  %7674 = vmatpush.bf16.msrb.mxu3 %v12004_v57  ;;  %v5912_v23 = vperm.slane %v16990_v63, 3  ;;  %vm8409_vm12 = vweird.f32 %v17000_v59  ;;  %v12795_v21 = vld [vmem:[%s18048_s3 + $0x22c] sm:$0xf0] }
 0x3eb   :  { %v8405_v5 = vmul.f32 %v17080_v34, %v17000_v59  ;;  %12996 = vrcp.f32 %v17078_v53  ;;  %12069 = vmatmul.msk.bf16.vlgmr.msra.gmra.mxu0 %vm6741_vm0, %v15294_v32  ;;  %v7250_v22 = vpop.f32.mrf.mxu2  ;;  %v7263_v7 = vpop.f32.mrf.mxu3  ;;  %v8402_v58 = vsel %vm17044_vm9, %v8401_v33, %v8397_v0  ;;  %vm17129_vm13 = vcmp.eq.f32.partialorder %v8413_v19, 8.507059e+37 }
 0x3ec   :  { %9077 = vst [vmem:[%s18050_s5 + $0xe0] sm:$0xff] %v8402_v58  ;;  %12998 = vrcp.f32 %v17090_v61  ;;  %12070 = vmatmul.msk.bf16.vlgmr.msra.gmra.mxu1 %vm6741_vm0, %v15294_v32  ;;  %v8416_v14 = vor.u32 1.1754944e-38, %v8415_v28  ;;  %vm8410_vm14 = vweird.f32 %v17080_v34  ;;  %v7197_v51 = vadd.f32 %v16845_v17, %v5911_v62  ;;  %v17162_v50 = vpop.f32.mrf.mxu0  ;;  %v17164_v43 = vpop.f32.mrf.mxu1 }
 0x3ed   :  { %v8406_v9 = vsub.f32 1.0, %v8405_v5  ;;  %13000 = vpow2.f32 %v12110_v56  ;;  %v7210_v15 = vadd.f32 %v16847_v39, %v5912_v23  ;;  %vm8424_vm15 = vweird.f32 %v17078_v53  ;;  %vm17155_vm1 = vmor %vm8409_vm12, %vm8410_vm14 }
 0x3ee   :  { %v8428_v45 = vand.u32 2147483647, %v17078_v53  ;;  %v11992_v8 = vor.u32 %v12867_v2, %v11991_v27  ;;  %v11996_v36 = vor.u32 %v12831_v3, %v11993_v54  ;;  %v11712_v46 = vor.u32 %v12796_v35, %v11711_v10 }
 0x3ef   :  { %v8407_v24 = vmul.f32 %v17080_v34, %v8406_v9  ;;  %v12995_v18 = vpop.eup %12994  ;;  %v8430_v39 = vand.u32 2147483648, %v17078_v53  ;;  %v12111_v33 = vmul.f32 -1.442695, %v7197_v51  ;;  %v12112_v25 = vmul.f32 -1.442695, %v7210_v15 }
 0x3f0   :  { %v17149_v30 = vadd.f32 1.0, %v12995_v18  ;;  %7635 = vmatpush.bf16.msrb.mxu0 %v11992_v8  ;;  %7648 = vmatpush.bf16.msrb.mxu1 %v11996_v36  ;;  %v11716_v37 = vor.u32 %v12760_v60, %v11713_v12  ;;  %v5913_v4 = vperm.slane %v16990_v63, 4  ;;  %vm8439_vm2 = vweird.f32 %v17090_v61 }
 0x3f1   :  { %v17145_v29 = vpop.eup %12996  ;;  %v8408_v17 = vadd.f32 %v17080_v34, %v8407_v24  ;;  %v8443_v13 = vand.u32 2147483647, %v17090_v61  ;;  %7662 = vmatpush.bf16.msrb.mxu2 %v11712_v46  ;;  %vm17176_vm3 = vcmp.eq.f32.partialorder %v8428_v45, 8.507059e+37  ;;  %v8445_v44 = vand.u32 2147483648, %v17090_v61 }
 0x3f2   :  { %v8420_v31 = vmul.f32 %v17145_v29, %v17078_v53  ;;  %v17166_v16 = vpop.eup %12998  ;;  %13002 = vrcp.f32 %v17149_v30  ;;  %7675 = vmatpush.bf16.msrb.mxu3 %v11716_v37  ;;  %vm8425_vm4 = vweird.f32 %v17145_v29  ;;  %v7223_v57 = vadd.f32 %v16958_v47, %v5913_v4 }
 0x3f3   :  { %v8412_v59 = vsel %vm17155_vm1, %v17080_v34, %v8408_v17  ;;  %v13001_v20 = vpop.eup %13000  ;;  %v8435_v42 = vmul.f32 %v17166_v16, %v17090_v61  ;;  %13004 = vpow2.f32 %v12111_v33  ;;  %v12759_v34 = vld [vmem:[%s18048_s3 + $0x114] sm:$0xf]  ;;  %v8431_v56 = vor.u32 1.1754944e-38, %v8430_v39  ;;  %v17216_v27 = vpop.f32.mrf.mxu2  ;;  %vm8426_vm7 = vmor %vm8424_vm15, %vm8425_vm4 }
 0x3f4   :  { %v8417_v41 = vsel %vm17129_vm13, %v8416_v14, %v8412_v59  ;;  %v8421_v19 = vsub.f32 1.0, %v8420_v31  ;;  %v17190_v48 = vadd.f32 1.0, %v13001_v20  ;;  %13006 = vpow2.f32 %v12112_v25  ;;  %v17218_v22 = vpop.f32.mrf.mxu3  ;;  %v7276_v52 = vpop.f32.mrf.mxu0 }
 0x3f5   :  { %9078 = vst [vmem:[%s18050_s5 + $0xe8] sm:$0xff] %v8417_v41  ;;  %v8436_v28 = vsub.f32 1.0, %v8435_v42  ;;  %vm17203_vm5 = vcmp.eq.f32.partialorder %v8443_v13, 8.507059e+37  ;;  %v8458_v0 = vand.u32 2147483647, %v17149_v30  ;;  %vm8440_vm6 = vweird.f32 %v17166_v16  ;;  %v7289_v14 = vpop.f32.mrf.mxu1 }
 0x3f6   :  { %v8422_v49 = vmul.f32 %v17145_v29, %v8421_v19  ;;  %13008 = vrcp.f32 %v17190_v48  ;;  %12075 = vmatmul.msk.bf16.vlgmr.msrb.gmra.mxu2 %vm6741_vm0, %v15294_v32  ;;  %12076 = vmatmul.msk.bf16.vlgmr.msrb.gmra.mxu3 %vm6741_vm0, %v15294_v32  ;;  %v12113_v23 = vmul.f32 -1.442695, %v7223_v57  ;;  %v8446_v58 = vor.u32 1.1754944e-38, %v8445_v44  ;;  %vm8441_vm9 = vmor %vm8439_vm2, %vm8440_vm6 }
 0x3f7   :  { %v8437_v5 = vmul.f32 %v17166_v16, %v8436_v28  ;;  %v5914_v2 = vperm.slane %v16990_v63, 5  ;;  %v11704_v3 = vor.u32 %v12795_v21, %v11703_v40  ;;  %v11708_v54 = vor.u32 %v12759_v34, %v11705_v55 }
 0x3f8   :  { %v8423_v47 = vadd.f32 %v17145_v29, %v8422_v49  ;;  %v13003_v7 = vpop.eup %13002  ;;  %vm8454_vm8 = vweird.f32 %v17149_v30  ;;  %v8460_v51 = vand.u32 2147483648, %v17149_v30  ;;  %13010 = vpow2.f32 %v12113_v23 }
 0x3f9   :  { %v8438_v10 = vadd.f32 %v17166_v16, %v8437_v5  ;;  %v8450_v35 = vmul.f32 %v13003_v7, %v17149_v30  ;;  %v13005_v24 = vpop.eup %13004  ;;  %v7236_v15 = vadd.f32 %v16960_v26, %v5914_v2  ;;  %7636 = vmatpush.bf16.msrb.mxu0 %v11704_v3  ;;  %7649 = vmatpush.bf16.msrb.mxu1 %v11708_v54  ;;  %vm17241_vm10 = vcmp.eq.f32.partialorder %v8458_v0, 8.507059e+37  ;;  %v17300_v0 = vld [vmem:[%s18049_s4 + $0x28] sm:$0xff] }
 0x3fa   :  { %v8427_v9 = vsel %vm8426_vm7, %v17145_v29, %v8423_v47  ;;  %v13007_v60 = vpop.eup %13006  ;;  %v17245_v61 = vadd.f32 1.0, %v13005_v24  ;;  %v8473_v36 = vand.u32 2147483647, %v17190_v48  ;;  %vm8455_vm11 = vweird.f32 %v13003_v7 }
 0x3fb   :  { %v8432_v53 = vsel %vm17176_vm3, %v8431_v56, %v8427_v9  ;;  %v8442_v12 = vsel %vm8441_vm9, %v17166_v16, %v8438_v10  ;;  %v8451_v18 = vsub.f32 1.0, %v8450_v35  ;;  %v17250_v46 = vadd.f32 1.0, %v13007_v60  ;;  %v7302_v16 = vpop.f32.mrf.mxu2 }
 0x3fc   :  { %9079 = vst [vmem:[%s18050_s5 + $0xf0] sm:$0xff] %v8432_v53  ;;  %v13009_v8 = vpop.eup %13008  ;;  %v8447_v26 = vsel %vm17203_vm5, %v8446_v58, %v8442_v12  ;;  %v12114_v29 = vmul.f32 -1.442695, %v7236_v15  ;;  %13012 = vrcp.f32 %v17245_v61  ;;  %12073 = vmatmul.msk.bf16.vlgmr.msrb.gmra.mxu0 %vm6741_vm0, %v15294_v32  ;;  %12074 = vmatmul.msk.bf16.vlgmr.msrb.gmra.mxu1 %vm6741_vm0, %v15294_v32  ;;  %v8461_v33 = vor.u32 1.1754944e-38, %v8460_v51  ;;  %v7315_v59 = vpop.f32.mrf.mxu3  ;;  %vm8456_vm0 = vmor %vm8454_vm8, %vm8455_vm11 }
 0x3fd   :  { %9080 = vst [vmem:[%s18050_s5 + $0xf8] sm:$0xff] %v8447_v26  ;;  %v8452_v17 = vmul.f32 %v13003_v7, %v8451_v18  ;;  %v8465_v39 = vmul.f32 %v13009_v8, %v17190_v48  ;;  %v8475_v1 = vand.u32 2147483648, %v17190_v48  ;;  %13014 = vrcp.f32 %v17250_v46  ;;  %v17277_v42 = vpop.f32.mrf.mxu0  ;;  %v17279_v40 = vpop.f32.mrf.mxu1 }
 0x3fe   :  { %v5915_v31 = vperm.slane %v16990_v63, 6  ;;  %vm8469_vm12 = vweird.f32 %v17190_v48  ;;  %v5916_v4 = vperm.slane %v16990_v63, 7  ;;  %v13011_v13 = vpop.eup %13010  ;;  %vm8470_vm13 = vweird.f32 %v13009_v8 }
 0x3ff   :  { %v8453_v25 = vadd.f32 %v13003_v7, %v8452_v17  ;;  %v8466_v37 = vsub.f32 1.0, %v8465_v39  ;;  %vm17269_vm14 = vcmp.eq.f32.partialorder %v8473_v36, 8.507059e+37  ;;  %v8488_v20 = vand.u32 2147483647, %v17245_v61  ;;  %vm8471_vm1 = vmor %vm8469_vm12, %vm8470_vm13 }
 0x400   :  { %13016 = vpow2.f32 %v12114_v29  ;;  %v8490_v38 = vand.u32 2147483648, %v17245_v61  ;;  %v17275_v63 = vadd.f32 1.0, %v13011_v13  ;;  %v8476_v44 = vor.u32 1.1754944e-38, %v8475_v1 }
 0x401   :  { %v8457_v41 = vsel %vm8456_vm0, %v13003_v7, %v8453_v25  ;;  %v8467_v19 = vmul.f32 %v13009_v8, %v8466_v37  ;;  %v8503_v21 = vand.u32 2147483647, %v17250_v46  ;;  %v7249_v49 = vadd.f32 %v17019_v6, %v5915_v31 }
 0x402   :  { %v8462_v30 = vsel %vm17241_vm10, %v8461_v33, %v8457_v41  ;;  %v13013_v28 = vpop.eup %13012  ;;  %vm8484_vm15 = vweird.f32 %v17245_v61  ;;  %13018 = vrcp.f32 %v17275_v63  ;;  %v7262_v34 = vadd.f32 %v17021_v11, %v5916_v4 }
 0x403   :  { %9081 = vst [vmem:[%s18050_s5 + $0x100] sm:$0xff] %v8462_v30  ;;  %v8468_v57 = vadd.f32 %v13009_v8, %v8467_v19  ;;  %v13015_v55 = vpop.eup %13014  ;;  %v8480_v56 = vmul.f32 %v13013_v28, %v17245_v61  ;;  %vm8499_vm2 = vweird.f32 %v17250_v46  ;;  %v8505_v6 = vand.u32 2147483648, %v17250_v46  ;;  %v17319_v35 = vpop.f32.mrf.mxu2 }
 0x404   :  { %v12115_v62 = vmul.f32 -1.442695, %v7249_v49  ;;  %vm17302_vm3 = vcmp.eq.f32.partialorder %v8488_v20, 8.507059e+37  ;;  %v8491_v5 = vor.u32 1.1754944e-38, %v8490_v38  ;;  %v8495_v48 = vmul.f32 %v13015_v55, %v17250_v46  ;;  %v17324_v60 = vpop.f32.mrf.mxu3 }
 0x405   :  { %v8472_v47 = vsel %vm8471_vm1, %v13009_v8, %v8468_v57  ;;  %v8481_v58 = vsub.f32 1.0, %v8480_v56  ;;  %vm17309_vm4 = vcmp.eq.f32.partialorder %v8503_v21, 8.507059e+37  ;;  %v12116_v9 = vmul.f32 -1.442695, %v7262_v34  ;;  %v7328_v12 = vpop.f32.mrf.mxu0  ;;  %v7341_v36 = vpop.f32.mrf.mxu1 }
 0x406   :  { %v13017_v23 = vpop.eup %13016  ;;  %v8477_v7 = vsel %vm17269_vm14, %v8476_v44, %v8472_v47  ;;  %13020 = vpow2.f32 %v12115_v62  ;;  %v8496_v3 = vsub.f32 1.0, %v8495_v48  ;;  %v5917_v10 = vperm.slane %v17300_v0, 0 }
 0x407   :  { %9082 = vst [vmem:[%s18050_s5 + $0x108] sm:$0xff] %v8477_v7  ;;  %v17316_v54 = vadd.f32 1.0, %v13017_v23  ;;  %v8482_v52 = vmul.f32 %v13013_v28, %v8481_v58  ;;  %vm8485_vm5 = vweird.f32 %v13013_v28  ;;  %v8506_v14 = vor.u32 1.1754944e-38, %v8505_v6 }
 0x408   :  { %v5918_v24 = vperm.slane %v17300_v0, 1  ;;  %v13019_v53 = vpop.eup %13018  ;;  %v8497_v51 = vmul.f32 %v13015_v55, %v8496_v3  ;;  %vm8500_vm6 = vweird.f32 %v13015_v55  ;;  %v8518_v15 = vand.u32 2147483647, %v17275_v63  ;;  %vm8486_vm7 = vmor %vm8484_vm15, %vm8485_vm5 }
 0x409   :  { %13022 = vrcp.f32 %v17316_v54  ;;  %v8483_v18 = vadd.f32 %v13013_v28, %v8482_v52  ;;  %v8510_v45 = vmul.f32 %v13019_v53, %v17275_v63  ;;  %v8520_v8 = vand.u32 2147483648, %v17275_v63  ;;  %vm8501_vm8 = vmor %vm8499_vm2, %vm8500_vm6 }
 0x40a   :  { %v5919_v26 = vperm.slane %v17300_v0, 2  ;;  %v8498_v29 = vadd.f32 %v13015_v55, %v8497_v51  ;;  %13024 = vpow2.f32 %v12116_v9  ;;  %v7275_v17 = vadd.f32 %v17162_v50, %v5917_v10 }
 0x40b   :  { %v5920_v39 = vperm.slane %v17300_v0, 3  ;;  %v8487_v1 = vsel %vm8486_vm7, %v13013_v28, %v8483_v18  ;;  %v8511_v31 = vsub.f32 1.0, %v8510_v45  ;;  %vm8515_vm9 = vweird.f32 %v13019_v53  ;;  %v7354_v41 = vpop.f32.mrf.mxu2 }
 0x40c   :  { %v13021_v33 = vpop.eup %13020  ;;  %v7288_v25 = vadd.f32 %v17164_v43, %v5918_v24  ;;  %v8492_v61 = vsel %vm17302_vm3, %v8491_v5, %v8487_v1  ;;  %v8502_v37 = vsel %vm8501_vm8, %v13015_v55, %v8498_v29  ;;  %v12117_v16 = vmul.f32 -1.442695, %v7275_v17  ;;  %v7367_v21 = vpop.f32.mrf.mxu3 }
 0x40d   :  { %v17340_v4 = vadd.f32 1.0, %v13021_v33  ;;  %9083 = vst [vmem:[%s18050_s5 + $0x110] sm:$0xff] %v8492_v61  ;;  %v8507_v50 = vsel %vm17309_vm4, %v8506_v14, %v8502_v37  ;;  %v8512_v46 = vmul.f32 %v13019_v53, %v8511_v31  ;;  %v7301_v13 = vadd.f32 %v17216_v27, %v5919_v26 }
 0x40e   :  { %v12118_v59 = vmul.f32 -1.442695, %v7288_v25  ;;  %9084 = vst [vmem:[%s18050_s5 + $0x118] sm:$0xff] %v8507_v50  ;;  %vm8514_vm10 = vweird.f32 %v17275_v63  ;;  %vm17352_vm11 = vcmp.eq.f32.partialorder %v8518_v15, 8.507059e+37  ;;  %v8521_v20 = vor.u32 1.1754944e-38, %v8520_v8 }
 0x40f   :  { %v13023_v32 = vpop.eup %13022  ;;  %13026 = vrcp.f32 %v17340_v4  ;;  %v8513_v19 = vadd.f32 %v13019_v53, %v8512_v46  ;;  %vm8529_vm12 = vweird.f32 %v17316_v54  ;;  %vm8516_vm0 = vmor %vm8514_vm10, %vm8515_vm9  ;;  %v8533_v30 = vand.u32 2147483647, %v17316_v54 }
 0x410   :  { %v8525_v38 = vmul.f32 %v13023_v32, %v17316_v54  ;;  %13028 = vpow2.f32 %v12117_v16  ;;  %v13025_v27 = vpop.eup %13024  ;;  %v8535_v63 = vand.u32 2147483648, %v17316_v54  ;;  %v12119_v44 = vmul.f32 -1.442695, %v7301_v13 }
 0x411   :  { %13030 = vpow2.f32 %v12118_v59  ;;  %v8517_v49 = vsel %vm8516_vm0, %v13019_v53, %v8513_v19  ;;  %v17362_v57 = vadd.f32 1.0, %v13025_v27  ;;  %v7314_v34 = vadd.f32 %v17218_v22, %v5920_v39 }
 0x412   :  { %v8526_v28 = vsub.f32 1.0, %v8525_v38  ;;  %v8522_v55 = vsel %vm17352_vm11, %v8521_v20, %v8517_v49  ;;  %v8548_v56 = vand.u32 2147483647, %v17340_v4  ;;  %13032 = vpow2.f32 %v12119_v44 }
 0x413   :  { %v5921_v6 = vperm.slane %v17300_v0, 4  ;;  %9085 = vst [vmem:[%s18050_s5 + $0x120] sm:$0xff] %v8522_v55  ;;  %vm8530_vm13 = vweird.f32 %v13023_v32  ;;  %13034 = vrcp.f32 %v17362_v57  ;;  %v5922_v47 = vperm.slane %v17300_v0, 5 }
 0x414   :  { %v8527_v62 = vmul.f32 %v13023_v32, %v8526_v28  ;;  %vm17374_vm14 = vcmp.eq.f32.partialorder %v8533_v30, 8.507059e+37  ;;  %v8536_v5 = vor.u32 1.1754944e-38, %v8535_v63  ;;  %v12120_v48 = vmul.f32 -1.442695, %v7314_v34  ;;  %vm8531_vm1 = vmor %vm8529_vm12, %vm8530_vm13 }
 0x415   :  { %v13027_v11 = vpop.eup %13026  ;;  %v7327_v23 = vadd.f32 %v17277_v42, %v5921_v6  ;;  %vm8544_vm15 = vweird.f32 %v17340_v4  ;;  %v8550_v3 = vand.u32 2147483648, %v17340_v4  ;;  %vm17384_vm2 = vcmp.eq.f32.partialorder %v8548_v56, 8.507059e+37 }
 0x416   :  { %v13029_v7 = vpop.eup %13028  ;;  %v8528_v58 = vadd.f32 %v13023_v32, %v8527_v62  ;;  %v8540_v2 = vmul.f32 %v13027_v11, %v17340_v4  ;;  %v8563_v52 = vand.u32 2147483647, %v17362_v57  ;;  %13036 = vpow2.f32 %v12120_v48  ;;  %v17394_v15 = vpop.f32.mrf.mxu0 }
 0x417   :  { %v13031_v9 = vpop.eup %13030  ;;  %v17389_v14 = vadd.f32 1.0, %v13029_v7  ;;  %v7340_v51 = vadd.f32 %v17279_v40, %v5922_v47  ;;  %v8565_v18 = vand.u32 2147483648, %v17362_v57  ;;  %v12121_v45 = vmul.f32 -1.442695, %v7327_v23  ;;  %v17418_v37 = vpop.f32.mrf.mxu3 }
 0x418   :  { %v8532_v42 = vsel %vm8531_vm1, %v13023_v32, %v8528_v58  ;;  %v8541_v24 = vsub.f32 1.0, %v8540_v2  ;;  %v17391_v53 = vadd.f32 1.0, %v13031_v9  ;;  %v13033_v12 = vpop.eup %13032  ;;  %vm8545_vm3 = vweird.f32 %v13027_v11 }
 0x419   :  { %v8537_v54 = vsel %vm17374_vm14, %v8536_v5, %v8532_v42  ;;  %13038 = vrcp.f32 %v17389_v14  ;;  %v13035_v8 = vpop.eup %13034  ;;  %v8551_v36 = vor.u32 1.1754944e-38, %v8550_v3  ;;  %vm8559_vm4 = vweird.f32 %v17362_v57  ;;  %vm8546_vm6 = vmor %vm8544_vm15, %vm8545_vm3 }
 0x41a   :  { %9086 = vst [vmem:[%s18050_s5 + $0x128] sm:$0xff] %v8537_v54  ;;  %v8542_v26 = vmul.f32 %v13027_v11, %v8541_v24  ;;  %13040 = vrcp.f32 %v17391_v53  ;;  %v8555_v40 = vmul.f32 %v13035_v8, %v17362_v57  ;;  %vm17406_vm5 = vcmp.eq.f32.partialorder %v8563_v52, 8.507059e+37  ;;  %v17411_v39 = vpop.f32.mrf.mxu2 }
 0x41b   :  { %v8580_v17 = vand.u32 2147483648, %v17389_v14  ;;  %v8578_v1 = vand.u32 2147483647, %v17389_v14  ;;  %v17414_v31 = vadd.f32 1.0, %v13033_v12  ;;  %v12122_v25 = vmul.f32 -1.442695, %v7340_v51 }
 0x41c   :  { %v8543_v33 = vadd.f32 %v13027_v11, %v8542_v26  ;;  %v17416_v61 = vpop.f32.mrf.mxu1  ;;  %v13037_v16 = vpop.eup %13036  ;;  %v8556_v50 = vsub.f32 1.0, %v8555_v40  ;;  %v8566_v46 = vor.u32 1.1754944e-38, %v8565_v18  ;;  %v8593_v59 = vand.u32 2147483647, %v17391_v53 }
 0x41d   :  { %13042 = vpow2.f32 %v12121_v45  ;;  %vm8574_vm7 = vweird.f32 %v17389_v14  ;;  %v8595_v32 = vand.u32 2147483648, %v17391_v53  ;;  %vm8560_vm8 = vweird.f32 %v13035_v8 }
 0x41e   :  { %v8547_v13 = vsel %vm8546_vm6, %v13027_v11, %v8543_v33  ;;  %13044 = vrcp.f32 %v17414_v31  ;;  %v8557_v41 = vmul.f32 %v13035_v8, %v8556_v50  ;;  %v8581_v4 = vor.u32 1.1754944e-38, %v8580_v17  ;;  %v7380_v44 = vpop.f32.mrf.mxu0  ;;  %vm8561_vm12 = vmor %vm8559_vm4, %vm8560_vm8 }
 0x41f   :  { %v13039_v43 = vpop.eup %13038  ;;  %v8552_v20 = vsel %vm17384_vm2, %v8551_v36, %v8547_v13  ;;  %vm8589_vm9 = vweird.f32 %v17391_v53  ;;  %vm17434_vm10 = vcmp.eq.f32.partialorder %v8578_v1, 8.507059e+37  ;;  %v17438_v30 = vadd.f32 1.0, %v13037_v16  ;;  %v7419_v2 = vpop.f32.mrf.mxu3 }
 0x420   :  { %v13041_v19 = vpop.eup %13040  ;;  %9087 = vst [vmem:[%s18050_s5 + $0x130] sm:$0xff] %v8552_v20  ;;  %v8570_v38 = vmul.f32 %v13039_v43, %v17389_v14  ;;  %13046 = vpow2.f32 %v12122_v25  ;;  %v5923_v63 = vperm.slane %v17300_v0, 6  ;;  %v8558_v21 = vadd.f32 %v13035_v8, %v8557_v41 }
 0x421   :  { %v8585_v49 = vmul.f32 %v13041_v19, %v17391_v53  ;;  %vm17442_vm11 = vcmp.eq.f32.partialorder %v8593_v59, 8.507059e+37  ;;  %v8608_v34 = vand.u32 2147483647, %v17414_v31  ;;  %v8596_v56 = vor.u32 1.1754944e-38, %v8595_v32 }
 0x422   :  { %v8571_v55 = vsub.f32 1.0, %v8570_v38  ;;  %v8610_v6 = vand.u32 2147483648, %v17414_v31  ;;  %13048 = vrcp.f32 %v17438_v30  ;;  %v8562_v47 = vsel %vm8561_vm12, %v13035_v8, %v8558_v21  ;;  %v7406_v22 = vpop.f32.mrf.mxu2 }
 0x423   :  { %v13043_v62 = vpop.eup %13042  ;;  %vm8575_vm0 = vweird.f32 %v13039_v43  ;;  %v8586_v11 = vsub.f32 1.0, %v8585_v49  ;;  %vm8604_vm13 = vweird.f32 %v17414_v31  ;;  %v8567_v48 = vsel %vm17406_vm5, %v8566_v46, %v8562_v47 }
 0x424   :  { %v13045_v5 = vpop.eup %13044  ;;  %v8572_v23 = vmul.f32 %v13039_v43, %v8571_v55  ;;  %v17455_v57 = vadd.f32 1.0, %v13043_v62  ;;  %v7353_v7 = vadd.f32 %v17319_v35, %v5923_v63  ;;  %v7393_v58 = vpop.f32.mrf.mxu1  ;;  %9088 = vst [vmem:[%s18050_s5 + $0x138] sm:$0xff] %v8567_v48  ;;  %vm8590_vm14 = vweird.f32 %v13041_v19  ;;  %vm8576_vm1 = vmor %vm8574_vm7, %vm8575_vm0 }
 0x425   :  { %v8587_v3 = vmul.f32 %v13041_v19, %v8586_v11  ;;  %v8600_v9 = vmul.f32 %v13045_v5, %v17414_v31  ;;  %vm17462_vm15 = vcmp.eq.f32.partialorder %v8608_v34, 8.507059e+37  ;;  %v8611_v24 = vor.u32 1.1754944e-38, %v8610_v6  ;;  %vm8591_vm3 = vmor %vm8589_vm9, %vm8590_vm14 }
 0x426   :  { %v13047_v52 = vpop.eup %13046  ;;  %v8573_v42 = vadd.f32 %v13039_v43, %v8572_v23  ;;  %v8623_v51 = vand.u32 2147483647, %v17438_v30  ;;  %13050 = vrcp.f32 %v17455_v57  ;;  %vm8605_vm2 = vweird.f32 %v13045_v5 }
 0x427   :  { %v8588_v35 = vadd.f32 %v13041_v19, %v8587_v3  ;;  %v8601_v12 = vsub.f32 1.0, %v8600_v9  ;;  %v8625_v54 = vand.u32 2147483648, %v17438_v30  ;;  %v17475_v8 = vadd.f32 1.0, %v13047_v52  ;;  %vm8606_vm6 = vmor %vm8604_vm13, %vm8605_vm2 }
 0x428   :  { %v13049_v18 = vpop.eup %13048  ;;  %v8577_v45 = vsel %vm8576_vm1, %v13039_v43, %v8573_v42  ;;  %v12123_v26 = vmul.f32 -1.442695, %v7353_v7  ;;  %v5924_v36 = vperm.slane %v17300_v0, 7  ;;  %vm8619_vm4 = vweird.f32 %v17438_v30  ;;  %v17507_v43 = vld [vmem:[%s18049_s4 + $0x30] sm:$0xff] }
 0x429   :  { %v8582_v14 = vsel %vm17434_vm10, %v8581_v4, %v8577_v45  ;;  %v8592_v40 = vsel %vm8591_vm3, %v13041_v19, %v8588_v35  ;;  %v8602_v29 = vmul.f32 %v13045_v5, %v8601_v12  ;;  %v8615_v17 = vmul.f32 %v13049_v18, %v17438_v30  ;;  %v17512_v19 = vpop.f32.mrf.mxu3 }
 0x42a   :  { %9089 = vst [vmem:[%s18050_s5 + $0x140] sm:$0xff] %v8582_v14  ;;  %v8597_v53 = vsel %vm17442_vm11, %v8596_v56, %v8592_v40  ;;  %vm17487_vm5 = vcmp.eq.f32.partialorder %v8623_v51, 8.507059e+37  ;;  %v8638_v0 = vand.u32 2147483647, %v17455_v57  ;;  %v8626_v16 = vor.u32 1.1754944e-38, %v8625_v54  ;;  %v7430_v50 = vpop.f32.mrf.mxu0  ;;  %v17496_v46 = vpop.f32.mrf.mxu2 }
 0x42b   :  { %9090 = vst [vmem:[%s18050_s5 + $0x148] sm:$0xff] %v8597_v53  ;;  %v8603_v1 = vadd.f32 %v13045_v5, %v8602_v29  ;;  %v8616_v25 = vsub.f32 1.0, %v8615_v17  ;;  %13052 = vrcp.f32 %v17475_v8  ;;  %vm8634_vm7 = vweird.f32 %v17455_v57 }
 0x42c   :  { %v13051_v59 = vpop.eup %13050  ;;  %v8640_v13 = vand.u32 2147483648, %v17455_v57  ;;  %13054 = vpow2.f32 %v12123_v26  ;;  %v7366_v32 = vadd.f32 %v17324_v60, %v5924_v36  ;;  %v17509_v20 = vpop.f32.mrf.mxu1  ;;  %vm8620_vm8 = vweird.f32 %v13049_v18 }
 0x42d   :  { %v8607_v41 = vsel %vm8606_vm6, %v13045_v5, %v8603_v1  ;;  %v8617_v4 = vmul.f32 %v13049_v18, %v8616_v25  ;;  %v8630_v31 = vmul.f32 %v13051_v59, %v17455_v57  ;;  %vm8635_vm9 = vweird.f32 %v13051_v59  ;;  %vm8621_vm11 = vmor %vm8619_vm4, %vm8620_vm8 }
 0x42e   :  { %v8612_v38 = vsel %vm17462_vm15, %v8611_v24, %v8607_v41  ;;  %vm17516_vm10 = vcmp.eq.f32.partialorder %v8638_v0, 8.507059e+37  ;;  %v12124_v27 = vmul.f32 -1.442695, %v7366_v32  ;;  %v5925_v21 = vperm.slane %v17507_v43, 0  ;;  %vm8636_vm12 = vmor %vm8634_vm7, %vm8635_vm9 }
 0x42f   :  { %9091 = vst [vmem:[%s18050_s5 + $0x150] sm:$0xff] %v8612_v38  ;;  %v8618_v63 = vadd.f32 %v13049_v18, %v8617_v4  ;;  %v8631_v44 = vsub.f32 1.0, %v8630_v31  ;;  %v5926_v49 = vperm.slane %v17507_v43, 1  ;;  %v5927_v28 = vperm.slane %v17507_v43, 2 }
 0x430   :  { %13056 = vpow2.f32 %v12124_v27  ;;  %v5928_v34 = vperm.slane %v17507_v43, 3  ;;  %v5929_v55 = vperm.slane %v17507_v43, 4  ;;  %v7379_v47 = vadd.f32 %v17394_v15, %v5925_v21 }
 0x431   :  { %v13053_v56 = vpop.eup %13052  ;;  %v8622_v6 = vsel %vm8621_vm11, %v13049_v18, %v8618_v63  ;;  %v8632_v62 = vmul.f32 %v13051_v59, %v8631_v44  ;;  %v7392_v11 = vadd.f32 %v17416_v61, %v5926_v49  ;;  %v8641_v30 = vor.u32 1.1754944e-38, %v8640_v13  ;;  %v7471_v12 = vpop.f32.mrf.mxu3 }
 0x432   :  { %v13055_v22 = vpop.eup %13054  ;;  %v8627_v5 = vsel %vm17487_vm5, %v8626_v16, %v8622_v6  ;;  %v8645_v48 = vmul.f32 %v13053_v56, %v17475_v8  ;;  %v7405_v23 = vadd.f32 %v17411_v39, %v5927_v28  ;;  %v12125_v2 = vmul.f32 -1.442695, %v7379_v47  ;;  %v7432_v3 = vpop.f32.mrf.mxu0 }
 0x433   :  { %9092 = vst [vmem:[%s18050_s5 + $0x158] sm:$0xff] %v8627_v5  ;;  %v8633_v7 = vadd.f32 %v13051_v59, %v8632_v62  ;;  %v17539_v58 = vadd.f32 1.0, %v13055_v22  ;;  %v12126_v15 = vmul.f32 -1.442695, %v7392_v11  ;;  %v7458_v61 = vpop.f32.mrf.mxu2  ;;  %v7418_v52 = vadd.f32 %v17418_v37, %v5928_v34 }
 0x434   :  { %v8646_v9 = vsub.f32 1.0, %v8645_v48  ;;  %v12127_v10 = vmul.f32 -1.442695, %v7405_v23  ;;  %v7431_v39 = vadd.f32 %v7430_v50, %v5929_v55  ;;  %v7445_v42 = vpop.f32.mrf.mxu1  ;;  %v8653_v51 = vand.u32 2147483647, %v17475_v8 }
 0x435   :  { %v8637_v24 = vsel %vm8636_vm12, %v13051_v59, %v8633_v7  ;;  %v8655_v35 = vand.u32 2147483648, %v17475_v8  ;;  %13058 = vrcp.f32 %v17539_v58  ;;  %vm8650_vm0 = vweird.f32 %v13053_v56 }
 0x436   :  { %v13057_v54 = vpop.eup %13056  ;;  %v8642_v18 = vsel %vm17516_vm10, %v8641_v30, %v8637_v24  ;;  %v8647_v57 = vmul.f32 %v13053_v56, %v8646_v9  ;;  %13060 = vpow2.f32 %v12125_v2  ;;  %v12128_v45 = vmul.f32 -1.442695, %v7418_v52 }
 0x437   :  { %9093 = vst [vmem:[%s18050_s5 + $0x160] sm:$0xff] %v8642_v18  ;;  %v17553_v37 = vadd.f32 1.0, %v13057_v54  ;;  %13062 = vpow2.f32 %v12126_v15  ;;  %vm8649_vm13 = vweird.f32 %v17475_v8  ;;  %v12129_v36 = vmul.f32 -1.442695, %v7431_v39 }
 0x438   :  { %v8648_v26 = vadd.f32 %v13053_v56, %v8647_v57  ;;  %13064 = vpow2.f32 %v12127_v10  ;;  %vm8651_vm14 = vmor %vm8649_vm13, %vm8650_vm0  ;;  %vm8654_vm15 = vcmp.eq.f32.partialorder %v8653_v51, 8.507059e+37  ;;  %v8656_v14 = vor.u32 1.1754944e-38, %v8655_v35 }
 0x439   :  { %v8668_v40 = vand.u32 2147483647, %v17539_v58  ;;  %13066 = vrcp.f32 %v17553_v37  ;;  %v8670_v17 = vand.u32 2147483648, %v17539_v58  ;;  %v5930_v53 = vperm.slane %v17507_v43, 5 }
 0x43a   :  { %v8652_v29 = vsel %vm8651_vm14, %v13053_v56, %v8648_v26  ;;  %13068 = vpow2.f32 %v12128_v45  ;;  %v8683_v1 = vand.u32 2147483647, %v17553_v37  ;;  %v8685_v8 = vand.u32 2147483648, %v17553_v37 }
 0x43b   :  { %v13059_v33 = vpop.eup %13058  ;;  %v8657_v0 = vsel %vm8654_vm15, %v8656_v14, %v8652_v29  ;;  %13070 = vpow2.f32 %v12129_v36  ;;  %v7444_v50 = vadd.f32 %v17509_v20, %v5930_v53  ;;  %v5931_v59 = vperm.slane %v17507_v43, 6  ;;  %v17581_v20 = vld [vmem:[%s18049_s4 + $0x38] sm:$0xff] }
 0x43c   :  { %v13061_v25 = vpop.eup %13060  ;;  %9094 = vst [vmem:[%s18050_s5 + $0x168] sm:$0xff] %v8657_v0  ;;  %v8660_v16 = vmul.f32 %v13059_v33, %v17539_v58  ;;  %vm8664_vm1 = vweird.f32 %v17539_v58  ;;  %vm17569_vm2 = vcmp.eq.f32.partialorder %v8668_v40, 8.507059e+37  ;;  %v8671_v38 = vor.u32 1.1754944e-38, %v8670_v17 }
 0x43d   :  { %v13063_v13 = vpop.eup %13062  ;;  %v17573_v41 = vadd.f32 1.0, %v13061_v25  ;;  %vm8679_vm3 = vweird.f32 %v17553_v37  ;;  %vm8665_vm4 = vweird.f32 %v13059_v33  ;;  %v8686_v63 = vor.u32 1.1754944e-38, %v8685_v8 }
 0x43e   :  { %v13065_v4 = vpop.eup %13064  ;;  %v8661_v31 = vsub.f32 1.0, %v8660_v16  ;;  %v17576_v60 = vadd.f32 1.0, %v13063_v13  ;;  %v12130_v44 = vmul.f32 -1.442695, %v7444_v50  ;;  %v17584_v21 = vpop.f32.mrf.mxu0  ;;  %vm17589_vm5 = vcmp.eq.f32.partialorder %v8683_v1, 8.507059e+37  ;;  %vm8666_vm6 = vmor %vm8664_vm1, %vm8665_vm4 }
 0x43f   :  { %v13067_v27 = vpop.eup %13066  ;;  %13072 = vrcp.f32 %v17573_v41  ;;  %v17586_v49 = vpop.f32.mrf.mxu1  ;;  %v7457_v6 = vadd.f32 %v17496_v46, %v5931_v59  ;;  %v8698_v62 = vand.u32 2147483647, %v17573_v41  ;;  %v5932_v47 = vperm.slane %v17507_v43, 7 }
 0x440   :  { %v13069_v28 = vpop.eup %13068  ;;  %v8662_v34 = vmul.f32 %v13059_v33, %v8661_v31  ;;  %v8675_v55 = vmul.f32 %v13067_v27, %v17553_v37  ;;  %13074 = vrcp.f32 %v17576_v60  ;;  %v5933_v11 = vperm.slane %v17581_v20, 0  ;;  %v17599_v5 = vpop.f32.mrf.mxu2 }
 0x441   :  { %v5934_v22 = vperm.slane %v17581_v20, 1  ;;  %v13071_v30 = vpop.eup %13070  ;;  %v8700_v7 = vand.u32 2147483648, %v17573_v41  ;;  %v17602_v2 = vadd.f32 1.0, %v13065_v4  ;;  %vm8680_vm7 = vweird.f32 %v13067_v27 }
 0x442   :  { %v8663_v48 = vadd.f32 %v13059_v33, %v8662_v34  ;;  %v8676_v23 = vsub.f32 1.0, %v8675_v55  ;;  %v8713_v46 = vand.u32 2147483647, %v17576_v60  ;;  %v17608_v15 = vadd.f32 1.0, %v13069_v28  ;;  %v17610_v3 = vpop.f32.mrf.mxu3  ;;  %vm8681_vm10 = vmor %vm8679_vm3, %vm8680_vm7 }
 0x443   :  { %13076 = vpow2.f32 %v12130_v44  ;;  %v8715_v10 = vand.u32 2147483648, %v17576_v60  ;;  %vm8694_vm8 = vweird.f32 %v17573_v41  ;;  %v17617_v58 = vadd.f32 1.0, %v13071_v30 }
 0x444   :  { %v8667_v61 = vsel %vm8666_vm6, %v13059_v33, %v8663_v48  ;;  %v8677_v9 = vmul.f32 %v13067_v27, %v8676_v23  ;;  %13078 = vrcp.f32 %v17602_v2  ;;  %v17619_v42 = vmul.f32 -1.442695, %v7457_v6 }
 0x445   :  { %v13073_v52 = vpop.eup %13072  ;;  %v8672_v39 = vsel %vm17569_vm2, %v8671_v38, %v8667_v61  ;;  %vm17627_vm9 = vcmp.eq.f32.partialorder %v8698_v62, 8.507059e+37  ;;  %v8701_v54 = vor.u32 1.1754944e-38, %v8700_v7  ;;  %13080 = vrcp.f32 %v17608_v15 }
 0x446   :  { %v17621_v24 = vpop.eup %13074  ;;  %9095 = vst [vmem:[%s18050_s5 + $0x170] sm:$0xff] %v8672_v39  ;;  %v8678_v51 = vadd.f32 %v13067_v27, %v8677_v9  ;;  %v8690_v35 = vmul.f32 %v13073_v52, %v17573_v41  ;;  %vm8709_vm11 = vweird.f32 %v17576_v60  ;;  %v8728_v57 = vand.u32 2147483647, %v17602_v2  ;;  %v7484_v26 = vpop.f32.mrf.mxu0 }
 0x447   :  { %v8705_v18 = vmul.f32 %v17621_v24, %v17576_v60  ;;  %v8730_v45 = vand.u32 2147483648, %v17602_v2  ;;  %v7497_v36 = vpop.f32.mrf.mxu1  ;;  %vm17640_vm12 = vcmp.eq.f32.partialorder %v8713_v46, 8.507059e+37  ;;  %v8716_v17 = vor.u32 1.1754944e-38, %v8715_v10 }
 0x448   :  { %v8682_v14 = vsel %vm8681_vm10, %v13067_v27, %v8678_v51  ;;  %v8691_v40 = vsub.f32 1.0, %v8690_v35  ;;  %vm8724_vm0 = vweird.f32 %v17602_v2  ;;  %v8743_v0 = vand.u32 2147483647, %v17608_v15  ;;  %v7510_v1 = vpop.f32.mrf.mxu2 }
 0x449   :  { %v13077_v37 = vpop.eup %13076  ;;  %v8687_v53 = vsel %vm17589_vm5, %v8686_v63, %v8682_v14  ;;  %v8706_v33 = vsub.f32 1.0, %v8705_v18  ;;  %13082 = vrcp.f32 %v17617_v58  ;;  %vm8695_vm13 = vweird.f32 %v13073_v52 }
 0x44a   :  { %v13079_v8 = vpop.eup %13078  ;;  %9096 = vst [vmem:[%s18050_s5 + $0x178] sm:$0xff] %v8687_v53  ;;  %v8692_v25 = vmul.f32 %v13073_v52, %v8691_v40  ;;  %vm8710_vm14 = vweird.f32 %v17621_v24  ;;  %v8745_v16 = vand.u32 2147483648, %v17608_v15  ;;  %vm17656_vm15 = vcmp.eq.f32.partialorder %v8728_v57, 8.507059e+37  ;;  %v7523_v4 = vpop.f32.mrf.mxu3  ;;  %vm8696_vm2 = vmor %vm8694_vm8, %vm8695_vm13 }
 0x44b   :  { %v8707_v50 = vmul.f32 %v17621_v24, %v8706_v33  ;;  %v8720_v59 = vmul.f32 %v13079_v8, %v17602_v2  ;;  %v8731_v32 = vor.u32 1.1754944e-38, %v8730_v45  ;;  %v13081_v31 = vpop.eup %13080  ;;  %vm8739_vm1 = vweird.f32 %v17608_v15  ;;  %vm8711_vm4 = vmor %vm8709_vm11, %vm8710_vm14 }
 0x44c   :  { %v8693_v38 = vadd.f32 %v13073_v52, %v8692_v25  ;;  %v8758_v27 = vand.u32 2147483647, %v17617_v58  ;;  %v17662_v63 = vadd.f32 1.0, %v13077_v37  ;;  %v8735_v34 = vmul.f32 %v13081_v31, %v17608_v15 }
 0x44d   :  { %v8708_v44 = vadd.f32 %v17621_v24, %v8707_v50  ;;  %v8721_v28 = vsub.f32 1.0, %v8720_v59  ;;  %vm17668_vm3 = vcmp.eq.f32.partialorder %v8743_v0, 8.507059e+37  ;;  %v8760_v56 = vand.u32 2147483648, %v17617_v58 }
 0x44e   :  { %v8697_v6 = vsel %vm8696_vm2, %v13073_v52, %v8693_v38  ;;  %vm8725_vm5 = vweird.f32 %v13079_v8  ;;  %v8746_v41 = vor.u32 1.1754944e-38, %v8745_v16  ;;  %vm8754_vm6 = vweird.f32 %v17617_v58  ;;  %v7534_v46 = vpop.f32.mrf.mxu0 }
 0x44f   :  { %13084 = vrcp.f32 %v17662_v63  ;;  %v13083_v62 = vpop.eup %13082  ;;  %v8702_v30 = vsel %vm17627_vm9, %v8701_v54, %v8697_v6  ;;  %v8712_v48 = vsel %vm8711_vm4, %v17621_v24, %v8708_v44  ;;  %v8722_v23 = vmul.f32 %v13079_v8, %v8721_v28  ;;  %v17682_v61 = vpop.f32.mrf.mxu1  ;;  %vm8726_vm9 = vmor %vm8724_vm0, %vm8725_vm5 }
 0x450   :  { %v8736_v7 = vsub.f32 1.0, %v8735_v34  ;;  %9097 = vst [vmem:[%s18050_s5 + $0x180] sm:$0xff] %v8702_v30  ;;  %v8717_v60 = vsel %vm17640_vm12, %v8716_v17, %v8712_v48  ;;  %vm8740_vm7 = vweird.f32 %v13081_v31  ;;  %v8750_v9 = vmul.f32 %v13083_v62, %v17617_v58 }
 0x451   :  { %vm17690_vm8 = vcmp.eq.f32.partialorder %v8758_v27, 8.507059e+37  ;;  %9098 = vst [vmem:[%s18050_s5 + $0x188] sm:$0xff] %v8717_v60  ;;  %v8723_v52 = vadd.f32 %v13079_v8, %v8722_v23  ;;  %v8761_v24 = vor.u32 1.1754944e-38, %v8760_v56  ;;  %13086 = vpow2.f32 %v17619_v42  ;;  %v17698_v51 = vpop.f32.mrf.mxu2  ;;  %vm8741_vm11 = vmor %vm8739_vm1, %vm8740_vm7 }
 0x452   :  { %v8737_v39 = vmul.f32 %v13081_v31, %v8736_v7  ;;  %v8751_v35 = vsub.f32 1.0, %v8750_v9  ;;  %vm8755_vm10 = vweird.f32 %v13083_v62  ;;  %v7470_v12 = vadd.f32 %v17512_v19, %v5932_v47  ;;  %v17713_v2 = vpop.f32.mrf.mxu3 }
 0x453   :  { %v7483_v54 = vadd.f32 %v17584_v21, %v5933_v11  ;;  %v8727_v18 = vsel %vm8726_vm9, %v13079_v8, %v8723_v52  ;;  %v8773_v42 = vand.u32 2147483647, %v17662_v63  ;;  %v7496_v45 = vadd.f32 %v17586_v49, %v5934_v22  ;;  %vm8756_vm12 = vmor %vm8754_vm6, %vm8755_vm10 }
 0x454   :  { %v8738_v57 = vadd.f32 %v13081_v31, %v8737_v39  ;;  %v8732_v43 = vsel %vm17656_vm15, %v8731_v32, %v8727_v18  ;;  %v8752_v19 = vmul.f32 %v13083_v62, %v8751_v35  ;;  %v12132_v21 = vmul.f32 -1.442695, %v7470_v12 }
 0x455   :  { %v13085_v26 = vpop.eup %13084  ;;  %v12133_v47 = vmul.f32 -1.442695, %v7483_v54  ;;  %9099 = vst [vmem:[%s18050_s5 + $0x190] sm:$0xff] %v8732_v43  ;;  %v8775_v22 = vand.u32 2147483648, %v17662_v63  ;;  %v12134_v36 = vmul.f32 -1.442695, %v7496_v45  ;;  %vm8769_vm13 = vweird.f32 %v17662_v63 }
 0x456   :  { %v8742_v11 = vsel %vm8741_vm11, %v13081_v31, %v8738_v57  ;;  %v8765_v49 = vmul.f32 %v13085_v26, %v17662_v63  ;;  %v8753_v40 = vadd.f32 %v13083_v62, %v8752_v19  ;;  %13088 = vpow2.f32 %v12132_v21  ;;  %v7536_v33 = vpop.f32.mrf.mxu0 }
 0x457   :  { %v8747_v14 = vsel %vm17668_vm3, %v8746_v41, %v8742_v11  ;;  %v5935_v15 = vperm.slane %v17581_v20, 2  ;;  %v13087_v29 = vpop.eup %13086  ;;  %13090 = vpow2.f32 %v12133_v47  ;;  %v5936_v37 = vperm.slane %v17581_v20, 3  ;;  %v7549_v0 = vpop.f32.mrf.mxu1 }
 0x458   :  { %9100 = vst [vmem:[%s18050_s5 + $0x198] sm:$0xff] %v8747_v14  ;;  %v8766_v17 = vsub.f32 1.0, %v8765_v49  ;;  %v5937_v53 = vperm.slane %v17581_v20, 4  ;;  %v8757_v1 = vsel %vm8756_vm12, %v13083_v62, %v8753_v40  ;;  %vm8770_vm0 = vweird.f32 %v13085_v26 }
 0x459   :  { %v17736_v8 = vadd.f32 1.0, %v13087_v29  ;;  %v7509_v25 = vadd.f32 %v17599_v5, %v5935_v15  ;;  %v8762_v16 = vsel %vm17690_vm8, %v8761_v24, %v8757_v1  ;;  %13092 = vpow2.f32 %v12134_v36  ;;  %v7562_v59 = vpop.f32.mrf.mxu2  ;;  %vm8771_vm14 = vmor %vm8769_vm13, %vm8770_vm0 }
 0x45a   :  { %v8767_v50 = vmul.f32 %v13085_v26, %v8766_v17  ;;  %v7522_v58 = vadd.f32 %v17610_v3, %v5936_v37  ;;  %9101 = vst [vmem:[%s18050_s5 + $0x1a0] sm:$0xff] %v8762_v16  ;;  %v7535_v5 = vadd.f32 %v7534_v46, %v5937_v53  ;;  %v7575_v31 = vpop.f32.mrf.mxu3  ;;  %vm8774_vm15 = vcmp.eq.f32.partialorder %v8773_v42, 8.507059e+37 }
 0x45b   :  { %13094 = vrcp.f32 %v17736_v8  ;;  %v12135_v32 = vmul.f32 -1.442695, %v7509_v25  ;;  %v8776_v27 = vor.u32 1.1754944e-38, %v8775_v22  ;;  %v8788_v3 = vand.u32 2147483647, %v17736_v8 }
 0x45c   :  { %v8768_v13 = vadd.f32 %v13085_v26, %v8767_v50  ;;  %v12136_v4 = vmul.f32 -1.442695, %v7522_v58  ;;  %v13089_v38 = vpop.eup %13088  ;;  %v5938_v44 = vperm.slane %v17581_v20, 5  ;;  %v8790_v63 = vand.u32 2147483648, %v17736_v8 }
 0x45d   :  { %v13091_v28 = vpop.eup %13090  ;;  %v17751_v55 = vadd.f32 1.0, %v13089_v38  ;;  %13096 = vpow2.f32 %v12135_v32  ;;  %v12137_v62 = vmul.f32 -1.442695, %v7535_v5  ;;  %vm8784_vm1 = vweird.f32 %v17736_v8 }
 0x45e   :  { %v8772_v34 = vsel %vm8771_vm14, %v13085_v26, %v8768_v13  ;;  %v17753_v6 = vadd.f32 1.0, %v13091_v28  ;;  %13098 = vpow2.f32 %v12136_v4  ;;  %v7548_v30 = vadd.f32 %v17682_v61, %v5938_v44 }
 0x45f   :  { %v8777_v56 = vsel %vm8774_vm15, %v8776_v27, %v8772_v34  ;;  %v13093_v41 = vpop.eup %13092  ;;  %13100 = vrcp.f32 %v17751_v55  ;;  %vm17763_vm2 = vcmp.eq.f32.partialorder %v8788_v3, 8.507059e+37  ;;  %v8791_v46 = vor.u32 1.1754944e-38, %v8790_v63 }
 0x460   :  { %9102 = vst [vmem:[%s18050_s5 + $0x1a8] sm:$0xff] %v8777_v56  ;;  %13102 = vrcp.f32 %v17753_v6  ;;  %v8803_v60 = vand.u32 2147483647, %v17751_v55  ;;  %v8805_v9 = vand.u32 2147483648, %v17751_v55  ;;  %v17769_v10 = vadd.f32 1.0, %v13093_v41 }
 0x461   :  { %v13095_v48 = vpop.eup %13094  ;;  %v5939_v61 = vperm.slane %v17581_v20, 6  ;;  %13104 = vpow2.f32 %v12137_v62  ;;  %v12138_v24 = vmul.f32 -1.442695, %v7548_v30  ;;  %v5940_v35 = vperm.slane %v17581_v20, 7 }
 0x462   :  { %v8780_v23 = vmul.f32 %v13095_v48, %v17736_v8  ;;  %vm8785_vm3 = vweird.f32 %v13095_v48  ;;  %vm8799_vm4 = vweird.f32 %v17751_v55  ;;  %v8818_v54 = vand.u32 2147483647, %v17753_v6 }
 0x463   :  { %v13097_v52 = vpop.eup %13096  ;;  %v8820_v18 = vand.u32 2147483648, %v17753_v6  ;;  %13106 = vrcp.f32 %v17769_v10  ;;  %vm8814_vm5 = vweird.f32 %v17753_v6  ;;  %vm17783_vm6 = vcmp.eq.f32.partialorder %v8803_v60, 8.507059e+37  ;;  %vm8786_vm7 = vmor %vm8784_vm1, %vm8785_vm3 }
 0x464   :  { %v8781_v39 = vsub.f32 1.0, %v8780_v23  ;;  %v13099_v12 = vpop.eup %13098  ;;  %v17778_v45 = vadd.f32 1.0, %v13097_v52  ;;  %13108 = vpow2.f32 %v12138_v24  ;;  %v8806_v21 = vor.u32 1.1754944e-38, %v8805_v9 }
 0x465   :  { %v13101_v57 = vpop.eup %13100  ;;  %v17780_v26 = vadd.f32 1.0, %v13099_v12  ;;  %v8833_v47 = vand.u32 2147483647, %v17769_v10  ;;  %v8835_v22 = vand.u32 2147483648, %v17769_v10  ;;  %vm17796_vm8 = vcmp.eq.f32.partialorder %v8818_v54, 8.507059e+37  ;;  %v17862_v12 = vld [vmem:[%s18049_s4 + $0x40] sm:$0xff] }
 0x466   :  { %v8782_v42 = vmul.f32 %v13095_v48, %v8781_v39  ;;  %v13103_v20 = vpop.eup %13102  ;;  %v8795_v43 = vmul.f32 %v13101_v57, %v17751_v55  ;;  %13110 = vrcp.f32 %v17778_v45  ;;  %v8821_v15 = vor.u32 1.1754944e-38, %v8820_v18 }
 0x467   :  { %v8810_v49 = vmul.f32 %v13103_v20, %v17753_v6  ;;  %v7561_v29 = vadd.f32 %v17698_v51, %v5939_v61  ;;  %v13105_v17 = vpop.eup %13104  ;;  %13112 = vrcp.f32 %v17780_v26  ;;  %v17803_v33 = vadd.f32 %v17713_v2, %v5940_v35 }
 0x468   :  { %v8783_v11 = vadd.f32 %v13095_v48, %v8782_v42  ;;  %v17791_v36 = vpop.f32.mrf.mxu0  ;;  %v8796_v14 = vsub.f32 1.0, %v8795_v43  ;;  %vm8800_vm9 = vweird.f32 %v13101_v57  ;;  %vm8829_vm10 = vweird.f32 %v17769_v10 }
 0x469   :  { %v8811_v53 = vsub.f32 1.0, %v8810_v49  ;;  %v17805_v0 = vpop.f32.mrf.mxu1  ;;  %v17807_v1 = vpop.f32.mrf.mxu2  ;;  %vm8815_vm11 = vweird.f32 %v13103_v20  ;;  %vm17818_vm12 = vcmp.eq.f32.partialorder %v8833_v47, 8.507059e+37  ;;  %v8836_v13 = vor.u32 1.1754944e-38, %v8835_v22  ;;  %vm8801_vm13 = vmor %vm8799_vm4, %vm8800_vm9 }
 0x46a   :  { %v8787_v37 = vsel %vm8786_vm7, %v13095_v48, %v8783_v11  ;;  %v13107_v8 = vpop.eup %13106  ;;  %v8797_v16 = vmul.f32 %v13101_v57, %v8796_v14  ;;  %v17812_v51 = vpop.f32.mrf.mxu3  ;;  %vm8844_vm0 = vweird.f32 %v17778_v45  ;;  %v8848_v4 = vand.u32 2147483647, %v17778_v45  ;;  %vm8816_vm15 = vmor %vm8814_vm5, %vm8815_vm11 }
 0x46b   :  { %v8792_v25 = vsel %vm17763_vm2, %v8791_v46, %v8787_v37  ;;  %v13109_v50 = vpop.eup %13108  ;;  %v8812_v2 = vmul.f32 %v13103_v20, %v8811_v53  ;;  %v8825_v58 = vmul.f32 %v13107_v8, %v17769_v10  ;;  %v8850_v5 = vand.u32 2147483648, %v17778_v45 }
 0x46c   :  { %9103 = vst [vmem:[%s18050_s5 + $0x1b0] sm:$0xff] %v8792_v25  ;;  %v8798_v32 = vadd.f32 %v13101_v57, %v8797_v16  ;;  %v17825_v31 = vadd.f32 1.0, %v13105_v17  ;;  %v13111_v38 = vpop.eup %13110  ;;  %vm8830_vm14 = vweird.f32 %v13107_v8  ;;  %v8863_v44 = vand.u32 2147483647, %v17780_v26 }
 0x46d   :  { %v8813_v27 = vadd.f32 %v13103_v20, %v8812_v2  ;;  %v8826_v3 = vsub.f32 1.0, %v8825_v58  ;;  %v8840_v34 = vmul.f32 %v13111_v38, %v17778_v45  ;;  %v8865_v63 = vand.u32 2147483648, %v17780_v26  ;;  %v13113_v41 = vpop.eup %13112  ;;  %vm8831_vm3 = vmor %vm8829_vm10, %vm8830_vm14 }
 0x46e   :  { %v8802_v28 = vsel %vm8801_vm13, %v13101_v57, %v8798_v32  ;;  %v17836_v56 = vadd.f32 1.0, %v13109_v50  ;;  %13114 = vrcp.f32 %v17825_v31  ;;  %v8855_v7 = vmul.f32 %v13113_v41, %v17780_v26 }
 0x46f   :  { %v8807_v55 = vsel %vm17783_vm6, %v8806_v21, %v8802_v28  ;;  %v8817_v62 = vsel %vm8816_vm15, %v13103_v20, %v8813_v27  ;;  %v8827_v30 = vmul.f32 %v13107_v8, %v8826_v3  ;;  %v8841_v23 = vsub.f32 1.0, %v8840_v34 }
 0x470   :  { %v7588_v48 = vpop.f32.mrf.mxu0  ;;  %9104 = vst [vmem:[%s18050_s5 + $0x1b8] sm:$0xff] %v8807_v55  ;;  %v8822_v6 = vsel %vm17796_vm8, %v8821_v15, %v8817_v62  ;;  %vm8859_vm1 = vweird.f32 %v17780_v26  ;;  %vm17851_vm2 = vcmp.eq.f32.partialorder %v8848_v4, 8.507059e+37  ;;  %v8851_v9 = vor.u32 1.1754944e-38, %v8850_v5 }
 0x471   :  { %9105 = vst [vmem:[%s18050_s5 + $0x1c0] sm:$0xff] %v8822_v6  ;;  %v8828_v46 = vadd.f32 %v13107_v8, %v8827_v30  ;;  %v12139_v61 = vmul.f32 -1.442695, %v7561_v29  ;;  %v7601_v52 = vpop.f32.mrf.mxu1  ;;  %v7614_v39 = vpop.f32.mrf.mxu2  ;;  %v8842_v24 = vmul.f32 %v13111_v38, %v8841_v23  ;;  %vm8845_vm4 = vweird.f32 %v13111_v38 }
 0x472   :  { %v8856_v35 = vsub.f32 1.0, %v8855_v7  ;;  %13116 = vrcp.f32 %v17836_v56  ;;  %v7627_v54 = vpop.f32.mrf.mxu3  ;;  %vm8860_vm5 = vweird.f32 %v13113_v41  ;;  %vm17864_vm6 = vcmp.eq.f32.partialorder %v8863_v44, 8.507059e+37  ;;  %vm8846_vm8 = vmor %vm8844_vm0, %vm8845_vm4 }
 0x473   :  { %v8832_v18 = vsel %vm8831_vm3, %v13107_v8, %v8828_v46  ;;  %v8866_v42 = vor.u32 1.1754944e-38, %v8865_v63  ;;  %v8843_v20 = vadd.f32 %v13111_v38, %v8842_v24  ;;  %vm8874_vm7 = vweird.f32 %v17825_v31  ;;  %vm8861_vm9 = vmor %vm8859_vm1, %vm8860_vm5 }
 0x474   :  { %v8837_v10 = vsel %vm17818_vm12, %v8836_v13, %v8832_v18  ;;  %v8857_v43 = vmul.f32 %v13113_v41, %v8856_v35  ;;  %v13115_v19 = vpop.eup %13114  ;;  %v8878_v21 = vand.u32 2147483647, %v17825_v31  ;;  %13118 = vpow2.f32 %v12139_v61 }
 0x475   :  { %9106 = vst [vmem:[%s18050_s5 + $0x1c8] sm:$0xff] %v8837_v10  ;;  %v12140_v47 = vmul.f32 -1.442695, %v17803_v33  ;;  %v5941_v11 = vperm.slane %v17862_v12, 0  ;;  %v8847_v49 = vsel %vm8846_vm8, %v13111_v38, %v8843_v20  ;;  %v8870_v14 = vmul.f32 %v13115_v19, %v17825_v31 }
 0x476   :  { %v8858_v22 = vadd.f32 %v13113_v41, %v8857_v43  ;;  %v8880_v40 = vand.u32 2147483648, %v17825_v31  ;;  %v8852_v15 = vsel %vm17851_vm2, %v8851_v9, %v8847_v49  ;;  %vm8889_vm10 = vweird.f32 %v17836_v56 }
 0x477   :  { %13120 = vpow2.f32 %v12140_v47  ;;  %v7587_v45 = vadd.f32 %v17791_v36, %v5941_v11  ;;  %9107 = vst [vmem:[%s18050_s5 + $0x1d0] sm:$0xff] %v8852_v15  ;;  %v8871_v37 = vsub.f32 1.0, %v8870_v14  ;;  %v5942_v53 = vperm.slane %v17862_v12, 1 }
 0x478   :  { %v13117_v29 = vpop.eup %13116  ;;  %v8862_v17 = vsel %vm8861_vm9, %v13113_v41, %v8858_v22  ;;  %v5943_v33 = vperm.slane %v17862_v12, 2  ;;  %vm17896_vm11 = vcmp.eq.f32.partialorder %v8878_v21, 8.507059e+37  ;;  %vm8875_vm12 = vweird.f32 %v13115_v19 }
 0x479   :  { %v8867_v26 = vsel %vm17864_vm6, %v8866_v42, %v8862_v17  ;;  %v8885_v36 = vmul.f32 %v13117_v29, %v17836_v56  ;;  %v12141_v25 = vmul.f32 -1.442695, %v7587_v45  ;;  %v7664_v16 = vpop.f32.mrf.mxu2  ;;  %v8872_v50 = vmul.f32 %v13115_v19, %v8871_v37  ;;  %v7638_v59 = vpop.f32.mrf.mxu0  ;;  %vm8876_vm0 = vmor %vm8874_vm7, %vm8875_vm12 }
 0x47a   :  { %9108 = vst [vmem:[%s18050_s5 + $0x1d8] sm:$0xff] %v8867_v26  ;;  %v7600_v2 = vadd.f32 %v17805_v0, %v5942_v53  ;;  %v5944_v58 = vperm.slane %v17862_v12, 3  ;;  %v7651_v13 = vpop.f32.mrf.mxu1  ;;  %v13119_v32 = vpop.eup %13118  ;;  %v8895_v5 = vand.u32 2147483648, %v17836_v56  ;;  %v7613_v38 = vadd.f32 %v17807_v1, %v5943_v33 }
 0x47b   :  { %v8886_v4 = vsub.f32 1.0, %v8885_v36  ;;  %13122 = vpow2.f32 %v12141_v25  ;;  %v17908_v27 = vpop.f32.mrf.mxu3  ;;  %v8873_v3 = vadd.f32 %v13115_v19, %v8872_v50  ;;  %v17910_v44 = vadd.f32 1.0, %v13119_v32 }
 0x47c   :  { %v12142_v28 = vmul.f32 -1.442695, %v7600_v2  ;;  %v5945_v34 = vperm.slane %v17862_v12, 4  ;;  %v8881_v63 = vor.u32 1.1754944e-38, %v8880_v40  ;;  %vm8890_vm13 = vweird.f32 %v13117_v29 }
 0x47d   :  { %v13121_v0 = vpop.eup %13120  ;;  %v8887_v41 = vmul.f32 %v13117_v29, %v8886_v4  ;;  %v8893_v55 = vand.u32 2147483647, %v17836_v56  ;;  %v8877_v62 = vsel %vm8876_vm0, %v13115_v19, %v8873_v3  ;;  %13124 = vrcp.f32 %v17910_v44  ;;  %vm8891_vm14 = vmor %vm8889_vm10, %vm8890_vm13 }
 0x47e   :  { %v7626_v1 = vadd.f32 %v17812_v51, %v5944_v58  ;;  %v5946_v30 = vperm.slane %v17862_v12, 5  ;;  %v8882_v48 = vsel %vm17896_vm11, %v8881_v63, %v8877_v62  ;;  %v17922_v23 = vadd.f32 1.0, %v13121_v0 }
 0x47f   :  { %v8888_v6 = vadd.f32 %v13117_v29, %v8887_v41  ;;  %v12143_v31 = vmul.f32 -1.442695, %v7613_v38  ;;  %9109 = vst [vmem:[%s18050_s5 + $0x1e0] sm:$0xff] %v8882_v48  ;;  %v8896_v7 = vor.u32 1.1754944e-38, %v8895_v5  ;;  %13126 = vpow2.f32 %v12142_v28 }
 0x480   :  { %v7639_v46 = vadd.f32 %v7638_v59, %v5945_v34  ;;  %vm8894_vm15 = vcmp.eq.f32.partialorder %v8893_v55, 8.507059e+37  ;;  %13128 = vrcp.f32 %v17922_v23  ;;  %v12144_v39 = vmul.f32 -1.442695, %v7626_v1 }
 0x481   :  { %v13123_v51 = vpop.eup %13122  ;;  %v8892_v60 = vsel %vm8891_vm14, %v13117_v29, %v8888_v6  ;;  %v7666_v9 = vpop.f32.mrf.mxu2  ;;  %13130 = vpow2.f32 %v12143_v31  ;;  %v7652_v56 = vadd.f32 %v7651_v13, %v5946_v30  ;;  %v5947_v54 = vperm.slane %v17862_v12, 6 }
 0x482   :  { %v8897_v61 = vsel %vm8894_vm15, %v8896_v7, %v8892_v60  ;;  %v17930_v52 = vadd.f32 1.0, %v13123_v51  ;;  %v7640_v24 = vpop.f32.mrf.mxu0  ;;  %v7653_v35 = vpop.f32.mrf.mxu1  ;;  %v8908_v42 = vand.u32 2147483647, %v17910_v44  ;;  %v8910_v10 = vand.u32 2147483648, %v17910_v44 }
 0x483   :  { %9110 = vst [vmem:[%s18050_s5 + $0x1e8] sm:$0xff] %v8897_v61  ;;  %v7679_v18 = vpop.f32.mrf.mxu3  ;;  %v13125_v57 = vpop.eup %13124  ;;  %v12145_v20 = vmul.f32 -1.442695, %v7639_v46  ;;  %v7665_v21 = vadd.f32 %v7664_v16, %v5947_v54  ;;  %vm8904_vm1 = vweird.f32 %v17910_v44  ;;  %v12146_v22 = vmul.f32 -1.442695, %v7652_v56 }
 0x484   :  { %13132 = vrcp.f32 %v17930_v52  ;;  %v8900_v43 = vmul.f32 %v13125_v57, %v17910_v44  ;;  %vm17943_vm2 = vcmp.eq.f32.partialorder %v8908_v42, 8.507059e+37  ;;  %v8911_v40 = vor.u32 1.1754944e-38, %v8910_v10 }
 0x485   :  { %v13127_v19 = vpop.eup %13126  ;;  %13134 = vpow2.f32 %v12144_v39  ;;  %vm8905_vm3 = vweird.f32 %v13125_v57  ;;  %v8925_v17 = vand.u32 2147483648, %v17922_v23  ;;  %vm8919_vm4 = vweird.f32 %v17922_v23 }
 0x486   :  { %v13129_v47 = vpop.eup %13128  ;;  %v8901_v11 = vsub.f32 1.0, %v8900_v43  ;;  %v17941_v49 = vadd.f32 1.0, %v13127_v19  ;;  %13136 = vpow2.f32 %v12145_v20  ;;  %v12147_v26 = vmul.f32 -1.442695, %v7665_v21  ;;  %vm8906_vm5 = vmor %vm8904_vm1, %vm8905_vm3 }
 0x487   :  { %v8915_v15 = vmul.f32 %v13129_v47, %v17922_v23  ;;  %v13131_v45 = vpop.eup %13130  ;;  %v8923_v36 = vand.u32 2147483647, %v17922_v23  ;;  %vm8920_vm6 = vweird.f32 %v13129_v47  ;;  %v5948_v2 = vperm.slane %v17862_v12, 7 }
 0x488   :  { %v8902_v29 = vmul.f32 %v13125_v57, %v8901_v11  ;;  %13138 = vrcp.f32 %v17941_v49  ;;  %v17951_v33 = vadd.f32 1.0, %v13131_v45  ;;  %v8926_v59 = vor.u32 1.1754944e-38, %v8925_v17  ;;  %vm8921_vm7 = vmor %vm8919_vm4, %vm8920_vm6 }
 0x489   :  { %v8916_v53 = vsub.f32 1.0, %v8915_v15  ;;  %13140 = vpow2.f32 %v12146_v22  ;;  %v8940_v32 = vand.u32 2147483648, %v17930_v52  ;;  %v8938_v28 = vand.u32 2147483647, %v17930_v52 }
 0x48a   :  { %v13133_v37 = vpop.eup %13132  ;;  %v8903_v8 = vadd.f32 %v13125_v57, %v8902_v29  ;;  %13142 = vrcp.f32 %v17951_v33  ;;  %vm8924_vm9 = vcmp.eq.f32.partialorder %v8923_v36, 8.507059e+37  ;;  %vm8934_vm10 = vweird.f32 %v17930_v52 }
 0x48b   :  { %v8930_v25 = vmul.f32 %v13133_v37, %v17930_v52  ;;  %v13135_v16 = vpop.eup %13134  ;;  %v8917_v50 = vmul.f32 %v13129_v47, %v8916_v53  ;;  %13144 = vpow2.f32 %v12147_v26  ;;  %vm8935_vm8 = vweird.f32 %v13133_v37 }
 0x48c   :  { %v8907_v58 = vsel %vm8906_vm5, %v13125_v57, %v8903_v8  ;;  %v13137_v4 = vpop.eup %13136  ;;  %v17962_v3 = vadd.f32 1.0, %v13135_v16  ;;  %v8953_v1 = vand.u32 2147483647, %v17941_v49  ;;  %vm8936_vm11 = vmor %vm8934_vm10, %vm8935_vm8  ;;  %v8941_v48 = vor.u32 1.1754944e-38, %v8940_v32 }
 0x48d   :  { %v8931_v13 = vsub.f32 1.0, %v8930_v25  ;;  %v8912_v5 = vsel %vm17943_vm2, %v8911_v40, %v8907_v58  ;;  %v8918_v38 = vadd.f32 %v13129_v47, %v8917_v50  ;;  %v17970_v34 = vadd.f32 1.0, %v13137_v4 }
 0x48e   :  { %v13139_v44 = vpop.eup %13138  ;;  %9111 = vst [vmem:[%s18050_s5 + $0x1f0] sm:$0xff] %v8912_v5  ;;  %13146 = vrcp.f32 %v17962_v3  ;;  %v8955_v23 = vand.u32 2147483648, %v17941_v49  ;;  %vm8939_vm12 = vcmp.eq.f32.partialorder %v8938_v28, 8.507059e+37  ;;  %v7678_v46 = vadd.f32 %v17908_v27, %v5948_v2 }
 0x48f   :  { %v8932_v12 = vmul.f32 %v13133_v37, %v8931_v13  ;;  %v8922_v0 = vsel %vm8921_vm7, %v13129_v47, %v8918_v38  ;;  %v8945_v63 = vmul.f32 %v13139_v44, %v17941_v49  ;;  %v13141_v41 = vpop.eup %13140  ;;  %13148 = vrcp.f32 %v17970_v34 }
 0x490   :  { %v8927_v55 = vsel %vm8924_vm9, %v8926_v59, %v8922_v0  ;;  %v13143_v30 = vpop.eup %13142  ;;  %vm8950_vm0 = vweird.f32 %v13139_v44  ;;  %v8968_v61 = vand.u32 2147483647, %v17951_v33  ;;  %vm8949_vm13 = vweird.f32 %v17941_v49 }
 0x491   :  { %v8933_v62 = vadd.f32 %v13133_v37, %v8932_v12  ;;  %9112 = vst [vmem:[%s18050_s5 + $0x1f8] sm:$0xff] %v8927_v55  ;;  %v8946_v6 = vsub.f32 1.0, %v8945_v63  ;;  %v8960_v7 = vmul.f32 %v13143_v30, %v17951_v33  ;;  %v13145_v51 = vpop.eup %13144  ;;  %vm17988_vm14 = vcmp.eq.f32.partialorder %v8953_v1, 8.507059e+37  ;;  %vm8951_vm15 = vmor %vm8949_vm13, %vm8950_vm0 }
 0x492   :  { %v17992_v24 = vadd.f32 1.0, %v13141_v41  ;;  %v8956_v56 = vor.u32 1.1754944e-38, %v8955_v23  ;;  %v8970_v54 = vand.u32 2147483648, %v17951_v33  ;;  %v17995_v18 = vadd.f32 1.0, %v13145_v51 }
 0x493   :  { %v8937_v31 = vsel %vm8936_vm11, %v13133_v37, %v8933_v62  ;;  %v8947_v9 = vmul.f32 %v13139_v44, %v8946_v6  ;;  %v8961_v39 = vsub.f32 1.0, %v8960_v7  ;;  %vm8964_vm1 = vweird.f32 %v17951_v33 }
 0x494   :  { %v8942_v60 = vsel %vm8939_vm12, %v8941_v48, %v8937_v31  ;;  %v13147_v27 = vpop.eup %13146  ;;  %vm8965_vm2 = vweird.f32 %v13143_v30  ;;  %vm17999_vm3 = vcmp.eq.f32.partialorder %v8968_v61, 8.507059e+37  ;;  %13150 = vrcp.f32 %v17992_v24 }
 0x495   :  { %9113 = vst [vmem:[%s18050_s5 + $0x200] sm:$0xff] %v8942_v60  ;;  %v8948_v35 = vadd.f32 %v13139_v44, %v8947_v9  ;;  %v8962_v57 = vmul.f32 %v13143_v30, %v8961_v39  ;;  %v8975_v42 = vmul.f32 %v13147_v27, %v17962_v3  ;;  %v13149_v10 = vpop.eup %13148  ;;  %v12148_v19 = vmul.f32 -1.442695, %v7678_v46  ;;  %vm8966_vm4 = vmor %vm8964_vm1, %vm8965_vm2 }
 0x496   :  { %v8990_v49 = vmul.f32 %v13149_v10, %v17970_v34  ;;  %v8971_v22 = vor.u32 1.1754944e-38, %v8970_v54  ;;  %v8983_v14 = vand.u32 2147483647, %v17962_v3  ;;  %v8985_v40 = vand.u32 2147483648, %v17962_v3 }
 0x497   :  { %v8952_v20 = vsel %vm8951_vm15, %v13139_v44, %v8948_v35  ;;  %v8963_v47 = vadd.f32 %v13143_v30, %v8962_v57  ;;  %v8976_v11 = vsub.f32 1.0, %v8975_v42  ;;  %13152 = vrcp.f32 %v17995_v18 }
 0x498   :  { %v8957_v21 = vsel %vm17988_vm14, %v8956_v56, %v8952_v20  ;;  %vm8980_vm5 = vweird.f32 %v13147_v27  ;;  %v8991_v29 = vsub.f32 1.0, %v8990_v49  ;;  %vm8979_vm6 = vweird.f32 %v17962_v3 }
 0x499   :  { %9114 = vst [vmem:[%s18050_s5 + $0x208] sm:$0xff] %v8957_v21  ;;  %v8967_v15 = vsel %vm8966_vm4, %v13143_v30, %v8963_v47  ;;  %v8977_v45 = vmul.f32 %v13147_v27, %v8976_v11  ;;  %v8998_v37 = vand.u32 2147483647, %v17970_v34  ;;  %v9000_v53 = vand.u32 2147483648, %v17970_v34  ;;  %vm8981_vm8 = vmor %vm8979_vm6, %vm8980_vm5 }
 0x49a   :  { %v8972_v17 = vsel %vm17999_vm3, %v8971_v22, %v8967_v15  ;;  %v8992_v26 = vmul.f32 %v13149_v10, %v8991_v29  ;;  %vm8995_vm7 = vweird.f32 %v13149_v10  ;;  %13154 = vpow2.f32 %v12148_v19  ;;  %v13151_v8 = vpop.eup %13150 }
 0x49b   :  { %9115 = vst [vmem:[%s18050_s5 + $0x210] sm:$0xff] %v8972_v17  ;;  %v8978_v33 = vadd.f32 %v13147_v27, %v8977_v45  ;;  %v8986_v36 = vor.u32 1.1754944e-38, %v8985_v40  ;;  %vm8994_vm9 = vweird.f32 %v17970_v34  ;;  %vm8984_vm10 = vcmp.eq.f32.partialorder %v8983_v14, 8.507059e+37 }
 0x49c   :  { %v8993_v16 = vadd.f32 %v13149_v10, %v8992_v26  ;;  %v9005_v50 = vmul.f32 %v13151_v8, %v17992_v24  ;;  %vm8996_vm11 = vmor %vm8994_vm9, %vm8995_vm7  ;;  %v9001_v59 = vor.u32 1.1754944e-38, %v9000_v53  ;;  %vm8999_vm12 = vcmp.eq.f32.partialorder %v8998_v37, 8.507059e+37 }
 0x49d   :  { %v8982_v25 = vsel %vm8981_vm8, %v13147_v27, %v8978_v33  ;;  %v13153_v2 = vpop.eup %13152  ;;  %v9015_v38 = vand.u32 2147483648, %v17992_v24  ;;  %vm9010_vm0 = vweird.f32 %v13151_v8  ;;  %v9013_v12 = vand.u32 2147483647, %v17992_v24 }
 0x49e   :  { %v8987_v58 = vsel %vm8984_vm10, %v8986_v36, %v8982_v25  ;;  %v8997_v13 = vsel %vm8996_vm11, %v13149_v10, %v8993_v16  ;;  %v9006_v32 = vsub.f32 1.0, %v9005_v50  ;;  %v9020_v4 = vmul.f32 %v13153_v2, %v17995_v18 }
 0x49f   :  { %9116 = vst [vmem:[%s18050_s5 + $0x218] sm:$0xff] %v8987_v58  ;;  %v9002_v5 = vsel %vm8999_vm12, %v9001_v59, %v8997_v13  ;;  %vm9009_vm13 = vweird.f32 %v17992_v24  ;;  %v9030_v34 = vand.u32 2147483648, %v17995_v18  ;;  %vm9025_vm14 = vweird.f32 %v13153_v2 }
 0x4a0   :  { %v13155_v3 = vpop.eup %13154  ;;  %9117 = vst [vmem:[%s18050_s5 + $0x220] sm:$0xff] %v9002_v5  ;;  %v9007_v44 = vmul.f32 %v13151_v8, %v9006_v32  ;;  %v9021_v28 = vsub.f32 1.0, %v9020_v4  ;;  %v9028_v55 = vand.u32 2147483647, %v17995_v18  ;;  %vm9011_vm15 = vmor %vm9009_vm13, %vm9010_vm0  ;;  %v9016_v62 = vor.u32 1.1754944e-38, %v9015_v38 }
 0x4a1   :  { %v7968_v0 = vadd.f32 1.0, %v13155_v3  ;;  %vm9014_vm1 = vcmp.eq.f32.partialorder %v9013_v12, 8.507059e+37  ;;  %vm9024_vm2 = vweird.f32 %v17995_v18  ;;  %v9031_v6 = vor.u32 1.1754944e-38, %v9030_v34 }
 0x4a2   :  { %v9008_v63 = vadd.f32 %v13151_v8, %v9007_v44  ;;  %v9022_v41 = vmul.f32 %v13153_v2, %v9021_v28  ;;  %vm9026_vm3 = vmor %vm9024_vm2, %vm9025_vm14  ;;  %vm9029_vm4 = vcmp.eq.f32.partialorder %v9028_v55, 8.507059e+37 }
 0x4a3   :  { %13156 = vrcp.f32 %v7968_v0  ;;  %v9045_v60 = vand.u32 2147483648, %v7968_v0  ;;  %v9043_v61 = vand.u32 2147483647, %v7968_v0  ;;  %vm9039_vm6 = vweird.f32 %v7968_v0 }
 0x4a4   :  { %v9012_v1 = vsel %vm9011_vm15, %v13151_v8, %v9008_v63  ;;  %v9023_v30 = vadd.f32 %v13153_v2, %v9022_v41 }
 0x4a5   :  { %v9017_v48 = vsel %vm9014_vm1, %v9016_v62, %v9012_v1  ;;  %v9046_v39 = vor.u32 1.1754944e-38, %v9045_v60  ;;  %vm9044_vm8 = vcmp.eq.f32.partialorder %v9043_v61, 8.507059e+37 }
 0x4a6   :  { %9118 = vst [vmem:[%s18050_s5 + $0x228] sm:$0xff] %v9017_v48  ;;  %v9027_v23 = vsel %vm9026_vm3, %v13153_v2, %v9023_v30 }
 0x4a7   :  { %v9032_v31 = vsel %vm9029_vm4, %v9031_v6, %v9027_v23 }
 0x4a8   :  { %9119 = vst [vmem:[%s18050_s5 + $0x230] sm:$0xff] %v9032_v31 }
 0x4a9   :  { %v13157_v7 = vpop.eup %13156 }
 0x4aa   :  { %v9035_v46 = vmul.f32 %v13157_v7, %v7968_v0  ;;  %vm9040_vm5 = vweird.f32 %v13157_v7 }
 0x4ab   :  { %vm9041_vm7 = vmor %vm9039_vm6, %vm9040_vm5 }
 0x4ac   :  { %v9036_v51 = vsub.f32 1.0, %v9035_v46 }
 0x4ae   :  { %v9037_v9 = vmul.f32 %v13157_v7, %v9036_v51 }
 0x4b0   :  { %v9038_v52 = vadd.f32 %v13157_v7, %v9037_v9 }
 0x4b2   :  { %v9042_v24 = vsel %vm9041_vm7, %v13157_v7, %v9038_v52 }
 0x4b3   :  { %v9047_v27 = vsel %vm9044_vm8, %v9046_v39, %v9042_v24 }
 0x4b4   :  { %9120 = vst [vmem:[%s18050_s5 + $0x238] sm:$0xff] %v9047_v27 }

</bundles_post_ra>
